<compile_context>
chip_gen: v7x
topology: tpu7x:2x2x1
jax: 0.10.0
libtpu: 0.0.40
codegen_flags: <defaults>
</compile_context>

<pallas_src>
import numpy as np
import jax
import jax.numpy as jnp
from jax.experimental import pallas as pl
from jax.experimental.pallas import tpu as pltpu

# ---- MelSpectrogram hyper-parameters (from the PyTorch module __init__) ----
SAMPLE_RATE = 16000
N_FFT = 1024
WIN_LENGTH = 1024
HOP_LENGTH = 256
N_MELS = 64
F_MIN = 0.0
F_MAX = SAMPLE_RATE / 2.0
N_FREQS = N_FFT // 2 + 1          # 513 one-sided rFFT bins
N_FREQS_PAD = 640                 # 513 -> 640 (multiple of 128) for lane alignment
N_MELS_PAD = 128                  # 64 -> 128 so output stores are full-lane
MAX_TM = 256                      # max frames per grid step (fills 256-row MXU)


# -------------------- deterministic parameter construction --------------------
def _hann_window(n):
    i = np.arange(n, dtype=np.float64)
    return 0.5 * (1.0 - np.cos(2.0 * np.pi * i / n))


def _hz_to_mel(f):   # HTK scale (torchaudio default)
    return 2595.0 * np.log10(1.0 + np.asarray(f, np.float64) / 700.0)


def _mel_to_hz(m):
    return 700.0 * (10.0 ** (np.asarray(m, np.float64) / 2595.0) - 1.0)


def _mel_filterbank():
    """torchaudio.functional.melscale_fbanks (htk, norm=None): (n_freqs, n_mels)."""
    all_freqs = np.linspace(0.0, SAMPLE_RATE // 2, N_FREQS)
    m_pts = np.linspace(_hz_to_mel(F_MIN), _hz_to_mel(F_MAX), N_MELS + 2)
    f_pts = _mel_to_hz(m_pts)
    f_diff = f_pts[1:] - f_pts[:-1]                       # (n_mels+1,)
    slopes = f_pts[None, :] - all_freqs[:, None]          # (n_freqs, n_mels+2)
    down = -slopes[:, :-2] / f_diff[:-1]
    up = slopes[:, 2:] / f_diff[1:]
    return np.maximum(0.0, np.minimum(down, up))          # (n_freqs, n_mels)


def _build_constants():
    """Fused, window-folded DFT matrix and zero-padded mel filterbank (f32)."""
    n = np.arange(N_FFT, dtype=np.float64)[:, None]
    k = np.arange(N_FREQS, dtype=np.float64)[None, :]
    ang = 2.0 * np.pi * n * k / N_FFT
    win = _hann_window(N_FFT)[:, None]                    # fold Hann into the weights
    cs = np.zeros((N_FFT, 2 * N_FREQS_PAD), np.float64)
    cs[:, :N_FREQS] = np.cos(ang) * win                   # real part weights
    cs[:, N_FREQS_PAD:N_FREQS_PAD + N_FREQS] = -np.sin(ang) * win   # imag part weights
    fb = np.zeros((N_FREQS_PAD, N_MELS_PAD), np.float64)
    fb[:N_FREQS, :N_MELS] = _mel_filterbank()
    return cs.astype(np.float32), fb.astype(np.float32)


_CS_NP, _FB_NP = _build_constants()


# ------------------------------ Pallas kernel ---------------------------------
def mel_kernel(frames_ref, cossin_ref, fb_ref, out_ref):
    # frames_ref: (TM, N_FFT)                       -- frame tile
    # cossin_ref: (N_FFT, 2*N_FREQS_PAD)  (VMEM-resident, Hann folded in)
    # fb_ref:     (N_FREQS_PAD, N_MELS_PAD)         (VMEM-resident)
    # out_ref:    (TM, N_MELS_PAD)
    spec = jnp.dot(frames_ref[...], cossin_ref[...],
                   preferred_element_type=jnp.float32)       # one fused MXU matmul
    re = spec[:, :N_FREQS_PAD]                               # lane-aligned static slices
    im = spec[:, N_FREQS_PAD:]
    power = re * re + im * im                                # power spectrogram (power=2)
    mel = jnp.dot(power, fb_ref[...], preferred_element_type=jnp.float32)
    out_ref[...] = jnp.log(jnp.maximum(mel, 1e-5))           # clamp(min=1e-5).log()


# ------------------------------ wrapper helpers --------------------------------
def _frame(wav):
    """center=True framing: reflect pad by n_fft//2, strided (T, N_FFT) windows."""
    B, L = wav.shape
    pad = N_FFT // 2
    padded = jnp.pad(wav, ((0, 0), (pad, pad)), mode="reflect")
    T = 1 + L // HOP_LENGTH
    idx = jnp.arange(T)[:, None] * HOP_LENGTH + jnp.arange(N_FFT)[None, :]
    return padded[:, idx]                                    # (B, T, N_FFT)


def _choose_tm(num_frames):
    """Fill the MXU (up to MAX_TM frame-rows/step) but keep >= 2 grid steps when
    possible (so v7x's two TensorCores both get work); multiple of 8 sublanes."""
    tm = ((num_frames + 1) // 2 + 7) // 8 * 8
    return int(max(8, min(MAX_TM, tm)))


# ------------------------------ wrapper ("forward") ---------------------------
def featurizer_forward(wav, length=None):
    """wav: (B, L) float32.  Returns (B, n_mels, T) log-mel; optionally (mel, length)."""
    wav = wav.astype(jnp.float32)
    B, L = wav.shape

    frames = _frame(wav)                          # (B, T, N_FFT)
    T = frames.shape[1]
    frames = frames.reshape(B * T, N_FFT)

    M = B * T
    tm = _choose_tm(M)
    m_pad = ((M + tm - 1) // tm) * tm
    frames = jnp.pad(frames, ((0, m_pad - M), (0, 0)))

    cs = jnp.asarray(_CS_NP)                      # (N_FFT, 2*N_FREQS_PAD) f32
    fb = jnp.asarray(_FB_NP)                      # (N_FREQS_PAD, N_MELS_PAD) f32

    out = pl.pallas_call(
        mel_kernel,
        out_shape=jax.ShapeDtypeStruct((m_pad, N_MELS_PAD), jnp.float32),
        grid_spec=pltpu.PrefetchScalarGridSpec(
            num_scalar_prefetch=0,
            grid=(m_pad // tm,),
            in_specs=[
                pl.BlockSpec((tm, N_FFT), lambda i: (i, 0)),
                # Constant weights: whole array resident in VMEM once
                # (no per-step re-DMA, no double buffering).
                pl.BlockSpec(memory_space=pltpu.MemorySpace.VMEM),
                pl.BlockSpec(memory_space=pltpu.MemorySpace.VMEM),
            ],
            out_specs=pl.BlockSpec((tm, N_MELS_PAD), lambda i: (i, 0)),
        ),
        compiler_params=pltpu.CompilerParams(
            dimension_semantics=("parallel",),
            vmem_limit_bytes=32 << 20,            # headroom even on v7x (64 MiB physical)
        ),
    )(frames, cs, fb)

    mel_spec = out[:M, :N_MELS].reshape(B, T, N_MELS)
    mel_spec = jnp.transpose(mel_spec, (0, 2, 1))  # (B, n_mels, time) like torchaudio

    if length is not None:
        new_length = (length - WIN_LENGTH) // HOP_LENGTH
        new_length = new_length + 1 + 4            # exactly as in the PyTorch module
        return mel_spec, new_length
    return mel_spec


# ------------------------------ pure-JAX reference -----------------------------
def _reference_logmel(wav):
    frames = _frame(wav.astype(jnp.float32))                 # (B, T, N_FFT)
    cs = jnp.asarray(_CS_NP)
    fb = jnp.asarray(_FB_NP)[:, :N_MELS]
    spec = jnp.einsum("btn,nf->btf", frames, cs, precision=jax.lax.Precision.HIGHEST)
    re = spec[..., :N_FREQS_PAD]
    im = spec[..., N_FREQS_PAD:]
    mel = jnp.einsum("btf,fm->btm", re * re + im * im, fb,
                     precision=jax.lax.Precision.HIGHEST)
    return jnp.transpose(jnp.log(jnp.maximum(mel, 1e-5)), (0, 2, 1))


if __name__ == "__main__":
    key = jax.random.PRNGKey(0)
    B, L = 2, 4096                                   # small waveform: 2 x 4096 samples
    wav = jax.random.normal(key, (B, L), dtype=jnp.float32)
    length = jnp.array([4096, 3072], dtype=jnp.int32)

    mel = featurizer_forward(wav)                    # (2, 64, 17)
    mel2, out_len = featurizer_forward(wav, length)
    jax.block_until_ready(mel)
    jax.block_until_ready(mel2)
    jax.block_until_ready(out_len)

    T = 1 + L // HOP_LENGTH
    assert mel.shape == (B, N_MELS, T), mel.shape
    assert bool(jnp.all(jnp.isfinite(mel)))

    ref = jax.block_until_ready(_reference_logmel(wav))
    max_err = float(jnp.max(jnp.abs(mel - ref)))
    assert max_err < 1e-2, f"log-mel mismatch vs reference: {max_err}"

    print("KERNEL_OK")
</pallas_src>

<mosaic_0001>
module attributes {stable_mosaic.version = 11 : i64} {
  func.func @mel_kernel(%arg0: i32, %arg1: memref<24x1024xf32, #tpu.memory_space<vmem>>, %arg2: memref<1024x1280xf32, #tpu.memory_space<vmem>>, %arg3: memref<640x128xf32, #tpu.memory_space<vmem>>, %arg4: memref<24x128xf32, #tpu.memory_space<vmem>>) attributes {dimension_semantics = [#tpu.dimension_semantics<parallel>], iteration_bounds = array<i64: 2>, scalar_prefetch = 0 : i64, scratch_operands = 0 : i64, tpu.core_type = #tpu.core_type<tc>, window_params = [{transform_indices = @transform_0, window_bounds = array<i64: 24, 1024>}, {pipeline_mode = #tpu.pipeline_mode<synchronous>, transform_indices = @transform_1, window_bounds = array<i64: 1024, 1280>}, {pipeline_mode = #tpu.pipeline_mode<synchronous>, transform_indices = @transform_2, window_bounds = array<i64: 640, 128>}, {transform_indices = @transform_3, window_bounds = array<i64: 24, 128>}]} {
    %c0 = arith.constant 0 : index
    %c0_0 = arith.constant 0 : index
    %0 = vector.load %arg1[%c0, %c0_0] : memref<24x1024xf32, #tpu.memory_space<vmem>>, vector<24x1024xf32>
    %c0_1 = arith.constant 0 : index
    %c0_2 = arith.constant 0 : index
    %1 = vector.load %arg2[%c0_1, %c0_2] : memref<1024x1280xf32, #tpu.memory_space<vmem>>, vector<1024x1280xf32>
    %cst = arith.constant dense<0.000000e+00> : vector<24x1280xf32>
    %2 = tpu.matmul %0, %1, %cst {dimension_numbers = #tpu.dot_dimension_numbers<[1], [0], [0], [1], [0, 0, 1, 1], [], []>} : vector<24x1024xf32>, vector<1024x1280xf32>, vector<24x1280xf32> -> vector<24x1280xf32>
    %3 = vector.extract_strided_slice %2 {offsets = [0, 0], sizes = [24, 640], strides = [1, 1]} : vector<24x1280xf32> to vector<24x640xf32>
    %4 = vector.extract_strided_slice %2 {offsets = [0, 640], sizes = [24, 640], strides = [1, 1]} : vector<24x1280xf32> to vector<24x640xf32>
    %5 = arith.mulf %3, %3 : vector<24x640xf32>
    %6 = arith.mulf %4, %4 : vector<24x640xf32>
    %7 = arith.addf %5, %6 : vector<24x640xf32>
    %c0_3 = arith.constant 0 : index
    %c0_4 = arith.constant 0 : index
    %8 = vector.load %arg3[%c0_3, %c0_4] : memref<640x128xf32, #tpu.memory_space<vmem>>, vector<640x128xf32>
    %cst_5 = arith.constant dense<0.000000e+00> : vector<24x128xf32>
    %9 = tpu.matmul %7, %8, %cst_5 {dimension_numbers = #tpu.dot_dimension_numbers<[1], [0], [0], [1], [0, 0, 1, 1], [], []>} : vector<24x640xf32>, vector<640x128xf32>, vector<24x128xf32> -> vector<24x128xf32>
    %cst_6 = arith.constant 9.99999974E-6 : f32
    %10 = vector.broadcast %cst_6 : f32 to vector<24x128xf32>
    %11 = arith.maximumf %9, %10 : vector<24x128xf32>
    %12 = math.log %11 : vector<24x128xf32>
    %c0_7 = arith.constant 0 : index
    %c0_8 = arith.constant 0 : index
    %13 = vector.load %arg4[%c0_7, %c0_8] : memref<24x128xf32, #tpu.memory_space<vmem>>, vector<24x128xf32>
    tpu.vector_store %arg4[%c0_7, %c0_8], %12 {strides = array<i32>} : memref<24x128xf32, #tpu.memory_space<vmem>>, vector<24x128xf32>,
    return
  }
  func.func @transform_0(%arg0: i32) -> (i32, i32) {
    %c0_i32 = arith.constant 0 : i32
    %c0_i32_0 = arith.constant 0 : i32
    return %arg0, %c0_i32 : i32, i32
  }
  func.func @transform_1(%arg0: i32) -> (i32, i32) {
    %c0_i32 = arith.constant 0 : i32
    %c0_i32_0 = arith.constant 0 : i32
    %c0_i32_1 = arith.constant 0 : i32
    return %c0_i32, %c0_i32_0 : i32, i32
  }
  func.func @transform_2(%arg0: i32) -> (i32, i32) {
    %c0_i32 = arith.constant 0 : i32
    %c0_i32_0 = arith.constant 0 : i32
    %c0_i32_1 = arith.constant 0 : i32
    return %c0_i32, %c0_i32_0 : i32, i32
  }
  func.func @transform_3(%arg0: i32) -> (i32, i32) {
    %c0_i32 = arith.constant 0 : i32
    %c0_i32_0 = arith.constant 0 : i32
    return %arg0, %c0_i32 : i32, i32
  }
}

</mosaic_0001>

<bundles_post_ra>
// kernel: tpu_custom_call.1
= control target key start
LH: loop header
LB: loop body
LE: loop exit
PB: predicated region body
PF: predicated region fallthrough
CT: control target
= control target key end

     0   :  { %8 = vsyncpa [#allocation3], 0  ;;  %s6171_s0 = inlined_call_operand.hbm [shape: f32[48,1024], index: 0, kind: input, shape index: {}]   ;;  %s6172_s1 = inlined_call_operand.hbm [shape: f32[1024,1280], index: 1, kind: input, shape index: {}]   ;;  %s6173_s2 = inlined_call_operand.hbm [shape: f32[640,128], index: 2, kind: input, shape index: {}]   ;;  %s6174_s3 = inlined_call_operand.hbm [shape: f32[48,128], index: 3, kind: output, shape index: {}]  }
   0x1   :  { %10 = vsyncpa [#allocation3 + $0x1], 0 }
   0x2   :  { %11 = vsyncpa [#allocation6], 0 }
   0x3   :  { %12 = vsyncpa [#allocation4], 0 }
   0x4   :  { %14 = vsyncpa [#allocation4 + $0x1], 0  ;;  %s5638_s12 = smov 0   ;;  %s5640_s13 = smov 0  }
   0x5   :  { %s5642_s14 = smov 0   ;;  %s5644_s15 = smov 0  }
   0x6 LB: > { %s5659_s16 = sadd.s32 4294967295, %s5601_s15   ;;  %s3668_s17 = sadd.s32 4294967294, %s5601_s15   ;;  %s5601_s15 = sphi %s5644_s15, %s6194_s15   ;;  %s5597_s14 = sphi %s5642_s14, %s6193_s14   ;;  %s5593_s13 = sphi %s5640_s13, %s6192_s13   ;;  %s5589_s12 = sphi %s5638_s12, %s6191_s12  }
   0x7   : > { %p40_p0 = scmp.ne.s32.totalorder %s5593_s13, %s5589_s12  ;;  %p6175_p1 = scmp.eq.s32.totalorder %s5659_s16, 0 }
   0x8   : > { %p112_p3 = scmp.eq.s32.totalorder %s3668_s17, 1  ;;  %p3669_p5 = scmp.ge.s32.totalorder %s5601_s15, 1 }
   0x9   : > { %p5668_p4 = por %p6175_p1, %p40_p0  ;;  %p119_p7 = scmp.lt.s32.totalorder %s5601_s15, 3 }
   0xa   : > { %p5673_p6 = por %p112_p3, %p40_p0  ;;  %s5603_s21 = smov [#allocation5]  }
   0xb   : > { %s6178_s18 = scalar_select %p5668_p4, 1, 0 }
   0xc   : > { %s6179_s19 = scalar_select %p5673_p6, 1, 0 }
   0xd   : > { %p5678_p8 = pnand %p3669_p5, %p119_p7  ;;  %s131_s22 = sshll.u32 %s5603_s21, 4  ;;  %s5682_s22 = int_to_ptr.vmem [resolvable:$true] %s131_s22 }
   0xe   : > { %s5604_s24 = smov [#allocation7]   ;;  %s5445_s28 = scalar_lea.hbm %s6172_s1, 163840 }
   0xf   : > { %p5300_p9 = pneg %p5678_p8  ;;  %s144_s25 = sshll.u32 %s5604_s24, 4  ;;  %s5693_s25 = int_to_ptr.vmem [resolvable:$true] %s144_s25 }
  0x10   : > { %p5446_p12 = scmp.ne.s32.totalorder %s6172_s1, %s5445_s28  ;;  %p5452_p5 = scmp.lt.u32.totalorder %s5445_s28, %s6172_s1 }
  0x11   : > { %p5689_p11 = pnand %p5300_p9, %p6175_p1 }
  0x13   : > { %p5447_p13 = pneg %p5689_p11 }
  0x15   : > { %p5448_p0 = pnand %p5447_p13, %p5446_p12 }
  0x17   : > { %p5449_p3 = pneg %p5448_p0 }
  0x19   : > { %p5454_p7 = pnand %p5452_p5, %p5449_p3 }
  0x1b   : > { %5457 = shalt.err (!%p5454_p7)
}
  0x1c   : > { %s5458_s6 = scalar_lea.vmem %s5682_s22, 163840  ;;  %p5466_p2 = scmp.lt.s32.totalorder %s5682_s22, %s5682_s22 }
  0x1d   : > { %p5459_p9 = scmp.ne.s32.totalorder %s5682_s22, %s5458_s6  ;;  %p5467_p12 = scmp.lt.s32.totalorder %s5458_s6, %s5458_s6 }
  0x1f   : > { %p5461_p10 = pnand %p5459_p9, %p5447_p13  ;;  %p5468_p0 = por %p5467_p12, %p5466_p2 }
  0x21   : > { %p5462_p1 = pneg %p5461_p10 }
  0x23   : > { %p5469_p6 = pnand %p5468_p0, %p5462_p1 }
  0x25   : > { %5472 = shalt.err (!%p5469_p6)
}
  0x26   : > { %s5605_s7 = smov 1280   ;;  %s5606_s8 = smov 80  }
  0x27   : > { %5303 = dma.hbm_to_vmem [thread:$0]  (!%p5689_p11), %s6172_s1, 163840, %s5682_s22, [#allocation6], %s5605_s7, %s5605_s7, %s5606_s8  }
  0x28   : > { %s5473_s21 = scalar_lea.hbm %s6173_s2, 10240 }
  0x29   : > { %p5474_p2 = scmp.ne.s32.totalorder %s6173_s2, %s5473_s21  ;;  %p5480_p10 = scmp.lt.u32.totalorder %s5473_s21, %s6173_s2 }
  0x2b   : > { %p5476_p1 = pnand %p5474_p2, %p5447_p13 }
  0x2d   : > { %p5477_p6 = pneg %p5476_p1 }
  0x2f   : > { %p5482_p3 = pnand %p5480_p10, %p5477_p6 }
  0x31   : > { %5485 = shalt.err (!%p5482_p3)
}
  0x32   : > { %s5486_s22 = scalar_lea.vmem %s5693_s25, 10240  ;;  %p5494_p12 = scmp.lt.s32.totalorder %s5693_s25, %s5693_s25 }
  0x33   : > { %p5487_p5 = scmp.ne.s32.totalorder %s5693_s25, %s5486_s22  ;;  %p5495_p0 = scmp.lt.s32.totalorder %s5486_s22, %s5486_s22 }
  0x35   : > { %p5489_p7 = pnand %p5487_p5, %p5447_p13  ;;  %p5496_p2 = por %p5495_p0, %p5494_p12 }
  0x37   : > { %p5490_p9 = pneg %p5489_p7 }
  0x39   : > { %p5497_p1 = pnand %p5496_p2, %p5490_p9 }
  0x3b   : > { %5500 = shalt.err (!%p5497_p1)
}
  0x3c   : > { %s5607_s29 = smov 128   ;;  %s5608_s30 = smov 8  }
  0x3d   : > { %5306 = dma.hbm_to_vmem [thread:$0]  (!%p5689_p11), %s6173_s2, 10240, %s5693_s25, [#allocation6], %s5607_s29, %s5607_s29, %s5608_s30  }
  0x3e   : > { %s5748_s6 = sadd.s32 1, %s5601_s15   ;;  %s27_s8 = sadd.s32 1, %s5597_s14 }
  0x3f   : > { %s24_s7 = ssub.s32 %s5601_s15, %s5748_s6  ;;  %p34_p6 = scmp.ne.s32.totalorder %s5597_s14, %s5593_s13 }
  0x40   : > { %p25_p13 = scmp.eq.s32.totalorder %s24_s7, 0  ;;  %p35_p10 = scmp.eq.s32.totalorder %s5601_s15, 0 }
  0x41   : > { %p6182_p5 = scmp.eq.s32.totalorder %s5659_s16, 1  ;;  %p5317_p9 = scmp.lt.s32.totalorder %s5601_s15, 2 }
  0x42   : > { %s5757_s9 = scalar_select %p25_p13, %s5597_s14, %s27_s8  }
  0x43   : > { %p36_p3 = por %p35_p10, %p34_p6  ;;  %p5761_p7 = por %p6182_p5, %p34_p6 }
  0x44   : > { %s158_s23 = sand.u32 1, %s5597_s14   ;;  %s3684_s25 = smul.u32 3072, %s5601_s15 }
  0x45   : > { %s6183_s10 = scalar_select %p5761_p7, 1, 0 }
  0x46   : > { %s5285_s11 = smul.u32 192, %s158_s23  ;;  %p5768_p11 = pnand %p5317_p9, %p36_p3 }
  0x47   : > { %s5775_s26 = scalar_lea.hbm %s6171_s0, %s3684_s25  ;;  %s5779_s22 = scalar_lea.sflag [#allocation3], %s158_s23 }
  0x48   : > { %s162_s27 = scalar_lea.vmem [#allocation2], %s5285_s11  ;;  %s5501_s29 = scalar_lea.hbm %s5775_s26, 3072 }
  0x49   : > { %s170_s28 = sshll.u32 %s162_s27, 4  ;;  %p5502_p12 = scmp.ne.s32.totalorder %s5775_s26, %s5501_s29  ;;  %s5777_s28 = int_to_ptr.vmem [resolvable:$true] %s170_s28 }
  0x4a   : > { %p5503_p0 = pneg %p5768_p11  ;;  %s5506_s5 = scalar_lea.hbm %s6171_s0, 6144 }
  0x4b   : > { %p5507_p13 = scmp.lt.u32.totalorder %s5775_s26, %s6171_s0  ;;  %p5508_p6 = scmp.lt.u32.totalorder %s5506_s5, %s5501_s29 }
  0x4c   : > { %p5504_p2 = pnand %p5503_p0, %p5502_p12  ;;  %p5510_p3 = scmp.lt.u32.totalorder %s5501_s29, %s5775_s26 }
  0x4d   : > { %p5509_p10 = por %p5508_p6, %p5507_p13 }
  0x4e   : > { %p5505_p1 = pneg %p5504_p2 }
  0x4f   : > { %p5511_p5 = por %p5510_p3, %p5509_p10 }
  0x51   : > { %p5512_p9 = pnand %p5511_p5, %p5505_p1 }
  0x53   : > { %5515 = shalt.err (!%p5512_p9)
}
  0x54   : > { %s5516_s23 = scalar_lea.vmem %s5777_s28, 3072  ;;  %s5609_s11 = smov [#allocation2]  }
  0x55   : > { %p5517_p12 = scmp.ne.s32.totalorder %s5777_s28, %s5516_s23  ;;  %s5521_s25 = sshll.u32 %s5609_s11, 4  ;;  %s5522_s25 = int_to_ptr.vmem [resolvable:$false] %s5521_s25 }
  0x56   : > { %s5523_s21 = scalar_lea.vmem %s5522_s25, 6144  ;;  %p5524_p4 = scmp.lt.s32.totalorder %s5777_s28, %s5522_s25 }
  0x57   : > { %p5519_p2 = pnand %p5517_p12, %p5503_p0  ;;  %p5525_p13 = scmp.lt.s32.totalorder %s5523_s21, %s5516_s23 }
  0x59   : > { %p5520_p7 = pneg %p5519_p2  ;;  %p5526_p6 = por %p5525_p13, %p5524_p4 }
  0x5b   : > { %p5527_p10 = pnand %p5526_p6, %p5520_p7 }
  0x5d   : > { %5530 = shalt.err (!%p5527_p10)
}
  0x5e   : > { %s5610_s24 = smov 1024   ;;  %s5611_s27 = smov 64  }
  0x5f   : > { %5310 = dma.hbm_to_vmem [thread:$0]  (!%p5768_p11), %s5775_s26, 3072, %s5777_s28, %s5779_s22, %s5610_s24, %s5610_s24, %s5611_s27  }
  0x60   : > { %182 = sbr.rel (%p5678_p8) target bundleno = 1317 (0x525), region = 32  ;;  %s5810_s29 = sand.u32 (!%p5678_p8), 1, %s5593_s13  }
  0x61   : > { %s5286_s30 = smul.u32 (!%p5678_p8), 192, %s5810_s29  ;;  %s185_s4 = scalar_lea.sflag (!%p5678_p8), [#allocation3], %s5810_s29 }
  0x62   : > { %p6185_p4 = scmp.ne.s32.totalorder (!%p5678_p8), %s6178_s18, 0 }
  0x63   : > { %s5814_s5 = scalar_lea.vmem (!%p5678_p8), [#allocation2], %s5286_s30 }
  0x67   : > { %5576 = dma.done.wait (%p6185_p4), %s185_s4, 3072  }
  0x68   : > { %5578 = vsyncadd (%p6185_p4), %s185_s4, 4294964224  ;;  %p6186_p7 = scmp.eq.s32.totalorder %s5659_s16, 0 }
  0x6a   : > { %5580 = dma.done.wait (%p6186_p7), [#allocation6], 174080   ;;  %p6187_p8 = pmov %p6186_p7 }
  0x6b   : > { %v246_v0 = vld [vmem:[#allocation5 + $0x8] sm:$0xff]  ;;  %v256_v1 = vld [vmem:[#allocation5 + $0x58] sm:$0xff]  ;;  %v245_v5 = vld [vmem:[#allocation5] sm:$0xff]  ;;  %vm5613_vm0 = vmmov 0   ;;  %s5287_s18 = smul.u32 24, %s5810_s29  ;;  %s3563_s8 = scalar_lea.sflag [#allocation4], %s5810_s29 }
  0x6c   : > { %5582 = vsyncadd (%p6187_p8), [#allocation6], 4294793216  ;;  %v566_v2 = vld [vmem:[#allocation5 + $0xa08] sm:$0xff]  ;;  %v3827_v3 = vpack.c.bf16 %v256_v1, %v246_v0  ;;  %v576_v4 = vld [vmem:[#allocation5 + $0xa58] sm:$0xff]  ;;  %s3683_s26 = smul.u32 384, %s5659_s16  ;;  %p6188_p0 = scmp.ne.s32.totalorder %s6183_s10, 0 }
  0x6d   : > { %v255_v6 = vld [vmem:[#allocation5 + $0x50] sm:$0xff]  ;;  %v3891_v7 = vpack.c.bf16 %v576_v4, %v566_v2  ;;  %v565_v9 = vld [vmem:[#allocation5 + $0xa00] sm:$0xff]  ;;  %v266_v11 = vld [vmem:[#allocation5 + $0xa8] sm:$0xff]  ;;  %s218_s20 = scalar_lea.vmem [#allocation8], %s5287_s18  ;;  %s5615_s16 = smov [#allocation8]  }
  0x6e   : > { %v3829_v8 = vpack.c.bf16 %v255_v6, %v245_v5  ;;  %v575_v10 = vld [vmem:[#allocation5 + $0xa50] sm:$0xff]  ;;  %3828 = vmatprep.subr.bf16.mxu1 %v3827_v3  ;;  %v276_v13 = vld [vmem:[#allocation5 + $0xf8] sm:$0xff]  ;;  %v586_v14 = vld [vmem:[#allocation5 + $0xaa8] sm:$0xff]  ;;  %s3576_s17 = sshll.u32 %s218_s20, 4  ;;  %s6127_s7 = scalar_lea.hbm %s6174_s3, %s3683_s26  ;;  %s6122_s17 = int_to_ptr.vmem [resolvable:$true] %s3576_s17 }
  0x6f   : > { %v3893_v12 = vpack.c.bf16 %v575_v10, %v565_v9  ;;  %v596_v15 = vld [vmem:[#allocation5 + $0xaf8] sm:$0xff]  ;;  %3892 = vmatprep.subr.bf16.mxu0 %v3891_v7  ;;  %v3831_v16 = vpack.c.bf16 %v276_v13, %v266_v11  ;;  %v265_v18 = vld [vmem:[#allocation5 + $0xa0] sm:$0xff]  ;;  %v275_v19 = vld [vmem:[#allocation5 + $0xf0] sm:$0xff]  ;;  %s5531_s23 = scalar_lea.vmem %s6122_s17, 384  ;;  %s5535_s11 = sshll.u32 %s5615_s16, 4  ;;  %s5536_s11 = int_to_ptr.vmem [resolvable:$false] %s5535_s11 }
  0x70   : > { %3830 = vmatpush1.bf16.msra.mxu1 %v3829_v8  ;;  %v3895_v17 = vpack.c.bf16 %v596_v15, %v586_v14  ;;  %v585_v20 = vld [vmem:[#allocation5 + $0xaa0] sm:$0xff]  ;;  %v3833_v21 = vpack.c.bf16 %v275_v19, %v265_v18  ;;  %v595_v22 = vld [vmem:[#allocation5 + $0xaf0] sm:$0xff]  ;;  %v286_v23 = vld [vmem:[#allocation5 + $0x148] sm:$0xff]  ;;  %p5532_p11 = scmp.ne.s32.totalorder %s6122_s17, %s5531_s23  ;;  %s5537_s25 = scalar_lea.vmem %s5536_s11, 768 }
  0x71   : > { %3894 = vmatpush1.bf16.msra.mxu0 %v3893_v12  ;;  %v296_v24 = vld [vmem:[#allocation5 + $0x198] sm:$0xff]  ;;  %3832 = vmatprep.subr.bf16.mxu1 %v3831_v16  ;;  %v3897_v25 = vpack.c.bf16 %v595_v22, %v585_v20  ;;  %v606_v27 = vld [vmem:[#allocation5 + $0xb48] sm:$0xff]  ;;  %v285_v29 = vld [vmem:[#allocation5 + $0x140] sm:$0xff]  ;;  %p5538_p5 = scmp.lt.s32.totalorder %s6122_s17, %s5536_s11  ;;  %p5539_p9 = scmp.lt.s32.totalorder %s5537_s25, %s5531_s23 }
  0x72   : > { %3896 = vmatprep.subr.bf16.mxu0 %v3895_v17  ;;  %v3835_v26 = vpack.c.bf16 %v296_v24, %v286_v23  ;;  %v616_v28 = vld [vmem:[#allocation5 + $0xb98] sm:$0xff]  ;;  %v295_v31 = vld [vmem:[#allocation5 + $0x190] sm:$0xff]  ;;  %v605_v32 = vld [vmem:[#allocation5 + $0xb40] sm:$0xff]  ;;  %p5533_p1 = pnand %p5532_p11, %p6188_p0 }
  0x73   : > { %v3899_v30 = vpack.c.bf16 %v616_v28, %v606_v27  ;;  %v615_v33 = vld [vmem:[#allocation5 + $0xb90] sm:$0xff]  ;;  %v3837_v34 = vpack.c.bf16 %v295_v31, %v285_v29  ;;  %v306_v35 = vld [vmem:[#allocation5 + $0x1e8] sm:$0xff]  ;;  %v316_v36 = vld [vmem:[#allocation5 + $0x238] sm:$0xff]  ;;  %p5540_p12 = por %p5539_p9, %p5538_p5 }
  0x74   : > { %3834 = vmatpush1.bf16.msra.mxu1 %v3833_v21  ;;  %v626_v37 = vld [vmem:[#allocation5 + $0xbe8] sm:$0xff]  ;;  %v3901_v38 = vpack.c.bf16 %v615_v33, %v605_v32  ;;  %v3839_v39 = vpack.c.bf16 %v316_v36, %v306_v35  ;;  %v636_v40 = vld [vmem:[#allocation5 + $0xc38] sm:$0xff]  ;;  %v305_v41 = vld [vmem:[#allocation5 + $0x1e0] sm:$0xff]  ;;  %p5534_p3 = pneg %p5533_p1 }
  0x75   : > { %3898 = vmatpush1.bf16.msra.mxu0 %v3897_v25  ;;  %3836 = vmatprep.subr.bf16.mxu1 %v3835_v26  ;;  %v315_v42 = vld [vmem:[#allocation5 + $0x230] sm:$0xff]  ;;  %v3903_v43 = vpack.c.bf16 %v636_v40, %v626_v37  ;;  %v625_v44 = vld [vmem:[#allocation5 + $0xbe0] sm:$0xff]  ;;  %v326_v46 = vld [vmem:[#allocation5 + $0x288] sm:$0xff] }
  0x76   : > { %3900 = vmatprep.subr.bf16.mxu0 %v3899_v30  ;;  %v635_v45 = vld [vmem:[#allocation5 + $0xc30] sm:$0xff]  ;;  %v336_v47 = vld [vmem:[#allocation5 + $0x2d8] sm:$0xff]  ;;  %v646_v48 = vld [vmem:[#allocation5 + $0xc88] sm:$0xff]  ;;  %v3841_v50 = vpack.c.bf16 %v315_v42, %v305_v41  ;;  %p5541_p2 = pnand %p5540_p12, %p5534_p3 }
  0x77   : > { %v656_v49 = vld [vmem:[#allocation5 + $0xcd8] sm:$0xff]  ;;  %v3905_v51 = vpack.c.bf16 %v635_v45, %v625_v44  ;;  %v3843_v52 = vpack.c.bf16 %v336_v47, %v326_v46  ;;  %v325_v53 = vld [vmem:[#allocation5 + $0x280] sm:$0xff]  ;;  %v335_v54 = vld [vmem:[#allocation5 + $0x2d0] sm:$0xff] }
  0x78   : > { %3838 = vmatpush1.bf16.msra.mxu1 %v3837_v34  ;;  %v645_v55 = vld [vmem:[#allocation5 + $0xc80] sm:$0xff]  ;;  %v3907_v56 = vpack.c.bf16 %v656_v49, %v646_v48  ;;  %v655_v57 = vld [vmem:[#allocation5 + $0xcd0] sm:$0xff]  ;;  %v346_v58 = vld [vmem:[#allocation5 + $0x328] sm:$0xff]  ;;  %v3845_v62 = vpack.c.bf16 %v335_v54, %v325_v53 }
  0x79   : > { %3902 = vmatpush1.bf16.msra.mxu0 %v3901_v38  ;;  %3840 = vmatprep.subr.bf16.mxu1 %v3839_v39  ;;  %v356_v59 = vld [vmem:[#allocation5 + $0x378] sm:$0xff]  ;;  %v666_v60 = vld [vmem:[#allocation5 + $0xd28] sm:$0xff]  ;;  %v3909_v63 = vpack.c.bf16 %v655_v57, %v645_v55  ;;  %v345_v1 = vld [vmem:[#allocation5 + $0x320] sm:$0xff] }
  0x7a   : > { %3904 = vmatprep.subr.bf16.mxu0 %v3903_v43  ;;  %v676_v61 = vld [vmem:[#allocation5 + $0xd78] sm:$0xff]  ;;  %v3847_v0 = vpack.c.bf16 %v356_v59, %v346_v58  ;;  %v355_v2 = vld [vmem:[#allocation5 + $0x370] sm:$0xff]  ;;  %v665_v3 = vld [vmem:[#allocation5 + $0xd20] sm:$0xff] }
  0x7b   : > { %v3911_v4 = vpack.c.bf16 %v676_v61, %v666_v60  ;;  %v675_v5 = vld [vmem:[#allocation5 + $0xd70] sm:$0xff]  ;;  %v366_v6 = vld [vmem:[#allocation5 + $0x3c8] sm:$0xff]  ;;  %v376_v7 = vld [vmem:[#allocation5 + $0x418] sm:$0xff]  ;;  %v3849_v10 = vpack.c.bf16 %v355_v2, %v345_v1 }
  0x7c   : > { %3842 = vmatpush1.bf16.msra.mxu1 %v3841_v50  ;;  %v686_v8 = vld [vmem:[#allocation5 + $0xdc8] sm:$0xff]  ;;  %v696_v9 = vld [vmem:[#allocation5 + $0xe18] sm:$0xff]  ;;  %v3913_v11 = vpack.c.bf16 %v675_v5, %v665_v3  ;;  %v3851_v12 = vpack.c.bf16 %v376_v7, %v366_v6  ;;  %v365_v13 = vld [vmem:[#allocation5 + $0x3c0] sm:$0xff] }
  0x7d   : > { %3906 = vmatpush1.bf16.msra.mxu0 %v3905_v51  ;;  %3844 = vmatprep.subr.bf16.mxu1 %v3843_v52  ;;  %v375_v14 = vld [vmem:[#allocation5 + $0x410] sm:$0xff]  ;;  %v685_v15 = vld [vmem:[#allocation5 + $0xdc0] sm:$0xff]  ;;  %v3915_v16 = vpack.c.bf16 %v696_v9, %v686_v8  ;;  %v386_v18 = vld [vmem:[#allocation5 + $0x468] sm:$0xff] }
  0x7e   : > { %3908 = vmatprep.subr.bf16.mxu0 %v3907_v56  ;;  %v695_v17 = vld [vmem:[#allocation5 + $0xe10] sm:$0xff]  ;;  %v396_v19 = vld [vmem:[#allocation5 + $0x4b8] sm:$0xff]  ;;  %v706_v20 = vld [vmem:[#allocation5 + $0xe68] sm:$0xff]  ;;  %v3853_v22 = vpack.c.bf16 %v375_v14, %v365_v13 }
  0x7f   : > { %v716_v21 = vld [vmem:[#allocation5 + $0xeb8] sm:$0xff]  ;;  %v3917_v23 = vpack.c.bf16 %v695_v17, %v685_v15  ;;  %v3855_v24 = vpack.c.bf16 %v396_v19, %v386_v18  ;;  %v385_v25 = vld [vmem:[#allocation5 + $0x460] sm:$0xff]  ;;  %v395_v26 = vld [vmem:[#allocation5 + $0x4b0] sm:$0xff] }
  0x80   : > { %3846 = vmatpush1.bf16.msra.mxu1 %v3845_v62  ;;  %v705_v27 = vld [vmem:[#allocation5 + $0xe60] sm:$0xff]  ;;  %v3919_v28 = vpack.c.bf16 %v716_v21, %v706_v20  ;;  %v715_v29 = vld [vmem:[#allocation5 + $0xeb0] sm:$0xff]  ;;  %v406_v30 = vld [vmem:[#allocation5 + $0x508] sm:$0xff]  ;;  %v3857_v34 = vpack.c.bf16 %v395_v26, %v385_v25 }
  0x81   : > { %3910 = vmatpush1.bf16.msra.mxu0 %v3909_v63  ;;  %3848 = vmatprep.subr.bf16.mxu1 %v3847_v0  ;;  %v416_v31 = vld [vmem:[#allocation5 + $0x558] sm:$0xff]  ;;  %v726_v32 = vld [vmem:[#allocation5 + $0xf08] sm:$0xff]  ;;  %v3921_v35 = vpack.c.bf16 %v715_v29, %v705_v27  ;;  %v405_v37 = vld [vmem:[#allocation5 + $0x500] sm:$0xff] }
  0x82   : > { %3912 = vmatprep.subr.bf16.mxu0 %v3911_v4  ;;  %v736_v33 = vld [vmem:[#allocation5 + $0xf58] sm:$0xff]  ;;  %v3859_v36 = vpack.c.bf16 %v416_v31, %v406_v30  ;;  %v415_v38 = vld [vmem:[#allocation5 + $0x550] sm:$0xff]  ;;  %v725_v39 = vld [vmem:[#allocation5 + $0xf00] sm:$0xff] }
  0x83   : > { %v3923_v40 = vpack.c.bf16 %v736_v33, %v726_v32  ;;  %v735_v41 = vld [vmem:[#allocation5 + $0xf50] sm:$0xff]  ;;  %v426_v42 = vld [vmem:[#allocation5 + $0x5a8] sm:$0xff]  ;;  %v436_v43 = vld [vmem:[#allocation5 + $0x5f8] sm:$0xff]  ;;  %v3861_v46 = vpack.c.bf16 %v415_v38, %v405_v37 }
  0x84   : > { %3850 = vmatpush1.bf16.msra.mxu1 %v3849_v10  ;;  %v746_v44 = vld [vmem:[#allocation5 + $0xfa8] sm:$0xff]  ;;  %v756_v45 = vld [vmem:[#allocation5 + $0xff8] sm:$0xff]  ;;  %v3925_v47 = vpack.c.bf16 %v735_v41, %v725_v39  ;;  %v3863_v48 = vpack.c.bf16 %v436_v43, %v426_v42  ;;  %v425_v49 = vld [vmem:[#allocation5 + $0x5a0] sm:$0xff] }
  0x85   : > { %3914 = vmatpush1.bf16.msra.mxu0 %v3913_v11  ;;  %3852 = vmatprep.subr.bf16.mxu1 %v3851_v12  ;;  %v435_v50 = vld [vmem:[#allocation5 + $0x5f0] sm:$0xff]  ;;  %v745_v51 = vld [vmem:[#allocation5 + $0xfa0] sm:$0xff]  ;;  %v3927_v52 = vpack.c.bf16 %v756_v45, %v746_v44  ;;  %v446_v54 = vld [vmem:[#allocation5 + $0x648] sm:$0xff] }
  0x86   : > { %3916 = vmatprep.subr.bf16.mxu0 %v3915_v16  ;;  %v755_v53 = vld [vmem:[#allocation5 + $0xff0] sm:$0xff]  ;;  %v456_v55 = vld [vmem:[#allocation5 + $0x698] sm:$0xff]  ;;  %v766_v56 = vld [vmem:[#allocation5 + $0x1048] sm:$0xff]  ;;  %v3865_v58 = vpack.c.bf16 %v435_v50, %v425_v49 }
  0x87   : > { %v776_v57 = vld [vmem:[#allocation5 + $0x1098] sm:$0xff]  ;;  %v3929_v59 = vpack.c.bf16 %v755_v53, %v745_v51  ;;  %v3867_v60 = vpack.c.bf16 %v456_v55, %v446_v54  ;;  %v445_v61 = vld [vmem:[#allocation5 + $0x640] sm:$0xff]  ;;  %v455_v62 = vld [vmem:[#allocation5 + $0x690] sm:$0xff] }
  0x88   : > { %3854 = vmatpush1.bf16.msra.mxu1 %v3853_v22  ;;  %v765_v63 = vld [vmem:[#allocation5 + $0x1040] sm:$0xff]  ;;  %v3931_v0 = vpack.c.bf16 %v776_v57, %v766_v56  ;;  %v775_v1 = vld [vmem:[#allocation5 + $0x1090] sm:$0xff]  ;;  %v466_v2 = vld [vmem:[#allocation5 + $0x6e8] sm:$0xff]  ;;  %v3869_v6 = vpack.c.bf16 %v455_v62, %v445_v61 }
  0x89   : > { %3918 = vmatpush1.bf16.msra.mxu0 %v3917_v23  ;;  %3856 = vmatprep.subr.bf16.mxu1 %v3855_v24  ;;  %v476_v3 = vld [vmem:[#allocation5 + $0x738] sm:$0xff]  ;;  %v786_v4 = vld [vmem:[#allocation5 + $0x10e8] sm:$0xff]  ;;  %v465_v7 = vld [vmem:[#allocation5 + $0x6e0] sm:$0xff]  ;;  %v3933_v8 = vpack.c.bf16 %v775_v1, %v765_v63 }
  0x8a   : > { %3920 = vmatprep.subr.bf16.mxu0 %v3919_v28  ;;  %v796_v5 = vld [vmem:[#allocation5 + $0x1138] sm:$0xff]  ;;  %v3871_v9 = vpack.c.bf16 %v476_v3, %v466_v2  ;;  %v475_v10 = vld [vmem:[#allocation5 + $0x730] sm:$0xff]  ;;  %v785_v11 = vld [vmem:[#allocation5 + $0x10e0] sm:$0xff] }
  0x8b   : > { %v795_v12 = vld [vmem:[#allocation5 + $0x1130] sm:$0xff]  ;;  %v3935_v13 = vpack.c.bf16 %v796_v5, %v786_v4  ;;  %v486_v14 = vld [vmem:[#allocation5 + $0x788] sm:$0xff]  ;;  %v496_v15 = vld [vmem:[#allocation5 + $0x7d8] sm:$0xff]  ;;  %v3873_v20 = vpack.c.bf16 %v475_v10, %v465_v7 }
  0x8c   : > { %3858 = vmatpush1.bf16.msra.mxu1 %v3857_v34  ;;  %v5825_v16 = vld [vmem:[%s5814_s5 + $0x8] sm:$0xff]  ;;  %v816_v18 = vld [vmem:[#allocation5 + $0x11d8] sm:$0xff]  ;;  %v3937_v21 = vpack.c.bf16 %v795_v12, %v785_v11  ;;  %v3875_v22 = vpack.c.bf16 %v496_v15, %v486_v14  ;;  %v485_v23 = vld [vmem:[#allocation5 + $0x780] sm:$0xff] }
  0x8d   : > { %3922 = vmatpush1.bf16.msra.mxu0 %v3921_v35  ;;  %3860 = vmatprep.subr.bf16.mxu1 %v3859_v36  ;;  %v806_v17 = vld [vmem:[#allocation5 + $0x1188] sm:$0xff]  ;;  %v5829_v19 = vld [vmem:[%s5814_s5 + $0x18] sm:$0xff]  ;;  %v495_v24 = vld [vmem:[#allocation5 + $0x7d0] sm:$0xff] }
  0x8e   : > { %3924 = vmatprep.subr.bf16.mxu0 %v3923_v40  ;;  %1589 = vmatprep.mubr.f32.mxu1 %v5825_v16  ;;  %v805_v25 = vld [vmem:[#allocation5 + $0x1180] sm:$0xff]  ;;  %v3939_v26 = vpack.c.bf16 %v816_v18, %v806_v17  ;;  %v815_v27 = vld [vmem:[#allocation5 + $0x11d0] sm:$0xff]  ;;  %v506_v28 = vld [vmem:[#allocation5 + $0x828] sm:$0xff]  ;;  %v3877_v32 = vpack.c.bf16 %v495_v24, %v485_v23 }
  0x8f   : > { %1672 = vmatprep.mubr.f32.mxu0 %v5829_v19  ;;  %v516_v29 = vld [vmem:[#allocation5 + $0x878] sm:$0xff]  ;;  %v826_v30 = vld [vmem:[#allocation5 + $0x1228] sm:$0xff]  ;;  %v3941_v33 = vpack.c.bf16 %v815_v27, %v805_v25  ;;  %v505_v35 = vld [vmem:[#allocation5 + $0x820] sm:$0xff] }
  0x90   : > { %3862 = vmatpush1.bf16.msra.mxu1 %v3861_v46  ;;  %v836_v31 = vld [vmem:[#allocation5 + $0x1278] sm:$0xff]  ;;  %v3879_v34 = vpack.c.bf16 %v516_v29, %v506_v28  ;;  %v515_v36 = vld [vmem:[#allocation5 + $0x870] sm:$0xff]  ;;  %v825_v37 = vld [vmem:[#allocation5 + $0x1220] sm:$0xff] }
  0x91   : > { %3926 = vmatpush1.bf16.msra.mxu0 %v3925_v47  ;;  %3864 = vmatprep.subr.bf16.mxu1 %v3863_v48  ;;  %v3943_v38 = vpack.c.bf16 %v836_v31, %v826_v30  ;;  %v835_v39 = vld [vmem:[#allocation5 + $0x1270] sm:$0xff]  ;;  %v526_v40 = vld [vmem:[#allocation5 + $0x8c8] sm:$0xff]  ;;  %v536_v41 = vld [vmem:[#allocation5 + $0x918] sm:$0xff]  ;;  %v3881_v44 = vpack.c.bf16 %v515_v36, %v505_v35 }
  0x92   : > { %3928 = vmatprep.subr.bf16.mxu0 %v3927_v52  ;;  %v846_v42 = vld [vmem:[#allocation5 + $0x12c8] sm:$0xff]  ;;  %v856_v43 = vld [vmem:[#allocation5 + $0x1318] sm:$0xff]  ;;  %v3945_v45 = vpack.c.bf16 %v835_v39, %v825_v37  ;;  %v3883_v46 = vpack.c.bf16 %v536_v41, %v526_v40  ;;  %v525_v47 = vld [vmem:[#allocation5 + $0x8c0] sm:$0xff] }
  0x93   : > { %v535_v48 = vld [vmem:[#allocation5 + $0x910] sm:$0xff]  ;;  %v845_v49 = vld [vmem:[#allocation5 + $0x12c0] sm:$0xff]  ;;  %v3947_v50 = vpack.c.bf16 %v856_v43, %v846_v42  ;;  %v546_v52 = vld [vmem:[#allocation5 + $0x968] sm:$0xff] }
  0x94   : > { %3866 = vmatpush1.bf16.msra.mxu1 %v3865_v58  ;;  %v855_v51 = vld [vmem:[#allocation5 + $0x1310] sm:$0xff]  ;;  %v556_v53 = vld [vmem:[#allocation5 + $0x9b8] sm:$0xff]  ;;  %v866_v54 = vld [vmem:[#allocation5 + $0x1368] sm:$0xff]  ;;  %v3885_v56 = vpack.c.bf16 %v535_v48, %v525_v47 }
  0x95   : > { %3930 = vmatpush1.bf16.msra.mxu0 %v3929_v59  ;;  %3868 = vmatprep.subr.bf16.mxu1 %v3867_v60  ;;  %v876_v55 = vld [vmem:[#allocation5 + $0x13b8] sm:$0xff]  ;;  %v3949_v57 = vpack.c.bf16 %v855_v51, %v845_v49  ;;  %v3887_v58 = vpack.c.bf16 %v556_v53, %v546_v52  ;;  %v545_v59 = vld [vmem:[#allocation5 + $0x960] sm:$0xff]  ;;  %v555_v60 = vld [vmem:[#allocation5 + $0x9b0] sm:$0xff] }
  0x96   : > { %3932 = vmatprep.subr.bf16.mxu0 %v3931_v0  ;;  %v865_v61 = vld [vmem:[#allocation5 + $0x1360] sm:$0xff]  ;;  %v3951_v62 = vpack.c.bf16 %v876_v55, %v866_v54  ;;  %v875_v63 = vld [vmem:[#allocation5 + $0x13b0] sm:$0xff]  ;;  %v248_v0 = vld [vmem:[#allocation5 + $0x18] sm:$0xff]  ;;  %v3889_v4 = vpack.c.bf16 %v555_v60, %v545_v59 }
  0x97   : > { %v258_v1 = vld [vmem:[#allocation5 + $0x68] sm:$0xff]  ;;  %v896_v3 = vld [vmem:[#allocation5 + $0x1458] sm:$0xff]  ;;  %v3953_v5 = vpack.c.bf16 %v875_v63, %v865_v61  ;;  %v885_v7 = vld [vmem:[#allocation5 + $0x1400] sm:$0xff] }
  0x98   : > { %3870 = vmatpush1.bf16.msra.mxu1 %v3869_v6  ;;  %v886_v2 = vld [vmem:[#allocation5 + $0x1408] sm:$0xff]  ;;  %v4083_v6 = vpack.c.bf16 %v258_v1, %v248_v0  ;;  %v895_v11 = vld [vmem:[#allocation5 + $0x1450] sm:$0xff]  ;;  %v268_v12 = vld [vmem:[#allocation5 + $0xb8] sm:$0xff] }
  0x99   : > { %3934 = vmatpush1.bf16.msra.mxu0 %v3933_v8  ;;  %3872 = vmatprep.subr.bf16.mxu1 %v3871_v9  ;;  %v247_v8 = vld [vmem:[#allocation5 + $0x10] sm:$0xff]  ;;  %v257_v9 = vld [vmem:[#allocation5 + $0x60] sm:$0xff]  ;;  %v3955_v10 = vpack.c.bf16 %v896_v3, %v886_v2  ;;  %v906_v14 = vld [vmem:[#allocation5 + $0x14a8] sm:$0xff] }
  0x9a   : > { %3936 = vmatprep.subr.bf16.mxu0 %v3935_v13  ;;  %v278_v13 = vld [vmem:[#allocation5 + $0x108] sm:$0xff]  ;;  %v916_v15 = vld [vmem:[#allocation5 + $0x14f8] sm:$0xff]  ;;  %v5833_v17 = vld [vmem:[%s5814_s5] sm:$0xff] }
  0x9b   : > { %v223_v18 = vld [vmem:[%s5814_s5 + $0x10] sm:$0xff]  ;;  %v905_v23 = vld [vmem:[#allocation5 + $0x14a0] sm:$0xff]  ;;  %v288_v28 = vld [vmem:[#allocation5 + $0x158] sm:$0xff] }
  0x9c   : > { %3874 = vmatpush1.bf16.msra.mxu1 %v3873_v20  ;;  %v4085_v20 = vpack.c.bf16 %v257_v9, %v247_v8  ;;  %v267_v24 = vld [vmem:[#allocation5 + $0xb0] sm:$0xff]  ;;  %v277_v25 = vld [vmem:[#allocation5 + $0x100] sm:$0xff]  ;;  %v298_v29 = vld [vmem:[#allocation5 + $0x1a8] sm:$0xff] }
  0x9d   : > { %3938 = vmatpush1.bf16.msra.mxu0 %v3937_v21  ;;  %3876 = vmatprep.subr.bf16.mxu1 %v3875_v22  ;;  %v3957_v21 = vpack.c.bf16 %v895_v11, %v885_v7  ;;  %v4087_v22 = vpack.c.bf16 %v278_v13, %v268_v12  ;;  %v915_v27 = vld [vmem:[#allocation5 + $0x14f0] sm:$0xff]  ;;  %v926_v30 = vld [vmem:[#allocation5 + $0x1548] sm:$0xff]  ;;  %v936_v31 = vld [vmem:[#allocation5 + $0x1598] sm:$0xff] }
  0x9e   : > { %3940 = vmatprep.subr.bf16.mxu0 %v3939_v26  ;;  %v3959_v26 = vpack.c.bf16 %v916_v15, %v906_v14  ;;  %v925_v35 = vld [vmem:[#allocation5 + $0x1540] sm:$0xff]  ;;  %v287_v36 = vld [vmem:[#allocation5 + $0x150] sm:$0xff]  ;;  %v308_v40 = vld [vmem:[#allocation5 + $0x1f8] sm:$0xff] }
  0x9f   : > { %v297_v37 = vld [vmem:[#allocation5 + $0x1a0] sm:$0xff]  ;;  %v935_v39 = vld [vmem:[#allocation5 + $0x1590] sm:$0xff]  ;;  %v318_v41 = vld [vmem:[#allocation5 + $0x248] sm:$0xff] }
  0xa0   : > { %3878 = vmatpush1.bf16.msra.mxu1 %v3877_v32  ;;  %v4089_v32 = vpack.c.bf16 %v277_v25, %v267_v24  ;;  %v946_v42 = vld [vmem:[#allocation5 + $0x15e8] sm:$0xff]  ;;  %v956_v43 = vld [vmem:[#allocation5 + $0x1638] sm:$0xff]  ;;  %v945_v47 = vld [vmem:[#allocation5 + $0x15e0] sm:$0xff] }
  0xa1   : > { %3942 = vmatpush1.bf16.msra.mxu0 %v3941_v33  ;;  %3880 = vmatprep.subr.bf16.mxu1 %v3879_v34  ;;  %v3961_v33 = vpack.c.bf16 %v915_v27, %v905_v23  ;;  %v4091_v34 = vpack.c.bf16 %v298_v29, %v288_v28  ;;  %v307_v48 = vld [vmem:[#allocation5 + $0x1f0] sm:$0xff]  ;;  %v317_v49 = vld [vmem:[#allocation5 + $0x240] sm:$0xff]  ;;  %v328_v52 = vld [vmem:[#allocation5 + $0x298] sm:$0xff] }
  0xa2   : > { %3944 = vmatprep.subr.bf16.mxu0 %v3943_v38  ;;  %v3963_v38 = vpack.c.bf16 %v936_v31, %v926_v30  ;;  %v955_v51 = vld [vmem:[#allocation5 + $0x1630] sm:$0xff]  ;;  %v338_v53 = vld [vmem:[#allocation5 + $0x2e8] sm:$0xff]  ;;  %v976_v55 = vld [vmem:[#allocation5 + $0x16d8] sm:$0xff] }
  0xa3   : > { %v966_v54 = vld [vmem:[#allocation5 + $0x1688] sm:$0xff]  ;;  %v965_v59 = vld [vmem:[#allocation5 + $0x1680] sm:$0xff]  ;;  %v327_v60 = vld [vmem:[#allocation5 + $0x290] sm:$0xff] }
  0xa4   : > { %3882 = vmatpush1.bf16.msra.mxu1 %v3881_v44  ;;  %v4093_v44 = vpack.c.bf16 %v297_v37, %v287_v36  ;;  %v337_v61 = vld [vmem:[#allocation5 + $0x2e0] sm:$0xff]  ;;  %v975_v63 = vld [vmem:[#allocation5 + $0x16d0] sm:$0xff]  ;;  %v348_v0 = vld [vmem:[#allocation5 + $0x338] sm:$0xff] }
  0xa5   : > { %3946 = vmatpush1.bf16.msra.mxu0 %v3945_v45  ;;  %3884 = vmatprep.subr.bf16.mxu1 %v3883_v46  ;;  %v3965_v45 = vpack.c.bf16 %v935_v39, %v925_v35  ;;  %v4095_v46 = vpack.c.bf16 %v318_v41, %v308_v40  ;;  %v358_v1 = vld [vmem:[#allocation5 + $0x388] sm:$0xff]  ;;  %v996_v3 = vld [vmem:[#allocation5 + $0x1778] sm:$0xff]  ;;  %v347_v7 = vld [vmem:[#allocation5 + $0x330] sm:$0xff]  ;;  %v3973_v8 = vpack.c.bf16 %v975_v63, %v965_v59 }
  0xa6   : > { %3948 = vmatprep.subr.bf16.mxu0 %v3947_v50  ;;  %v3967_v50 = vpack.c.bf16 %v956_v43, %v946_v42  ;;  %v986_v2 = vld [vmem:[#allocation5 + $0x1728] sm:$0xff]  ;;  %v4103_v9 = vpack.c.bf16 %v358_v1, %v348_v0  ;;  %v232_v12 = vld [vmem:[%s5814_s5 + $0x58] sm:$0xff]  ;;  %v1005_v24 = vld [vmem:[#allocation5 + $0x17c0] sm:$0xff] }
  0xa7   : > { %v5838_v11 = vld [vmem:[%s5814_s5 + $0x48] sm:$0xff]  ;;  %v3975_v13 = vpack.c.bf16 %v996_v3, %v986_v2  ;;  %v368_v15 = vld [vmem:[#allocation5 + $0x3d8] sm:$0xff]  ;;  %v1015_v25 = vld [vmem:[#allocation5 + $0x1810] sm:$0xff] }
  0xa8   : > { %3886 = vmatpush1.bf16.msra.mxu1 %v3885_v56  ;;  %v4097_v56 = vpack.c.bf16 %v317_v49, %v307_v48  ;;  %v1006_v14 = vld [vmem:[#allocation5 + $0x17c8] sm:$0xff]  ;;  %v377_v29 = vld [vmem:[#allocation5 + $0x420] sm:$0xff]  ;;  %v240_v31 = vld [vmem:[%s5814_s5 + $0x98] sm:$0xff]  ;;  %v3981_v41 = vpack.c.bf16 %v1015_v25, %v1005_v24 }
  0xa9   : > { %3950 = vmatpush1.bf16.msra.mxu0 %v3949_v57  ;;  %3888 = vmatprep.subr.bf16.mxu1 %v3887_v58  ;;  %v3969_v57 = vpack.c.bf16 %v955_v51, %v945_v47  ;;  %v4099_v58 = vpack.c.bf16 %v338_v53, %v328_v52  ;;  %v5847_v30 = vld [vmem:[%s5814_s5 + $0x88] sm:$0xff]  ;;  %v1036_v36 = vld [vmem:[#allocation5 + $0x18b8] sm:$0xff]  ;;  %v5853_v37 = vld [vmem:[%s5814_s5 + $0x80] sm:$0xff] }
  0xaa   : > { %3952 = vmatprep.subr.bf16.mxu0 %v3951_v62  ;;  %v3971_v62 = vpack.c.bf16 %v976_v55, %v966_v54  ;;  %v398_v35 = vld [vmem:[#allocation5 + $0x4c8] sm:$0xff]  ;;  %v1025_v40 = vld [vmem:[#allocation5 + $0x1860] sm:$0xff]  ;;  %v387_v43 = vld [vmem:[#allocation5 + $0x470] sm:$0xff] }
  0xab   : > { %v1035_v47 = vld [vmem:[#allocation5 + $0x18b0] sm:$0xff]  ;;  %v408_v48 = vld [vmem:[#allocation5 + $0x518] sm:$0xff]  ;;  %v418_v49 = vld [vmem:[#allocation5 + $0x568] sm:$0xff] }
  0xac   : > { %3890 = vmatpush1.bf16.msra.mxu1 %v3889_v4  ;;  %v4101_v4 = vpack.c.bf16 %v337_v61, %v327_v60  ;;  %v1056_v51 = vld [vmem:[#allocation5 + $0x1958] sm:$0xff]  ;;  %v3985_v53 = vpack.c.bf16 %v1035_v47, %v1025_v40  ;;  %v4115_v54 = vpack.c.bf16 %v418_v49, %v408_v48  ;;  %v1045_v55 = vld [vmem:[#allocation5 + $0x1900] sm:$0xff]  ;;  %v1055_v59 = vld [vmem:[#allocation5 + $0x1950] sm:$0xff] }
  0xad   : > { %3954 = vmatpush1.bf16.msra.mxu0 %v3953_v5  ;;  %4084 = vmatprep.subr.bf16.mxu1 %v4083_v6  ;;  %v985_v5 = vld [vmem:[#allocation5 + $0x1720] sm:$0xff]  ;;  %v995_v6 = vld [vmem:[#allocation5 + $0x1770] sm:$0xff]  ;;  %v428_v60 = vld [vmem:[#allocation5 + $0x5b8] sm:$0xff] }
  0xae   : > { %3956 = vmatprep.subr.bf16.mxu0 %v3955_v10  ;;  %v357_v10 = vld [vmem:[#allocation5 + $0x380] sm:$0xff]  ;;  %v3977_v27 = vpack.c.bf16 %v995_v6, %v985_v5  ;;  %v438_v61 = vld [vmem:[#allocation5 + $0x608] sm:$0xff]  ;;  %v1076_v63 = vld [vmem:[#allocation5 + $0x19f8] sm:$0xff] }
  0xaf   : > { %1590 = vmatmul.mubr.f32.vlgmr.msra.gmra.mrb[0].mxu1 %v5833_v17  ;;  %v4105_v23 = vpack.c.bf16 %v357_v10, %v347_v7  ;;  %v4119_v1 = vpack.c.bf16 %v438_v61, %v428_v60  ;;  %v1065_v2 = vld [vmem:[#allocation5 + $0x19a0] sm:$0xff]  ;;  %v427_v3 = vld [vmem:[#allocation5 + $0x5b0] sm:$0xff]  ;;  %v448_v7 = vld [vmem:[#allocation5 + $0x658] sm:$0xff] }
  0xb0   : > { %1673 = vmatmul.mubr.f32.vlgmr.msra.gmra.mrb[0].mxu0 %v223_v18  ;;  %4086 = vmatpush1.bf16.msra.mxu1 %v4085_v20  ;;  %v378_v18 = vld [vmem:[#allocation5 + $0x428] sm:$0xff]  ;;  %v1016_v20 = vld [vmem:[#allocation5 + $0x1818] sm:$0xff]  ;;  %v1075_v6 = vld [vmem:[#allocation5 + $0x19f0] sm:$0xff] }
  0xb1   : > { %3958 = vmatpush1.bf16.msra.mxu0 %v3957_v21  ;;  %4088 = vmatprep.subr.bf16.mxu1 %v4087_v22  ;;  %v5843_v21 = vld [vmem:[%s5814_s5 + $0x40] sm:$0xff]  ;;  %v231_v22 = vld [vmem:[%s5814_s5 + $0x50] sm:$0xff]  ;;  %v4107_v28 = vpack.c.bf16 %v378_v18, %v368_v15  ;;  %v1096_v10 = vld [vmem:[#allocation5 + $0x1a98] sm:$0xff] }
  0xb2   : > { %3960 = vmatprep.subr.bf16.mxu0 %v3959_v26  ;;  %1595 = vmatprep.mubr.f32.mxu1 %v5838_v11  ;;  %v367_v26 = vld [vmem:[#allocation5 + $0x3d0] sm:$0xff]  ;;  %v1085_v15 = vld [vmem:[#allocation5 + $0x1a40] sm:$0xff]  ;;  %v468_v24 = vld [vmem:[#allocation5 + $0x6f8] sm:$0xff] }
  0xb3   : > { %1678 = vmatprep.mubr.f32.mxu0 %v232_v12  ;;  %1596 = vmatmul.mubr.f32.gmra.mrb[2].mxu1 %v5843_v21  ;;  %v4109_v39 = vpack.c.bf16 %v377_v29, %v367_v26  ;;  %v447_v18 = vld [vmem:[#allocation5 + $0x650] sm:$0xff]  ;;  %v478_v25 = vld [vmem:[#allocation5 + $0x748] sm:$0xff]  ;;  %v497_v48 = vld [vmem:[#allocation5 + $0x7e0] sm:$0xff] }
  0xb4   : > { %4090 = vmatpush1.bf16.msra.mxu1 %v4089_v32  ;;  %1679 = vmatmul.mubr.f32.gmra.mrb[2].mxu0 %v231_v22  ;;  %v3979_v32 = vpack.c.bf16 %v1016_v20, %v1006_v14  ;;  %v457_v20 = vld [vmem:[#allocation5 + $0x6a0] sm:$0xff]  ;;  %v1106_v26 = vld [vmem:[#allocation5 + $0x1ae8] sm:$0xff]  ;;  %v487_v47 = vld [vmem:[#allocation5 + $0x790] sm:$0xff] }
  0xb5   : > { %3962 = vmatpush1.bf16.msra.mxu0 %v3961_v33  ;;  %4092 = vmatprep.subr.bf16.mxu1 %v4091_v34  ;;  %v1026_v33 = vld [vmem:[#allocation5 + $0x1868] sm:$0xff]  ;;  %v388_v34 = vld [vmem:[#allocation5 + $0x478] sm:$0xff]  ;;  %v517_v60 = vld [vmem:[#allocation5 + $0x880] sm:$0xff] }
  0xb6   : > { %3964 = vmatprep.subr.bf16.mxu0 %v3963_v38  ;;  %1601 = vmatprep.mubr.f32.mxu1 %v5847_v30  ;;  %v239_v38 = vld [vmem:[%s5814_s5 + $0x90] sm:$0xff]  ;;  %v4111_v42 = vpack.c.bf16 %v398_v35, %v388_v34  ;;  %v477_v34 = vld [vmem:[#allocation5 + $0x740] sm:$0xff]  ;;  %v1126_v40 = vld [vmem:[#allocation5 + $0x1b88] sm:$0xff] }
  0xb7   : > { %1684 = vmatprep.mubr.f32.mxu0 %v240_v31  ;;  %1602 = vmatmul.mubr.f32.gmra.mrb[4].mxu1 %v5853_v37  ;;  %v4127_v31 = vpack.c.bf16 %v478_v25, %v468_v24  ;;  %v557_v24 = vld [vmem:[#allocation5 + $0x9c0] sm:$0xff] }
  0xb8   : > { %4094 = vmatpush1.bf16.msra.mxu1 %v4093_v44  ;;  %1685 = vmatmul.mubr.f32.gmra.mrb[4].mxu0 %v239_v38  ;;  %v397_v44 = vld [vmem:[#allocation5 + $0x4c0] sm:$0xff]  ;;  %v488_v38 = vld [vmem:[#allocation5 + $0x798] sm:$0xff] }
  0xb9   : > { %3966 = vmatpush1.bf16.msra.mxu0 %v3965_v45  ;;  %4096 = vmatprep.subr.bf16.mxu1 %v4095_v46  ;;  %v5857_v45 = vld [vmem:[%s5814_s5 + $0x28] sm:$0xff]  ;;  %v3983_v46 = vpack.c.bf16 %v1036_v36, %v1026_v33  ;;  %v4113_v52 = vpack.c.bf16 %v397_v44, %v387_v43  ;;  %v467_v33 = vld [vmem:[#allocation5 + $0x6f0] sm:$0xff] }
  0xba   : > { %3968 = vmatprep.subr.bf16.mxu0 %v3967_v50  ;;  %v1046_v50 = vld [vmem:[#allocation5 + $0x1908] sm:$0xff]  ;;  %1755 = vmatprep.mubr.f32.mxu0 %v5857_v45  ;;  %v1115_v36 = vld [vmem:[#allocation5 + $0x1b30] sm:$0xff] }
  0xbb   : > { %1921 = vmatprep.mubr.f32.mxu1 %v5825_v16  ;;  %v3989_v16 = vpack.c.bf16 %v1055_v59, %v1045_v55  ;;  %v4133_v55 = vpack.c.bf16 %v497_v48, %v487_v47  ;;  %v507_v59 = vld [vmem:[#allocation5 + $0x830] sm:$0xff] }
  0xbc   : > { %4098 = vmatpush1.bf16.msra.mxu1 %v4097_v56  ;;  %v407_v56 = vld [vmem:[#allocation5 + $0x510] sm:$0xff] }
  0xbd   : > { %3970 = vmatpush1.bf16.msra.mxu0 %v3969_v57  ;;  %4100 = vmatprep.subr.bf16.mxu1 %v4099_v58  ;;  %v417_v57 = vld [vmem:[#allocation5 + $0x560] sm:$0xff]  ;;  %v3987_v58 = vpack.c.bf16 %v1056_v51, %v1046_v50  ;;  %v1135_v50 = vld [vmem:[#allocation5 + $0x1bd0] sm:$0xff]  ;;  %v508_v51 = vld [vmem:[#allocation5 + $0x838] sm:$0xff] }
  0xbe   : > { %3972 = vmatprep.subr.bf16.mxu0 %v3971_v62  ;;  %v1066_v62 = vld [vmem:[#allocation5 + $0x19a8] sm:$0xff]  ;;  %v4117_v0 = vpack.c.bf16 %v417_v57, %v407_v56 }
  0xbf   : > { %v3991_v5 = vpack.c.bf16 %v1076_v63, %v1066_v62  ;;  %v1155_v62 = vld [vmem:[#allocation5 + $0x1c70] sm:$0xff]  ;;  %v528_v63 = vld [vmem:[#allocation5 + $0x8d8] sm:$0xff] }
  0xc0   : > { %4102 = vmatpush1.bf16.msra.mxu1 %v4101_v4  ;;  %v437_v4 = vld [vmem:[#allocation5 + $0x600] sm:$0xff] }
  0xc1   : > { %3974 = vmatpush1.bf16.msra.mxu0 %v3973_v8  ;;  %4104 = vmatprep.subr.bf16.mxu1 %v4103_v9  ;;  %v458_v8 = vld [vmem:[#allocation5 + $0x6a8] sm:$0xff]  ;;  %v4121_v12 = vpack.c.bf16 %v437_v4, %v427_v3 }
  0xc2   : > { %3976 = vmatprep.subr.bf16.mxu0 %v3975_v13  ;;  %v1086_v9 = vld [vmem:[#allocation5 + $0x1a48] sm:$0xff]  ;;  %v3993_v13 = vpack.c.bf16 %v1075_v6, %v1065_v2  ;;  %v4123_v14 = vpack.c.bf16 %v458_v8, %v448_v7  ;;  %v4137_v2 = vpack.c.bf16 %v517_v60, %v507_v59  ;;  %v527_v6 = vld [vmem:[#allocation5 + $0x8d0] sm:$0xff]  ;;  %v537_v7 = vld [vmem:[#allocation5 + $0x920] sm:$0xff] }
  0xc3   : > { %v3995_v22 = vpack.c.bf16 %v1096_v10, %v1086_v9  ;;  %v1175_v9 = vld [vmem:[#allocation5 + $0x1d10] sm:$0xff]  ;;  %v548_v10 = vld [vmem:[#allocation5 + $0x978] sm:$0xff]  ;;  %v234_v59 = vld [vmem:[%s5814_s5 + $0x68] sm:$0xff] }
  0xc4   : > { %4106 = vmatpush1.bf16.msra.mxu1 %v4105_v23  ;;  %v1095_v23 = vld [vmem:[#allocation5 + $0x1a90] sm:$0xff] }
  0xc5   : > { %3978 = vmatpush1.bf16.msra.mxu0 %v3977_v27  ;;  %4108 = vmatprep.subr.bf16.mxu1 %v4107_v28  ;;  %v1116_v27 = vld [vmem:[#allocation5 + $0x1b38] sm:$0xff]  ;;  %v4125_v28 = vpack.c.bf16 %v457_v20, %v447_v18  ;;  %v3997_v29 = vpack.c.bf16 %v1095_v23, %v1085_v15  ;;  %v4141_v15 = vpack.c.bf16 %v537_v7, %v527_v6  ;;  %v547_v23 = vld [vmem:[#allocation5 + $0x970] sm:$0xff] }
  0xc6   : > { %3980 = vmatprep.subr.bf16.mxu0 %v3979_v32  ;;  %v1105_v32 = vld [vmem:[#allocation5 + $0x1ae0] sm:$0xff]  ;;  %v3999_v35 = vpack.c.bf16 %v1116_v27, %v1106_v26  ;;  %v1195_v26 = vld [vmem:[#allocation5 + $0x1db0] sm:$0xff]  ;;  %v568_v27 = vld [vmem:[#allocation5 + $0xa18] sm:$0xff] }
  0xc7   : > { %v4001_v43 = vpack.c.bf16 %v1115_v36, %v1105_v32  ;;  %v4145_v32 = vpack.c.bf16 %v557_v24, %v547_v23  ;;  %v567_v36 = vld [vmem:[#allocation5 + $0xa10] sm:$0xff]  ;;  %v1276_v6 = vld [vmem:[#allocation5 + $0x2038] sm:$0xff]  ;;  %v658_v23 = vld [vmem:[#allocation5 + $0xce8] sm:$0xff] }
  0xc8   : > { %4110 = vmatpush1.bf16.msra.mxu1 %v4109_v39  ;;  %v498_v39 = vld [vmem:[#allocation5 + $0x7e8] sm:$0xff]  ;;  %v1296_v24 = vld [vmem:[#allocation5 + $0x20d8] sm:$0xff] }
  0xc9   : > { %3982 = vmatpush1.bf16.msra.mxu0 %v3981_v41  ;;  %4112 = vmatprep.subr.bf16.mxu1 %v4111_v42  ;;  %v1136_v41 = vld [vmem:[#allocation5 + $0x1bd8] sm:$0xff]  ;;  %v4129_v42 = vpack.c.bf16 %v477_v34, %v467_v33  ;;  %v4131_v44 = vpack.c.bf16 %v498_v39, %v488_v38  ;;  %v577_v38 = vld [vmem:[#allocation5 + $0xa60] sm:$0xff] }
  0xca   : > { %3984 = vmatprep.subr.bf16.mxu0 %v3983_v46  ;;  %v1125_v46 = vld [vmem:[#allocation5 + $0x1b80] sm:$0xff]  ;;  %v4003_v49 = vpack.c.bf16 %v1136_v41, %v1126_v40  ;;  %v1215_v40 = vld [vmem:[#allocation5 + $0x1e50] sm:$0xff]  ;;  %v588_v41 = vld [vmem:[#allocation5 + $0xab8] sm:$0xff]  ;;  %v4149_v47 = vpack.c.bf16 %v577_v38, %v567_v36 }
  0xcb   : > { %v4005_v56 = vpack.c.bf16 %v1135_v50, %v1125_v46  ;;  %v225_v46 = vld [vmem:[%s5814_s5 + $0x20] sm:$0xff]  ;;  %v1306_v36 = vld [vmem:[#allocation5 + $0x2128] sm:$0xff] }
  0xcc   : > { %4114 = vmatpush1.bf16.msra.mxu1 %v4113_v52  ;;  %v518_v52 = vld [vmem:[#allocation5 + $0x888] sm:$0xff]  ;;  %v1225_v50 = vld [vmem:[#allocation5 + $0x1ea0] sm:$0xff] }
  0xcd   : > { %3986 = vmatpush1.bf16.msra.mxu0 %v3985_v53  ;;  %4116 = vmatprep.subr.bf16.mxu1 %v4115_v54  ;;  %v1146_v53 = vld [vmem:[#allocation5 + $0x1c28] sm:$0xff]  ;;  %v1156_v54 = vld [vmem:[#allocation5 + $0x1c78] sm:$0xff]  ;;  %v4135_v57 = vpack.c.bf16 %v518_v52, %v508_v51  ;;  %v587_v51 = vld [vmem:[#allocation5 + $0xab0] sm:$0xff] }
  0xce   : > { %3988 = vmatprep.subr.bf16.mxu0 %v3987_v58  ;;  %v1145_v58 = vld [vmem:[#allocation5 + $0x1c20] sm:$0xff]  ;;  %v4007_v61 = vpack.c.bf16 %v1156_v54, %v1146_v53  ;;  %v1235_v54 = vld [vmem:[#allocation5 + $0x1ef0] sm:$0xff] }
  0xcf   : > { %v4009_v3 = vpack.c.bf16 %v1155_v62, %v1145_v58  ;;  %v597_v52 = vld [vmem:[#allocation5 + $0xb00] sm:$0xff]  ;;  %v1256_v58 = vld [vmem:[#allocation5 + $0x1f98] sm:$0xff]  ;;  %v4025_v62 = vpack.c.bf16 %v1235_v54, %v1225_v50 }
  0xd0   : > { %4118 = vmatpush1.bf16.msra.mxu1 %v4117_v0  ;;  %v538_v0 = vld [vmem:[#allocation5 + $0x928] sm:$0xff]  ;;  %v4153_v60 = vpack.c.bf16 %v597_v52, %v587_v51  ;;  %v1325_v52 = vld [vmem:[#allocation5 + $0x21c0] sm:$0xff] }
  0xd1   : > { %3990 = vmatpush1.bf16.msra.mxu0 %v3989_v16  ;;  %4120 = vmatprep.subr.bf16.mxu1 %v4119_v1  ;;  %v1166_v16 = vld [vmem:[#allocation5 + $0x1cc8] sm:$0xff]  ;;  %v1176_v1 = vld [vmem:[#allocation5 + $0x1d18] sm:$0xff]  ;;  %v4139_v4 = vpack.c.bf16 %v538_v0, %v528_v63  ;;  %v607_v0 = vld [vmem:[#allocation5 + $0xb50] sm:$0xff] }
  0xd2   : > { %3992 = vmatprep.subr.bf16.mxu0 %v3991_v5  ;;  %v1165_v5 = vld [vmem:[#allocation5 + $0x1cc0] sm:$0xff]  ;;  %v4011_v8 = vpack.c.bf16 %v1176_v1, %v1166_v16 }
  0xd3   : > { %v4013_v18 = vpack.c.bf16 %v1175_v9, %v1165_v5  ;;  %v617_v16 = vld [vmem:[#allocation5 + $0xba0] sm:$0xff]  ;;  %v1266_v5 = vld [vmem:[#allocation5 + $0x1fe8] sm:$0xff] }
  0xd4   : > { %4122 = vmatpush1.bf16.msra.mxu1 %v4121_v12  ;;  %v558_v12 = vld [vmem:[#allocation5 + $0x9c8] sm:$0xff]  ;;  %v233_v1 = vld [vmem:[%s5814_s5 + $0x60] sm:$0xff]  ;;  %v4157_v7 = vpack.c.bf16 %v617_v16, %v607_v0  ;;  %v707_v16 = vld [vmem:[#allocation5 + $0xe70] sm:$0xff] }
  0xd5   : > { %3994 = vmatpush1.bf16.msra.mxu0 %v3993_v13  ;;  %4124 = vmatprep.subr.bf16.mxu1 %v4123_v14  ;;  %v1186_v13 = vld [vmem:[#allocation5 + $0x1d68] sm:$0xff]  ;;  %v1196_v14 = vld [vmem:[#allocation5 + $0x1db8] sm:$0xff]  ;;  %v4143_v20 = vpack.c.bf16 %v558_v12, %v548_v10  ;;  %v697_v54 = vld [vmem:[#allocation5 + $0xe20] sm:$0xff] }
  0xd6   : > { %3996 = vmatprep.subr.bf16.mxu0 %v3995_v22  ;;  %v1185_v22 = vld [vmem:[#allocation5 + $0x1d60] sm:$0xff]  ;;  %v4015_v25 = vpack.c.bf16 %v1196_v14, %v1186_v13  ;;  %v242_v9 = vld [vmem:[%s5814_s5 + $0xa8] sm:$0xff]  ;;  %v627_v13 = vld [vmem:[#allocation5 + $0xbf0] sm:$0xff] }
  0xd7   : > { %v4017_v33 = vpack.c.bf16 %v1195_v26, %v1185_v22  ;;  %v637_v14 = vld [vmem:[#allocation5 + $0xc40] sm:$0xff]  ;;  %v648_v22 = vld [vmem:[#allocation5 + $0xc98] sm:$0xff] }
  0xd8   : > { %4126 = vmatpush1.bf16.msra.mxu1 %v4125_v28  ;;  %v578_v28 = vld [vmem:[#allocation5 + $0xa68] sm:$0xff]  ;;  %v228_v26 = vld [vmem:[%s5814_s5 + $0x38] sm:$0xff]  ;;  %v1345_v0 = vld [vmem:[#allocation5 + $0x2260] sm:$0xff] }
  0xd9   : > { %3998 = vmatpush1.bf16.msra.mxu0 %v3997_v29  ;;  %4128 = vmatprep.subr.bf16.mxu1 %v4127_v31  ;;  %v1206_v29 = vld [vmem:[#allocation5 + $0x1e08] sm:$0xff]  ;;  %v1216_v31 = vld [vmem:[#allocation5 + $0x1e58] sm:$0xff]  ;;  %v4147_v34 = vpack.c.bf16 %v578_v28, %v568_v27  ;;  %v4163_v28 = vpack.c.bf16 %v658_v23, %v648_v22 }
  0xda   : > { %4000 = vmatprep.subr.bf16.mxu0 %v3999_v35  ;;  %v1205_v35 = vld [vmem:[#allocation5 + $0x1e00] sm:$0xff]  ;;  %v4019_v39 = vpack.c.bf16 %v1216_v31, %v1206_v29  ;;  %v647_v31 = vld [vmem:[#allocation5 + $0xc90] sm:$0xff]  ;;  %v1386_v22 = vld [vmem:[#allocation5 + $0x23a8] sm:$0xff] }
  0xdb   : > { %v4021_v48 = vpack.c.bf16 %v1215_v40, %v1205_v35  ;;  %v1285_v29 = vld [vmem:[#allocation5 + $0x2080] sm:$0xff]  ;;  %v678_v35 = vld [vmem:[#allocation5 + $0xd88] sm:$0xff]  ;;  %v1396_v23 = vld [vmem:[#allocation5 + $0x23f8] sm:$0xff] }
  0xdc   : > { %4130 = vmatpush1.bf16.msra.mxu1 %v4129_v42  ;;  %v598_v42 = vld [vmem:[#allocation5 + $0xb08] sm:$0xff] }
  0xdd   : > { %4002 = vmatpush1.bf16.msra.mxu0 %v4001_v43  ;;  %4132 = vmatprep.subr.bf16.mxu1 %v4131_v44  ;;  %v1226_v43 = vld [vmem:[#allocation5 + $0x1ea8] sm:$0xff]  ;;  %v1236_v44 = vld [vmem:[#allocation5 + $0x1ef8] sm:$0xff] }
  0xde   : > { %4004 = vmatprep.subr.bf16.mxu0 %v4003_v49  ;;  %v4151_v49 = vpack.c.bf16 %v598_v42, %v588_v41  ;;  %v4023_v53 = vpack.c.bf16 %v1236_v44, %v1226_v43  ;;  %v1305_v41 = vld [vmem:[#allocation5 + $0x2120] sm:$0xff]  ;;  %v667_v42 = vld [vmem:[#allocation5 + $0xd30] sm:$0xff] }
  0xdf   : > { %v677_v43 = vld [vmem:[#allocation5 + $0xd80] sm:$0xff] }
  0xe0   : > { %4134 = vmatpush1.bf16.msra.mxu1 %v4133_v55  ;;  %v608_v55 = vld [vmem:[#allocation5 + $0xb58] sm:$0xff]  ;;  %v4169_v50 = vpack.c.bf16 %v677_v43, %v667_v42  ;;  %v1415_v42 = vld [vmem:[#allocation5 + $0x2490] sm:$0xff] }
  0xe1   : > { %4006 = vmatpush1.bf16.msra.mxu0 %v4005_v56  ;;  %4136 = vmatprep.subr.bf16.mxu1 %v4135_v57  ;;  %v618_v56 = vld [vmem:[#allocation5 + $0xba8] sm:$0xff]  ;;  %v788_v43 = vld [vmem:[#allocation5 + $0x10f8] sm:$0xff] }
  0xe2   : > { %4008 = vmatprep.subr.bf16.mxu0 %v4007_v61  ;;  %v1246_v57 = vld [vmem:[#allocation5 + $0x1f48] sm:$0xff]  ;;  %v1245_v61 = vld [vmem:[#allocation5 + $0x1f40] sm:$0xff]  ;;  %v4155_v63 = vpack.c.bf16 %v618_v56, %v608_v55  ;;  %v1335_v56 = vld [vmem:[#allocation5 + $0x2210] sm:$0xff] }
  0xe4   : > { %4138 = vmatpush1.bf16.msra.mxu1 %v4137_v2  ;;  %v4027_v2 = vpack.c.bf16 %v1256_v58, %v1246_v57  ;;  %v708_v57 = vld [vmem:[#allocation5 + $0xe78] sm:$0xff]  ;;  %v718_v58 = vld [vmem:[#allocation5 + $0xec8] sm:$0xff] }
  0xe5   : > { %4010 = vmatpush1.bf16.msra.mxu0 %v4009_v3  ;;  %4140 = vmatprep.subr.bf16.mxu1 %v4139_v4  ;;  %v1255_v3 = vld [vmem:[#allocation5 + $0x1f90] sm:$0xff]  ;;  %v628_v4 = vld [vmem:[#allocation5 + $0xbf8] sm:$0xff] }
  0xe6   : > { %4012 = vmatprep.subr.bf16.mxu0 %v4011_v8  ;;  %v1265_v8 = vld [vmem:[#allocation5 + $0x1fe0] sm:$0xff]  ;;  %v4029_v10 = vpack.c.bf16 %v1255_v3, %v1245_v61  ;;  %v1355_v3 = vld [vmem:[#allocation5 + $0x22b0] sm:$0xff] }
  0xe8   : > { %4142 = vmatpush1.bf16.msra.mxu1 %v4141_v15  ;;  %v241_v15 = vld [vmem:[%s5814_s5 + $0xa0] sm:$0xff] }
  0xe9   : > { %4014 = vmatpush1.bf16.msra.mxu0 %v4013_v18  ;;  %4144 = vmatprep.subr.bf16.mxu1 %v4143_v20  ;;  %v4031_v18 = vpack.c.bf16 %v1276_v6, %v1266_v5  ;;  %v1275_v20 = vld [vmem:[#allocation5 + $0x2030] sm:$0xff]  ;;  %v1366_v5 = vld [vmem:[#allocation5 + $0x2308] sm:$0xff]  ;;  %v1376_v6 = vld [vmem:[#allocation5 + $0x2358] sm:$0xff] }
  0xea   : > { %4016 = vmatprep.subr.bf16.mxu0 %v4015_v25  ;;  %v4161_v25 = vpack.c.bf16 %v637_v14, %v627_v13  ;;  %v4033_v27 = vpack.c.bf16 %v1275_v20, %v1265_v8  ;;  %v4049_v8 = vpack.c.bf16 %v1355_v3, %v1345_v0  ;;  %v737_v13 = vld [vmem:[#allocation5 + $0xf60] sm:$0xff]  ;;  %v4051_v14 = vpack.c.bf16 %v1376_v6, %v1366_v5  ;;  %v758_v20 = vld [vmem:[#allocation5 + $0x1008] sm:$0xff] }
  0xeb   : > { %v1466_v3 = vld [vmem:[#allocation5 + $0x2628] sm:$0xff] }
  0xec   : > { %4146 = vmatpush1.bf16.msra.mxu1 %v4145_v32  ;;  %v657_v32 = vld [vmem:[#allocation5 + $0xce0] sm:$0xff] }
  0xed   : > { %4018 = vmatpush1.bf16.msra.mxu0 %v4017_v33  ;;  %4148 = vmatprep.subr.bf16.mxu1 %v4147_v34  ;;  %v1295_v34 = vld [vmem:[#allocation5 + $0x20d0] sm:$0xff]  ;;  %v4165_v38 = vpack.c.bf16 %v657_v32, %v647_v31  ;;  %v768_v32 = vld [vmem:[#allocation5 + $0x1058] sm:$0xff] }
  0xee   : > { %4020 = vmatprep.subr.bf16.mxu0 %v4019_v39  ;;  %v4037_v39 = vpack.c.bf16 %v1295_v34, %v1285_v29  ;;  %v4055_v29 = vpack.c.bf16 %v1396_v23, %v1386_v22  ;;  %v1395_v31 = vld [vmem:[#allocation5 + $0x23f0] sm:$0xff]  ;;  %v1406_v34 = vld [vmem:[#allocation5 + $0x2448] sm:$0xff] }
  0xef   : > { %1922 = vmatmul.mubr.f32.vlgmr.msra.gmra.mrb[6].mxu1 %v5833_v17  ;;  %v638_v17 = vld [vmem:[#allocation5 + $0xc48] sm:$0xff] }
  0xf0   : > { %1756 = vmatmul.mubr.f32.vlgmr.msra.gmra.mrb[0].mxu0 %v225_v46  ;;  %4150 = vmatpush1.bf16.msra.mxu1 %v4149_v47  ;;  %v4159_v12 = vpack.c.bf16 %v638_v17, %v628_v4  ;;  %v1315_v46 = vld [vmem:[#allocation5 + $0x2170] sm:$0xff]  ;;  %v688_v47 = vld [vmem:[#allocation5 + $0xdd8] sm:$0xff]  ;;  %v738_v17 = vld [vmem:[#allocation5 + $0xf68] sm:$0xff] }
  0xf1   : > { %4022 = vmatpush1.bf16.msra.mxu0 %v4021_v48  ;;  %4152 = vmatprep.subr.bf16.mxu1 %v4151_v49  ;;  %v698_v48 = vld [vmem:[#allocation5 + $0xe28] sm:$0xff]  ;;  %v1336_v49 = vld [vmem:[#allocation5 + $0x2218] sm:$0xff] }
  0xf2   : > { %4024 = vmatprep.subr.bf16.mxu0 %v4023_v53  ;;  %1761 = vmatprep.mubr.f32.mxu0 %v234_v59  ;;  %v4171_v51 = vpack.c.bf16 %v698_v48, %v688_v47  ;;  %v687_v53 = vld [vmem:[#allocation5 + $0xdd0] sm:$0xff]  ;;  %v1346_v59 = vld [vmem:[#allocation5 + $0x2268] sm:$0xff]  ;;  %v728_v4 = vld [vmem:[#allocation5 + $0xf18] sm:$0xff] }
  0xf3   : > { %1927 = vmatprep.mubr.f32.mxu1 %v5838_v11  ;;  %v1286_v11 = vld [vmem:[#allocation5 + $0x2088] sm:$0xff]  ;;  %v4173_v61 = vpack.c.bf16 %v697_v54, %v687_v53  ;;  %v1436_v47 = vld [vmem:[#allocation5 + $0x2538] sm:$0xff]  ;;  %v1435_v53 = vld [vmem:[#allocation5 + $0x2530] sm:$0xff] }
  0xf4   : > { %4154 = vmatpush1.bf16.msra.mxu1 %v4153_v60  ;;  %1762 = vmatmul.mubr.f32.gmra.mrb[2].mxu0 %v233_v1  ;;  %v4035_v33 = vpack.c.bf16 %v1296_v24, %v1286_v11  ;;  %v1356_v60 = vld [vmem:[#allocation5 + $0x22b8] sm:$0xff]  ;;  %v717_v1 = vld [vmem:[#allocation5 + $0xec0] sm:$0xff] }
  0xf5   : > { %4026 = vmatpush1.bf16.msra.mxu0 %v4025_v62  ;;  %4156 = vmatprep.subr.bf16.mxu1 %v4155_v63  ;;  %v4045_v62 = vpack.c.bf16 %v1335_v56, %v1325_v52  ;;  %v4175_v63 = vpack.c.bf16 %v718_v58, %v708_v57  ;;  %v808_v54 = vld [vmem:[#allocation5 + $0x1198] sm:$0xff]  ;;  %v1446_v56 = vld [vmem:[#allocation5 + $0x2588] sm:$0xff] }
  0xf6   : > { %4028 = vmatprep.subr.bf16.mxu0 %v4027_v2  ;;  %1928 = vmatmul.mubr.f32.gmra.mrb[8].mxu1 %v5843_v21  ;;  %v668_v21 = vld [vmem:[#allocation5 + $0xd38] sm:$0xff]  ;;  %v4047_v2 = vpack.c.bf16 %v1356_v60, %v1346_v59 }
  0xf7   : > { %1767 = vmatprep.mubr.f32.mxu0 %v242_v9  ;;  %1933 = vmatprep.mubr.f32.mxu1 %v5847_v30  ;;  %v1316_v30 = vld [vmem:[#allocation5 + $0x2178] sm:$0xff]  ;;  %v4167_v40 = vpack.c.bf16 %v678_v35, %v668_v21  ;;  %v4179_v9 = vpack.c.bf16 %v738_v17, %v728_v4 }
  0xf8   : > { %4158 = vmatpush1.bf16.msra.mxu1 %v4157_v7  ;;  %1768 = vmatmul.mubr.f32.gmra.mrb[4].mxu0 %v241_v15  ;;  %v4039_v44 = vpack.c.bf16 %v1316_v30, %v1306_v36  ;;  %v4177_v7 = vpack.c.bf16 %v717_v1, %v707_v16  ;;  %v1375_v15 = vld [vmem:[#allocation5 + $0x2350] sm:$0xff]  ;;  %v1416_v21 = vld [vmem:[#allocation5 + $0x2498] sm:$0xff] }
  0xf9   : > { %4030 = vmatpush1.bf16.msra.mxu0 %v4029_v10  ;;  %4160 = vmatprep.subr.bf16.mxu1 %v4159_v12  ;;  %v1365_v10 = vld [vmem:[#allocation5 + $0x2300] sm:$0xff]  ;;  %v727_v12 = vld [vmem:[#allocation5 + $0xf10] sm:$0xff]  ;;  %v1456_v57 = vld [vmem:[#allocation5 + $0x25d8] sm:$0xff] }
  0xfa   : > { %4032 = vmatprep.subr.bf16.mxu0 %v4031_v18  ;;  %1934 = vmatmul.mubr.f32.gmra.mrb[10].mxu1 %v5853_v37  ;;  %v1326_v37 = vld [vmem:[#allocation5 + $0x21c8] sm:$0xff]  ;;  %v748_v18 = vld [vmem:[#allocation5 + $0xfb8] sm:$0xff]  ;;  %v4181_v11 = vpack.c.bf16 %v737_v13, %v727_v12  ;;  %v4053_v24 = vpack.c.bf16 %v1375_v15, %v1365_v10  ;;  %v4067_v0 = vpack.c.bf16 %v1456_v57, %v1446_v56  ;;  %v1455_v16 = vld [vmem:[#allocation5 + $0x25d0] sm:$0xff] }
  0xfb   : > { %1838 = vmatprep.mubr.f32.mxu0 %v228_v26  ;;  %2004 = vmatprep.mubr.f32.mxu1 %v5829_v19  ;;  %v4041_v19 = vpack.c.bf16 %v1315_v46, %v1305_v41  ;;  %v4043_v55 = vpack.c.bf16 %v1336_v49, %v1326_v37  ;;  %v1385_v26 = vld [vmem:[#allocation5 + $0x23a0] sm:$0xff]  ;;  %v4059_v41 = vpack.c.bf16 %v1416_v21, %v1406_v34  ;;  %v1426_v46 = vld [vmem:[#allocation5 + $0x24e8] sm:$0xff]  ;;  %v828_v1 = vld [vmem:[#allocation5 + $0x1238] sm:$0xff] }
  0xfc   : > { %4162 = vmatpush1.bf16.msra.mxu1 %v4161_v25  ;;  %v4183_v25 = vpack.c.bf16 %v758_v20, %v748_v18  ;;  %v4057_v36 = vpack.c.bf16 %v1395_v31, %v1385_v26  ;;  %v4063_v52 = vpack.c.bf16 %v1436_v47, %v1426_v46  ;;  %v1476_v4 = vld [vmem:[#allocation5 + $0x2678] sm:$0xff]  ;;  %v1475_v12 = vld [vmem:[#allocation5 + $0x2670] sm:$0xff]  ;;  %v1486_v15 = vld [vmem:[#allocation5 + $0x26c8] sm:$0xff] }
  0xfd   : > { %4034 = vmatpush1.bf16.msra.mxu0 %v4033_v27  ;;  %4164 = vmatprep.subr.bf16.mxu1 %v4163_v28  ;;  %v747_v27 = vld [vmem:[#allocation5 + $0xfb0] sm:$0xff]  ;;  %v757_v28 = vld [vmem:[#allocation5 + $0x1000] sm:$0xff]  ;;  %v4071_v10 = vpack.c.bf16 %v1476_v4, %v1466_v3  ;;  %v848_v13 = vld [vmem:[#allocation5 + $0x12d8] sm:$0xff] }
  0xfe   : > { %4036 = vmatprep.subr.bf16.mxu0 %v4035_v33  ;;  %v778_v33 = vld [vmem:[#allocation5 + $0x10a8] sm:$0xff]  ;;  %v4185_v35 = vpack.c.bf16 %v757_v28, %v747_v27  ;;  %v1496_v18 = vld [vmem:[#allocation5 + $0x2718] sm:$0xff]  ;;  %v1495_v27 = vld [vmem:[#allocation5 + $0x2710] sm:$0xff] }
  0xff   : > { %v4187_v30 = vpack.c.bf16 %v778_v33, %v768_v32  ;;  %v4075_v26 = vpack.c.bf16 %v1496_v18, %v1486_v15  ;;  %v868_v28 = vld [vmem:[#allocation5 + $0x1378] sm:$0xff]  ;;  %v1506_v31 = vld [vmem:[#allocation5 + $0x2768] sm:$0xff] }
 0x100   : > { %4166 = vmatpush1.bf16.msra.mxu1 %v4165_v38  ;;  %v1405_v38 = vld [vmem:[#allocation5 + $0x2440] sm:$0xff]  ;;  %v1516_v32 = vld [vmem:[#allocation5 + $0x27b8] sm:$0xff]  ;;  %v290_v3 = vld [vmem:[#allocation5 + $0x168] sm:$0xff] }
 0x101   : > { %4038 = vmatpush1.bf16.msra.mxu0 %v4037_v39  ;;  %4168 = vmatprep.subr.bf16.mxu1 %v4167_v40  ;;  %v767_v39 = vld [vmem:[#allocation5 + $0x1050] sm:$0xff]  ;;  %v777_v40 = vld [vmem:[#allocation5 + $0x10a0] sm:$0xff]  ;;  %v4061_v37 = vpack.c.bf16 %v1415_v42, %v1405_v38  ;;  %v4079_v38 = vpack.c.bf16 %v1516_v32, %v1506_v31  ;;  %v250_v42 = vld [vmem:[#allocation5 + $0x28] sm:$0xff] }
 0x102   : > { %4040 = vmatprep.subr.bf16.mxu0 %v4039_v44  ;;  %v798_v44 = vld [vmem:[#allocation5 + $0x1148] sm:$0xff]  ;;  %v4189_v48 = vpack.c.bf16 %v777_v40, %v767_v39  ;;  %v1515_v39 = vld [vmem:[#allocation5 + $0x27b0] sm:$0xff]  ;;  %v888_v40 = vld [vmem:[#allocation5 + $0x1418] sm:$0xff] }
 0x103   : > { %v4191_v49 = vpack.c.bf16 %v798_v44, %v788_v43  ;;  %v260_v43 = vld [vmem:[#allocation5 + $0x78] sm:$0xff]  ;;  %v958_v18 = vld [vmem:[#allocation5 + $0x1648] sm:$0xff]  ;;  %v319_v32 = vld [vmem:[#allocation5 + $0x250] sm:$0xff] }
 0x104   : > { %4170 = vmatpush1.bf16.msra.mxu1 %v4169_v50  ;;  %v1425_v50 = vld [vmem:[#allocation5 + $0x24e0] sm:$0xff]  ;;  %v300_v4 = vld [vmem:[#allocation5 + $0x1b8] sm:$0xff] }
 0x105   : > { %4042 = vmatpush1.bf16.msra.mxu0 %v4041_v19  ;;  %4172 = vmatprep.subr.bf16.mxu1 %v4171_v51  ;;  %v787_v19 = vld [vmem:[#allocation5 + $0x10f0] sm:$0xff]  ;;  %v797_v51 = vld [vmem:[#allocation5 + $0x1140] sm:$0xff]  ;;  %v4065_v59 = vpack.c.bf16 %v1435_v53, %v1425_v50  ;;  %v270_v53 = vld [vmem:[#allocation5 + $0xc8] sm:$0xff] }
 0x106   : > { %4044 = vmatprep.subr.bf16.mxu0 %v4043_v55  ;;  %v818_v55 = vld [vmem:[#allocation5 + $0x11e8] sm:$0xff]  ;;  %v4193_v58 = vpack.c.bf16 %v797_v51, %v787_v19  ;;  %v249_v50 = vld [vmem:[#allocation5 + $0x20] sm:$0xff]  ;;  %v259_v19 = vld [vmem:[#allocation5 + $0x70] sm:$0xff] }
 0x107   : > { %v4195_v60 = vpack.c.bf16 %v818_v55, %v808_v54  ;;  %v908_v51 = vld [vmem:[#allocation5 + $0x14b8] sm:$0xff]  ;;  %v227_v55 = vld [vmem:[%s5814_s5 + $0x30] sm:$0xff]  ;;  %v4341_v57 = vpack.c.bf16 %v259_v19, %v249_v50  ;;  %v5377_v19 = vld [vmem:[%s5814_s5 + $0x8] sm:$0xff] }
 0x108   : > { %4174 = vmatpush1.bf16.msra.mxu1 %v4173_v61  ;;  %v1445_v61 = vld [vmem:[#allocation5 + $0x2580] sm:$0xff]  ;;  %v280_v54 = vld [vmem:[#allocation5 + $0x118] sm:$0xff]  ;;  %v5376_v50 = vld [vmem:[%s5814_s5 + $0x90] sm:$0xff] }
 0x109   : > { %4046 = vmatpush1.bf16.msra.mxu0 %v4045_v62  ;;  %4176 = vmatprep.subr.bf16.mxu1 %v4175_v63  ;;  %v807_v62 = vld [vmem:[#allocation5 + $0x1190] sm:$0xff]  ;;  %v817_v63 = vld [vmem:[#allocation5 + $0x11e0] sm:$0xff]  ;;  %v4069_v5 = vpack.c.bf16 %v1455_v16, %v1445_v61  ;;  %v928_v16 = vld [vmem:[#allocation5 + $0x1558] sm:$0xff] }
 0x10a   : > { %4048 = vmatprep.subr.bf16.mxu0 %v4047_v2  ;;  %v838_v2 = vld [vmem:[#allocation5 + $0x1288] sm:$0xff]  ;;  %v4197_v17 = vpack.c.bf16 %v817_v63, %v807_v62  ;;  %v4343_v62 = vpack.c.bf16 %v280_v54, %v270_v53  ;;  %v269_v63 = vld [vmem:[#allocation5 + $0xc0] sm:$0xff]  ;;  %v948_v15 = vld [vmem:[#allocation5 + $0x15f8] sm:$0xff] }
 0x10b   : > { %v4199_v6 = vpack.c.bf16 %v838_v2, %v828_v1  ;;  %v5372_v1 = vld [vmem:[%s5814_s5 + $0x10] sm:$0xff]  ;;  %v938_v2 = vld [vmem:[#allocation5 + $0x15a8] sm:$0xff] }
 0x10c   : > { %4178 = vmatpush1.bf16.msra.mxu1 %v4177_v7  ;;  %v1465_v7 = vld [vmem:[#allocation5 + $0x2620] sm:$0xff]  ;;  %v987_v54 = vld [vmem:[#allocation5 + $0x1730] sm:$0xff] }
 0x10d   : > { %4050 = vmatpush1.bf16.msra.mxu0 %v4049_v8  ;;  %4180 = vmatprep.subr.bf16.mxu1 %v4179_v9  ;;  %v827_v8 = vld [vmem:[#allocation5 + $0x1230] sm:$0xff]  ;;  %v837_v9 = vld [vmem:[#allocation5 + $0x1280] sm:$0xff]  ;;  %v4073_v22 = vpack.c.bf16 %v1475_v12, %v1465_v7  ;;  %v4219_v12 = vpack.c.bf16 %v938_v2, %v928_v16 }
 0x10e   : > { %4052 = vmatprep.subr.bf16.mxu0 %v4051_v14  ;;  %v858_v14 = vld [vmem:[#allocation5 + $0x1328] sm:$0xff]  ;;  %v4201_v20 = vpack.c.bf16 %v837_v9, %v827_v8  ;;  %v927_v8 = vld [vmem:[#allocation5 + $0x1550] sm:$0xff]  ;;  %v937_v9 = vld [vmem:[#allocation5 + $0x15a0] sm:$0xff] }
 0x10f   : > { %v4203_v23 = vpack.c.bf16 %v858_v14, %v848_v13  ;;  %v4347_v13 = vpack.c.bf16 %v300_v4, %v290_v3  ;;  %v299_v14 = vld [vmem:[#allocation5 + $0x1b0] sm:$0xff]  ;;  %v369_v2 = vld [vmem:[#allocation5 + $0x3e0] sm:$0xff] }
 0x110   : > { %4182 = vmatpush1.bf16.msra.mxu1 %v4181_v11  ;;  %v1485_v11 = vld [vmem:[#allocation5 + $0x26c0] sm:$0xff]  ;;  %v1007_v16 = vld [vmem:[#allocation5 + $0x17d0] sm:$0xff] }
 0x111   : > { %4054 = vmatpush1.bf16.msra.mxu0 %v4053_v24  ;;  %4184 = vmatprep.subr.bf16.mxu1 %v4183_v25  ;;  %v847_v24 = vld [vmem:[#allocation5 + $0x12d0] sm:$0xff]  ;;  %v857_v25 = vld [vmem:[#allocation5 + $0x1320] sm:$0xff]  ;;  %v4077_v34 = vpack.c.bf16 %v1495_v27, %v1485_v11 }
 0x112   : > { %4056 = vmatprep.subr.bf16.mxu0 %v4055_v29  ;;  %v878_v29 = vld [vmem:[#allocation5 + $0x13c8] sm:$0xff]  ;;  %v4205_v33 = vpack.c.bf16 %v857_v25, %v847_v24  ;;  %v243_v11 = vld [vmem:[%s5814_s5 + $0xb0] sm:$0xff]  ;;  %v4221_v24 = vpack.c.bf16 %v937_v9, %v927_v8 }
 0x113   : > { %v4207_v21 = vpack.c.bf16 %v878_v29, %v868_v28  ;;  %v947_v27 = vld [vmem:[#allocation5 + $0x15f0] sm:$0xff]  ;;  %v957_v28 = vld [vmem:[#allocation5 + $0x1640] sm:$0xff] }
 0x114   : > { %4186 = vmatpush1.bf16.msra.mxu1 %v4185_v35  ;;  %v1505_v35 = vld [vmem:[#allocation5 + $0x2760] sm:$0xff]  ;;  %v379_v4 = vld [vmem:[#allocation5 + $0x430] sm:$0xff] }
 0x115   : > { %4058 = vmatpush1.bf16.msra.mxu0 %v4057_v36  ;;  %4188 = vmatprep.subr.bf16.mxu1 %v4187_v30  ;;  %v867_v36 = vld [vmem:[#allocation5 + $0x1370] sm:$0xff]  ;;  %v877_v30 = vld [vmem:[#allocation5 + $0x13c0] sm:$0xff]  ;;  %v4081_v46 = vpack.c.bf16 %v1515_v39, %v1505_v35  ;;  %v340_v35 = vld [vmem:[#allocation5 + $0x2f8] sm:$0xff]  ;;  %v4365_v9 = vpack.c.bf16 %v379_v4, %v369_v2 }
 0x116   : > { %4060 = vmatprep.subr.bf16.mxu0 %v4059_v41  ;;  %v898_v41 = vld [vmem:[#allocation5 + $0x1468] sm:$0xff]  ;;  %v4209_v44 = vpack.c.bf16 %v877_v30, %v867_v36  ;;  %v309_v29 = vld [vmem:[#allocation5 + $0x200] sm:$0xff]  ;;  %v5374_v36 = vld [vmem:[%s5814_s5 + $0x50] sm:$0xff]  ;;  %v4225_v30 = vpack.c.bf16 %v957_v28, %v947_v27 }
 0x117   : > { %v4211_v47 = vpack.c.bf16 %v898_v41, %v888_v40  ;;  %v967_v40 = vld [vmem:[#allocation5 + $0x1690] sm:$0xff]  ;;  %v977_v41 = vld [vmem:[#allocation5 + $0x16e0] sm:$0xff]  ;;  %v1138_v2 = vld [vmem:[#allocation5 + $0x1be8] sm:$0xff] }
 0x118   : > { %4190 = vmatpush1.bf16.msra.mxu1 %v4189_v48  ;;  %v887_v48 = vld [vmem:[#allocation5 + $0x1410] sm:$0xff]  ;;  %v1057_v28 = vld [vmem:[#allocation5 + $0x1960] sm:$0xff]  ;;  %v500_v4 = vld [vmem:[#allocation5 + $0x7f8] sm:$0xff] }
 0x119   : > { %4062 = vmatpush1.bf16.msra.mxu0 %v4061_v37  ;;  %4192 = vmatprep.subr.bf16.mxu1 %v4191_v49  ;;  %v897_v37 = vld [vmem:[#allocation5 + $0x1460] sm:$0xff]  ;;  %v4339_v49 = vpack.c.bf16 %v260_v43, %v250_v42  ;;  %v1047_v27 = vld [vmem:[#allocation5 + $0x1910] sm:$0xff] }
 0x11a   : > { %4064 = vmatprep.subr.bf16.mxu0 %v4063_v52  ;;  %v918_v52 = vld [vmem:[#allocation5 + $0x1508] sm:$0xff]  ;;  %v4213_v56 = vpack.c.bf16 %v897_v37, %v887_v48  ;;  %v329_v42 = vld [vmem:[#allocation5 + $0x2a0] sm:$0xff]  ;;  %v5375_v48 = vld [vmem:[%s5814_s5 + $0x98] sm:$0xff] }
 0x11b   : > { %v4215_v61 = vpack.c.bf16 %v918_v52, %v908_v51  ;;  %v350_v37 = vld [vmem:[#allocation5 + $0x348] sm:$0xff]  ;;  %v4229_v51 = vpack.c.bf16 %v977_v41, %v967_v40  ;;  %v1077_v40 = vld [vmem:[#allocation5 + $0x1a00] sm:$0xff] }
 0x11c   : > { %4194 = vmatpush1.bf16.msra.mxu1 %v4193_v58  ;;  %v236_v58 = vld [vmem:[%s5814_s5 + $0x78] sm:$0xff]  ;;  %v429_v41 = vld [vmem:[#allocation5 + $0x5c0] sm:$0xff] }
 0x11d   : > { %4066 = vmatpush1.bf16.msra.mxu0 %v4065_v59  ;;  %4196 = vmatprep.subr.bf16.mxu1 %v4195_v60  ;;  %v907_v59 = vld [vmem:[#allocation5 + $0x14b0] sm:$0xff]  ;;  %v917_v60 = vld [vmem:[#allocation5 + $0x1500] sm:$0xff] }
 0x11e   : > { %4068 = vmatprep.subr.bf16.mxu0 %v4067_v0  ;;  %v279_v0 = vld [vmem:[#allocation5 + $0x110] sm:$0xff] }
 0x11f   : > { %v4345_v7 = vpack.c.bf16 %v279_v0, %v269_v63 }
 0x120   : > { %4198 = vmatpush1.bf16.msra.mxu1 %v4197_v17  ;;  %v235_v17 = vld [vmem:[%s5814_s5 + $0x70] sm:$0xff] }
 0x121   : > { %4070 = vmatpush1.bf16.msra.mxu0 %v4069_v5  ;;  %4200 = vmatprep.subr.bf16.mxu1 %v4199_v6  ;;  %v4217_v5 = vpack.c.bf16 %v917_v60, %v907_v59  ;;  %v244_v6 = vld [vmem:[%s5814_s5 + $0xb8] sm:$0xff]  ;;  %v1018_v60 = vld [vmem:[#allocation5 + $0x1828] sm:$0xff] }
 0x122   : > { %4072 = vmatprep.subr.bf16.mxu0 %v4071_v10  ;;  %v289_v10 = vld [vmem:[#allocation5 + $0x160] sm:$0xff]  ;;  %v1008_v59 = vld [vmem:[#allocation5 + $0x17d8] sm:$0xff] }
 0x123   : > { %v4349_v25 = vpack.c.bf16 %v299_v14, %v289_v10  ;;  %v389_v14 = vld [vmem:[#allocation5 + $0x480] sm:$0xff] }
 0x124   : > { %4202 = vmatpush1.bf16.msra.mxu1 %v4201_v20  ;;  %v310_v20 = vld [vmem:[#allocation5 + $0x208] sm:$0xff] }
 0x125   : > { %4074 = vmatpush1.bf16.msra.mxu0 %v4073_v22  ;;  %4204 = vmatprep.subr.bf16.mxu1 %v4203_v23  ;;  %v320_v22 = vld [vmem:[#allocation5 + $0x258] sm:$0xff] }
 0x126   : > { %4076 = vmatprep.subr.bf16.mxu0 %v4075_v26  ;;  %v5373_v23 = vld [vmem:[%s5814_s5 + $0x58] sm:$0xff]  ;;  %v4223_v26 = vpack.c.bf16 %v958_v18, %v948_v15  ;;  %v4351_v31 = vpack.c.bf16 %v320_v22, %v310_v20  ;;  %v399_v18 = vld [vmem:[#allocation5 + $0x4d0] sm:$0xff]  ;;  %v1058_v22 = vld [vmem:[#allocation5 + $0x1968] sm:$0xff] }
 0x127   : > { %v1048_v20 = vld [vmem:[#allocation5 + $0x1918] sm:$0xff] }
 0x128   : > { %4206 = vmatpush1.bf16.msra.mxu1 %v4205_v33  ;;  %v968_v33 = vld [vmem:[#allocation5 + $0x1698] sm:$0xff] }
 0x129   : > { %4078 = vmatpush1.bf16.msra.mxu0 %v4077_v34  ;;  %4208 = vmatprep.subr.bf16.mxu1 %v4207_v21  ;;  %v978_v34 = vld [vmem:[#allocation5 + $0x16e8] sm:$0xff] }
 0x12a   : > { %4080 = vmatprep.subr.bf16.mxu0 %v4079_v38  ;;  %v330_v21 = vld [vmem:[#allocation5 + $0x2a8] sm:$0xff]  ;;  %v4353_v38 = vpack.c.bf16 %v319_v32, %v309_v29  ;;  %v4227_v39 = vpack.c.bf16 %v978_v34, %v968_v33  ;;  %v409_v29 = vld [vmem:[#allocation5 + $0x520] sm:$0xff]  ;;  %v419_v32 = vld [vmem:[#allocation5 + $0x570] sm:$0xff] }
 0x12b   : > { %v4355_v43 = vpack.c.bf16 %v340_v35, %v330_v21  ;;  %v1068_v33 = vld [vmem:[#allocation5 + $0x19b8] sm:$0xff]  ;;  %v1078_v34 = vld [vmem:[#allocation5 + $0x1a08] sm:$0xff] }
 0x12c   : > { %4210 = vmatpush1.bf16.msra.mxu1 %v4209_v44  ;;  %v339_v44 = vld [vmem:[#allocation5 + $0x2f0] sm:$0xff]  ;;  %v430_v21 = vld [vmem:[#allocation5 + $0x5c8] sm:$0xff]  ;;  %v440_v35 = vld [vmem:[#allocation5 + $0x618] sm:$0xff] }
 0x12d   : > { %4082 = vmatpush1.bf16.msra.mxu0 %v4081_v46  ;;  %4212 = vmatprep.subr.bf16.mxu1 %v4211_v47  ;;  %v988_v46 = vld [vmem:[#allocation5 + $0x1738] sm:$0xff]  ;;  %v998_v47 = vld [vmem:[#allocation5 + $0x1788] sm:$0xff]  ;;  %v4357_v52 = vpack.c.bf16 %v339_v44, %v329_v42  ;;  %v4375_v42 = vpack.c.bf16 %v440_v35, %v430_v21  ;;  %v1167_v35 = vld [vmem:[#allocation5 + $0x1cd0] sm:$0xff] }
 0x12e   : > { %4340 = vmatprep.subr.bf16.mxu0 %v4339_v49  ;;  %v360_v49 = vld [vmem:[#allocation5 + $0x398] sm:$0xff]  ;;  %v4231_v53 = vpack.c.bf16 %v998_v47, %v988_v46  ;;  %v1098_v46 = vld [vmem:[#allocation5 + $0x1aa8] sm:$0xff] }
 0x12f   : > { %2005 = vmatmul.mubr.f32.vlgmr.msra.gmra.mrb[6].mxu1 %v5372_v1  ;;  %v1017_v1 = vld [vmem:[#allocation5 + $0x1820] sm:$0xff]  ;;  %v1088_v44 = vld [vmem:[#allocation5 + $0x1a58] sm:$0xff]  ;;  %v450_v47 = vld [vmem:[#allocation5 + $0x668] sm:$0xff] }
 0x130   : > { %1839 = vmatmul.mubr.f32.vlgmr.msra.gmra.mrb[0].mxu0 %v227_v55  ;;  %4214 = vmatpush1.bf16.msra.mxu1 %v4213_v56  ;;  %v997_v55 = vld [vmem:[#allocation5 + $0x1780] sm:$0xff]  ;;  %v4237_v8 = vpack.c.bf16 %v1017_v1, %v1007_v16  ;;  %v479_v16 = vld [vmem:[#allocation5 + $0x750] sm:$0xff]  ;;  %v1128_v1 = vld [vmem:[#allocation5 + $0x1b98] sm:$0xff] }
 0x131   : > { %4342 = vmatpush1.bf16.msra.mxu0 %v4341_v57  ;;  %1844 = vmatprep.mubr.f32.mxu0 %v236_v58  ;;  %v349_v56 = vld [vmem:[#allocation5 + $0x340] sm:$0xff]  ;;  %v4359_v57 = vpack.c.bf16 %v360_v49, %v350_v37  ;;  %v359_v58 = vld [vmem:[#allocation5 + $0x390] sm:$0xff]  ;;  %v4233_v63 = vpack.c.bf16 %v997_v55, %v987_v54  ;;  %v1108_v55 = vld [vmem:[#allocation5 + $0x1af8] sm:$0xff] }
 0x132   : > { %4216 = vmatprep.subr.bf16.mxu1 %v4215_v61  ;;  %4344 = vmatprep.subr.bf16.mxu0 %v4343_v62  ;;  %v370_v61 = vld [vmem:[#allocation5 + $0x3e8] sm:$0xff]  ;;  %v380_v62 = vld [vmem:[#allocation5 + $0x438] sm:$0xff]  ;;  %v4361_v0 = vpack.c.bf16 %v359_v58, %v349_v56  ;;  %v459_v54 = vld [vmem:[#allocation5 + $0x6b0] sm:$0xff] }
 0x133   : > { %2010 = vmatprep.mubr.f32.mxu1 %v5373_v23  ;;  %v4363_v3 = vpack.c.bf16 %v380_v62, %v370_v61  ;;  %v410_v23 = vld [vmem:[#allocation5 + $0x528] sm:$0xff]  ;;  %v480_v58 = vld [vmem:[#allocation5 + $0x758] sm:$0xff]  ;;  %v1107_v62 = vld [vmem:[#allocation5 + $0x1af0] sm:$0xff] }
 0x134   : > { %1845 = vmatmul.mubr.f32.gmra.mrb[2].mxu0 %v235_v17  ;;  %4218 = vmatpush1.bf16.msra.mxu1 %v4217_v5  ;;  %v1028_v17 = vld [vmem:[#allocation5 + $0x1878] sm:$0xff]  ;;  %v1038_v5 = vld [vmem:[#allocation5 + $0x18c8] sm:$0xff] }
 0x135   : > { %4346 = vmatpush1.bf16.msra.mxu0 %v4345_v7  ;;  %1850 = vmatprep.mubr.f32.mxu0 %v244_v6  ;;  %v390_v6 = vld [vmem:[#allocation5 + $0x488] sm:$0xff]  ;;  %v400_v7 = vld [vmem:[#allocation5 + $0x4d8] sm:$0xff]  ;;  %v4239_v10 = vpack.c.bf16 %v1038_v5, %v1028_v17 }
 0x136   : > { %4220 = vmatprep.subr.bf16.mxu1 %v4219_v12  ;;  %4348 = vmatprep.subr.bf16.mxu0 %v4347_v13  ;;  %v1027_v12 = vld [vmem:[#allocation5 + $0x1870] sm:$0xff]  ;;  %v1037_v13 = vld [vmem:[#allocation5 + $0x18c0] sm:$0xff]  ;;  %v4367_v15 = vpack.c.bf16 %v400_v7, %v390_v6  ;;  %v1118_v56 = vld [vmem:[#allocation5 + $0x1b48] sm:$0xff]  ;;  %v4259_v6 = vpack.c.bf16 %v1138_v2, %v1128_v1 }
 0x137   : > { %2011 = vmatmul.mubr.f32.gmra.mrb[8].mxu1 %v5374_v36  ;;  %v4245_v36 = vpack.c.bf16 %v1057_v28, %v1047_v27  ;;  %v4255_v61 = vpack.c.bf16 %v1118_v56, %v1108_v55  ;;  %v1127_v7 = vld [vmem:[#allocation5 + $0x1b90] sm:$0xff]  ;;  %v1168_v28 = vld [vmem:[#allocation5 + $0x1cd8] sm:$0xff] }
 0x138   : > { %1851 = vmatmul.mubr.f32.gmra.mrb[4].mxu0 %v243_v11  ;;  %4222 = vmatpush1.bf16.msra.mxu1 %v4221_v24  ;;  %v420_v11 = vld [vmem:[#allocation5 + $0x578] sm:$0xff]  ;;  %v4241_v24 = vpack.c.bf16 %v1037_v13, %v1027_v12  ;;  %v499_v12 = vld [vmem:[#allocation5 + $0x7f0] sm:$0xff] }
 0x139   : > { %4350 = vmatpush1.bf16.msra.mxu0 %v4349_v25  ;;  %4224 = vmatprep.subr.bf16.mxu1 %v4223_v26  ;;  %v4369_v25 = vpack.c.bf16 %v399_v18, %v389_v14  ;;  %v4243_v26 = vpack.c.bf16 %v1058_v22, %v1048_v20  ;;  %v1148_v13 = vld [vmem:[#allocation5 + $0x1c38] sm:$0xff]  ;;  %v1158_v14 = vld [vmem:[#allocation5 + $0x1c88] sm:$0xff]  ;;  %v519_v27 = vld [vmem:[#allocation5 + $0x890] sm:$0xff] }
 0x13a   : > { %4352 = vmatprep.subr.bf16.mxu0 %v4351_v31  ;;  %2016 = vmatprep.mubr.f32.mxu1 %v5375_v48  ;;  %v4371_v31 = vpack.c.bf16 %v420_v11, %v410_v23  ;;  %v460_v48 = vld [vmem:[#allocation5 + $0x6b8] sm:$0xff]  ;;  %v4263_v23 = vpack.c.bf16 %v1158_v14, %v1148_v13  ;;  %v1147_v11 = vld [vmem:[#allocation5 + $0x1c30] sm:$0xff]  ;;  %v5379_v14 = vld [vmem:[%s5814_s5] sm:$0xff] }
 0x13b   : > { %2017 = vmatmul.mubr.f32.gmra.mrb[10].mxu1 %v5376_v50  ;;  %2253 = vmatprep.mubr.f32.mxu0 %v5377_v19  ;;  %v4251_v50 = vpack.c.bf16 %v1098_v46, %v1088_v44  ;;  %v1087_v19 = vld [vmem:[#allocation5 + $0x1a50] sm:$0xff]  ;;  %v520_v18 = vld [vmem:[#allocation5 + $0x898] sm:$0xff] }
 0x13c   : > { %4226 = vmatpush1.bf16.msra.mxu1 %v4225_v30  ;;  %2087 = vmatprep.mubr.f32.mxu1 %v5857_v45  ;;  %v4235_v45 = vpack.c.bf16 %v1018_v60, %v1008_v59  ;;  %v4373_v30 = vpack.c.bf16 %v419_v32, %v409_v29  ;;  %v1178_v29 = vld [vmem:[#allocation5 + $0x1d28] sm:$0xff]  ;;  %v540_v32 = vld [vmem:[#allocation5 + $0x938] sm:$0xff] }
 0x13d   : > { %4354 = vmatpush1.bf16.msra.mxu0 %v4353_v38  ;;  %4228 = vmatprep.subr.bf16.mxu1 %v4227_v39  ;;  %v4247_v38 = vpack.c.bf16 %v1078_v34, %v1068_v33  ;;  %v1067_v39 = vld [vmem:[#allocation5 + $0x19b0] sm:$0xff]  ;;  %v4267_v21 = vpack.c.bf16 %v1178_v29, %v1168_v28  ;;  %v620_v13 = vld [vmem:[#allocation5 + $0xbb8] sm:$0xff]  ;;  %v5380_v28 = vld [vmem:[%s5814_s5 + $0x68] sm:$0xff] }
 0x13e   : > { %4356 = vmatprep.subr.bf16.mxu0 %v4355_v43  ;;  %v439_v43 = vld [vmem:[#allocation5 + $0x610] sm:$0xff]  ;;  %v4249_v37 = vpack.c.bf16 %v1077_v40, %v1067_v39  ;;  %v1188_v40 = vld [vmem:[#allocation5 + $0x1d78] sm:$0xff]  ;;  %v630_v29 = vld [vmem:[#allocation5 + $0xc08] sm:$0xff] }
 0x13f   : > { %v4377_v49 = vpack.c.bf16 %v439_v43, %v429_v41  ;;  %v539_v39 = vld [vmem:[#allocation5 + $0x930] sm:$0xff]  ;;  %v1198_v41 = vld [vmem:[#allocation5 + $0x1dc8] sm:$0xff]  ;;  %v560_v43 = vld [vmem:[#allocation5 + $0x9d8] sm:$0xff] }
 0x140   : > { %4230 = vmatpush1.bf16.msra.mxu1 %v4229_v51  ;;  %v1097_v51 = vld [vmem:[#allocation5 + $0x1aa0] sm:$0xff] }
 0x141   : > { %4358 = vmatpush1.bf16.msra.mxu0 %v4357_v52  ;;  %4232 = vmatprep.subr.bf16.mxu1 %v4231_v53  ;;  %v449_v52 = vld [vmem:[#allocation5 + $0x660] sm:$0xff]  ;;  %v4379_v53 = vpack.c.bf16 %v460_v48, %v450_v47  ;;  %v4253_v59 = vpack.c.bf16 %v1097_v51, %v1087_v19  ;;  %v4271_v47 = vpack.c.bf16 %v1198_v41, %v1188_v40  ;;  %v1187_v48 = vld [vmem:[#allocation5 + $0x1d70] sm:$0xff]  ;;  %v1208_v51 = vld [vmem:[#allocation5 + $0x1e18] sm:$0xff] }
 0x142   : > { %4360 = vmatprep.subr.bf16.mxu0 %v4359_v57  ;;  %v470_v57 = vld [vmem:[#allocation5 + $0x708] sm:$0xff]  ;;  %v4381_v60 = vpack.c.bf16 %v459_v54, %v449_v52  ;;  %v559_v19 = vld [vmem:[#allocation5 + $0x9d0] sm:$0xff]  ;;  %v580_v54 = vld [vmem:[#allocation5 + $0xa78] sm:$0xff] }
 0x143   : > { %v1218_v52 = vld [vmem:[#allocation5 + $0x1e68] sm:$0xff]  ;;  %v639_v41 = vld [vmem:[#allocation5 + $0xc50] sm:$0xff] }
 0x144   : > { %4234 = vmatpush1.bf16.msra.mxu1 %v4233_v63  ;;  %v1117_v63 = vld [vmem:[#allocation5 + $0x1b40] sm:$0xff] }
 0x145   : > { %4362 = vmatpush1.bf16.msra.mxu0 %v4361_v0  ;;  %4236 = vmatprep.subr.bf16.mxu1 %v4235_v45  ;;  %v469_v0 = vld [vmem:[#allocation5 + $0x700] sm:$0xff]  ;;  %v4383_v45 = vpack.c.bf16 %v480_v58, %v470_v57  ;;  %v4257_v17 = vpack.c.bf16 %v1117_v63, %v1107_v62  ;;  %v4275_v57 = vpack.c.bf16 %v1218_v52, %v1208_v51  ;;  %v1207_v58 = vld [vmem:[#allocation5 + $0x1e10] sm:$0xff]  ;;  %v1228_v63 = vld [vmem:[#allocation5 + $0x1eb8] sm:$0xff] }
 0x146   : > { %4364 = vmatprep.subr.bf16.mxu0 %v4363_v3  ;;  %v490_v3 = vld [vmem:[#allocation5 + $0x7a8] sm:$0xff]  ;;  %v4385_v5 = vpack.c.bf16 %v479_v16, %v469_v0  ;;  %v579_v62 = vld [vmem:[#allocation5 + $0xa70] sm:$0xff]  ;;  %v600_v16 = vld [vmem:[#allocation5 + $0xb18] sm:$0xff] }
 0x147   : > { %v1238_v0 = vld [vmem:[#allocation5 + $0x1f08] sm:$0xff]  ;;  %v1287_v52 = vld [vmem:[#allocation5 + $0x2090] sm:$0xff] }
 0x148   : > { %4238 = vmatpush1.bf16.msra.mxu1 %v4237_v8  ;;  %v1137_v8 = vld [vmem:[#allocation5 + $0x1be0] sm:$0xff] }
 0x149   : > { %4366 = vmatpush1.bf16.msra.mxu0 %v4365_v9  ;;  %4240 = vmatprep.subr.bf16.mxu1 %v4239_v10  ;;  %v489_v9 = vld [vmem:[#allocation5 + $0x7a0] sm:$0xff]  ;;  %v4387_v10 = vpack.c.bf16 %v500_v4, %v490_v3  ;;  %v4261_v20 = vpack.c.bf16 %v1137_v8, %v1127_v7  ;;  %v4279_v3 = vpack.c.bf16 %v1238_v0, %v1228_v63  ;;  %v1227_v4 = vld [vmem:[#allocation5 + $0x1eb0] sm:$0xff]  ;;  %v1248_v8 = vld [vmem:[#allocation5 + $0x1f58] sm:$0xff] }
 0x14a   : > { %4368 = vmatprep.subr.bf16.mxu0 %v4367_v15  ;;  %v510_v15 = vld [vmem:[#allocation5 + $0x848] sm:$0xff]  ;;  %v4389_v22 = vpack.c.bf16 %v499_v12, %v489_v9  ;;  %v599_v7 = vld [vmem:[#allocation5 + $0xb10] sm:$0xff] }
 0x14b   : > { %v1258_v9 = vld [vmem:[#allocation5 + $0x1fa8] sm:$0xff] }
 0x14c   : > { %4242 = vmatpush1.bf16.msra.mxu1 %v4241_v24  ;;  %v1157_v24 = vld [vmem:[#allocation5 + $0x1c80] sm:$0xff]  ;;  %v610_v12 = vld [vmem:[#allocation5 + $0xb68] sm:$0xff] }
 0x14d   : > { %4370 = vmatpush1.bf16.msra.mxu0 %v4369_v25  ;;  %4244 = vmatprep.subr.bf16.mxu1 %v4243_v26  ;;  %v509_v25 = vld [vmem:[#allocation5 + $0x840] sm:$0xff]  ;;  %v4391_v26 = vpack.c.bf16 %v520_v18, %v510_v15  ;;  %v4265_v33 = vpack.c.bf16 %v1157_v24, %v1147_v11  ;;  %v4411_v24 = vpack.c.bf16 %v620_v13, %v610_v12  ;;  %v1327_v12 = vld [vmem:[#allocation5 + $0x21d0] sm:$0xff] }
 0x14e   : > { %4372 = vmatprep.subr.bf16.mxu0 %v4371_v31  ;;  %v530_v31 = vld [vmem:[#allocation5 + $0x8e8] sm:$0xff]  ;;  %v4393_v34 = vpack.c.bf16 %v519_v27, %v509_v25  ;;  %v609_v11 = vld [vmem:[#allocation5 + $0xb60] sm:$0xff]  ;;  %v619_v25 = vld [vmem:[#allocation5 + $0xbb0] sm:$0xff] }
 0x14f   : > { %v1278_v27 = vld [vmem:[#allocation5 + $0x2048] sm:$0xff]  ;;  %v1337_v13 = vld [vmem:[#allocation5 + $0x2220] sm:$0xff] }
 0x150   : > { %4246 = vmatpush1.bf16.msra.mxu1 %v4245_v36  ;;  %v1177_v36 = vld [vmem:[#allocation5 + $0x1d20] sm:$0xff] }
 0x151   : > { %4374 = vmatpush1.bf16.msra.mxu0 %v4373_v30  ;;  %4248 = vmatprep.subr.bf16.mxu1 %v4247_v38  ;;  %v529_v30 = vld [vmem:[#allocation5 + $0x8e0] sm:$0xff]  ;;  %v4395_v38 = vpack.c.bf16 %v540_v32, %v530_v31  ;;  %v4269_v44 = vpack.c.bf16 %v1177_v36, %v1167_v35  ;;  %v640_v31 = vld [vmem:[#allocation5 + $0xc58] sm:$0xff]  ;;  %v4413_v35 = vpack.c.bf16 %v619_v25, %v609_v11  ;;  %v710_v11 = vld [vmem:[#allocation5 + $0xe88] sm:$0xff] }
 0x152   : > { %4376 = vmatprep.subr.bf16.mxu0 %v4375_v42  ;;  %v550_v42 = vld [vmem:[#allocation5 + $0x988] sm:$0xff]  ;;  %v4397_v46 = vpack.c.bf16 %v539_v39, %v529_v30  ;;  %v5381_v32 = vld [vmem:[%s5814_s5 + $0x60] sm:$0xff]  ;;  %v1267_v30 = vld [vmem:[#allocation5 + $0x1ff0] sm:$0xff]  ;;  %v4415_v40 = vpack.c.bf16 %v640_v31, %v630_v29 }
 0x153   : > { %v629_v39 = vld [vmem:[#allocation5 + $0xc00] sm:$0xff]  ;;  %v1347_v29 = vld [vmem:[#allocation5 + $0x2270] sm:$0xff] }
 0x154   : > { %4250 = vmatpush1.bf16.msra.mxu1 %v4249_v37  ;;  %v1197_v37 = vld [vmem:[#allocation5 + $0x1dc0] sm:$0xff] }
 0x155   : > { %4378 = vmatpush1.bf16.msra.mxu0 %v4377_v49  ;;  %4252 = vmatprep.subr.bf16.mxu1 %v4251_v50  ;;  %v549_v49 = vld [vmem:[#allocation5 + $0x980] sm:$0xff]  ;;  %v4399_v50 = vpack.c.bf16 %v560_v43, %v550_v42  ;;  %v4273_v55 = vpack.c.bf16 %v1197_v37, %v1187_v48  ;;  %v1288_v42 = vld [vmem:[#allocation5 + $0x2098] sm:$0xff]  ;;  %v1298_v43 = vld [vmem:[#allocation5 + $0x20e8] sm:$0xff] }
 0x156   : > { %4380 = vmatprep.subr.bf16.mxu0 %v4379_v53  ;;  %v570_v53 = vld [vmem:[#allocation5 + $0xa28] sm:$0xff]  ;;  %v4401_v56 = vpack.c.bf16 %v559_v19, %v549_v49  ;;  %v5385_v48 = vld [vmem:[%s5814_s5 + $0xa0] sm:$0xff]  ;;  %v4417_v19 = vpack.c.bf16 %v639_v41, %v629_v39  ;;  %v4291_v51 = vpack.c.bf16 %v1298_v43, %v1288_v42  ;;  %v1367_v41 = vld [vmem:[#allocation5 + $0x2310] sm:$0xff] }
 0x157   : > { %v5386_v37 = vld [vmem:[%s5814_s5 + $0x88] sm:$0xff]  ;;  %v1357_v31 = vld [vmem:[#allocation5 + $0x22c0] sm:$0xff] }
 0x158   : > { %4254 = vmatpush1.bf16.msra.mxu1 %v4253_v59  ;;  %v1217_v59 = vld [vmem:[#allocation5 + $0x1e60] sm:$0xff] }
 0x159   : > { %4382 = vmatpush1.bf16.msra.mxu0 %v4381_v60  ;;  %4256 = vmatprep.subr.bf16.mxu1 %v4255_v61  ;;  %v569_v60 = vld [vmem:[#allocation5 + $0xa20] sm:$0xff]  ;;  %v4403_v61 = vpack.c.bf16 %v580_v54, %v570_v53  ;;  %v4277_v1 = vpack.c.bf16 %v1217_v59, %v1207_v58  ;;  %v1318_v58 = vld [vmem:[#allocation5 + $0x2188] sm:$0xff]  ;;  %v5388_v59 = vld [vmem:[%s5814_s5 + $0x38] sm:$0xff] }
 0x15a   : > { %4384 = vmatprep.subr.bf16.mxu0 %v4383_v45  ;;  %v590_v45 = vld [vmem:[#allocation5 + $0xac8] sm:$0xff]  ;;  %v4405_v2 = vpack.c.bf16 %v579_v62, %v569_v60  ;;  %v1297_v53 = vld [vmem:[#allocation5 + $0x20e0] sm:$0xff]  ;;  %v5389_v62 = vld [vmem:[%s5814_s5 + $0x18] sm:$0xff] }
 0x15b   : > { %v649_v54 = vld [vmem:[#allocation5 + $0xca0] sm:$0xff]  ;;  %v670_v60 = vld [vmem:[#allocation5 + $0xd48] sm:$0xff]  ;;  %v4293_v63 = vpack.c.bf16 %v1297_v53, %v1287_v52  ;;  %v1387_v52 = vld [vmem:[#allocation5 + $0x23b0] sm:$0xff] }
 0x15c   : > { %4258 = vmatpush1.bf16.msra.mxu1 %v4257_v17  ;;  %v1237_v17 = vld [vmem:[#allocation5 + $0x1f00] sm:$0xff] }
 0x15d   : > { %4386 = vmatpush1.bf16.msra.mxu0 %v4385_v5  ;;  %4260 = vmatprep.subr.bf16.mxu1 %v4259_v6  ;;  %v589_v5 = vld [vmem:[#allocation5 + $0xac0] sm:$0xff]  ;;  %v4407_v6 = vpack.c.bf16 %v600_v16, %v590_v45  ;;  %v4281_v15 = vpack.c.bf16 %v1237_v17, %v1227_v4  ;;  %v1307_v16 = vld [vmem:[#allocation5 + $0x2130] sm:$0xff]  ;;  %v1328_v17 = vld [vmem:[#allocation5 + $0x21d8] sm:$0xff] }
 0x15e   : > { %4388 = vmatprep.subr.bf16.mxu0 %v4387_v10  ;;  %v5378_v10 = vld [vmem:[%s5814_s5 + $0x20] sm:$0xff]  ;;  %v4409_v18 = vpack.c.bf16 %v599_v7, %v589_v5  ;;  %v679_v4 = vld [vmem:[#allocation5 + $0xd90] sm:$0xff]  ;;  %v1338_v5 = vld [vmem:[#allocation5 + $0x2228] sm:$0xff] }
 0x15f   : > { %v700_v7 = vld [vmem:[#allocation5 + $0xe38] sm:$0xff]  ;;  %v1377_v42 = vld [vmem:[#allocation5 + $0x2360] sm:$0xff] }
 0x160   : > { %4262 = vmatpush1.bf16.msra.mxu1 %v4261_v20  ;;  %v4283_v20 = vpack.c.bf16 %v1258_v9, %v1248_v8  ;;  %v729_v43 = vld [vmem:[#allocation5 + $0xf20] sm:$0xff] }
 0x161   : > { %4390 = vmatpush1.bf16.msra.mxu0 %v4389_v22  ;;  %4264 = vmatprep.subr.bf16.mxu1 %v4263_v23  ;;  %v1247_v22 = vld [vmem:[#allocation5 + $0x1f50] sm:$0xff]  ;;  %v1257_v23 = vld [vmem:[#allocation5 + $0x1fa0] sm:$0xff] }
 0x162   : > { %4392 = vmatprep.subr.bf16.mxu0 %v4391_v26  ;;  %v1268_v26 = vld [vmem:[#allocation5 + $0x1ff8] sm:$0xff]  ;;  %v1397_v53 = vld [vmem:[#allocation5 + $0x2400] sm:$0xff] }
 0x163   : > { %v4287_v36 = vpack.c.bf16 %v1278_v27, %v1268_v26  ;;  %v4301_v26 = vpack.c.bf16 %v1337_v13, %v1327_v12  ;;  %v789_v12 = vld [vmem:[#allocation5 + $0x1100] sm:$0xff] }
 0x164   : > { %4266 = vmatpush1.bf16.msra.mxu1 %v4265_v33  ;;  %v5382_v33 = vld [vmem:[%s5814_s5 + $0x48] sm:$0xff] }
 0x165   : > { %4394 = vmatpush1.bf16.msra.mxu0 %v4393_v34  ;;  %4268 = vmatprep.subr.bf16.mxu1 %v4267_v21  ;;  %v4285_v34 = vpack.c.bf16 %v1257_v23, %v1247_v22  ;;  %v5383_v21 = vld [vmem:[%s5814_s5 + $0x40] sm:$0xff]  ;;  %v1358_v22 = vld [vmem:[#allocation5 + $0x22c8] sm:$0xff] }
 0x166   : > { %4396 = vmatprep.subr.bf16.mxu0 %v4395_v38  ;;  %v1277_v38 = vld [vmem:[#allocation5 + $0x2040] sm:$0xff] }
 0x167   : > { %v4289_v49 = vpack.c.bf16 %v1277_v38, %v1267_v30  ;;  %v740_v30 = vld [vmem:[#allocation5 + $0xf78] sm:$0xff]  ;;  %v4305_v38 = vpack.c.bf16 %v1357_v31, %v1347_v29  ;;  %v1447_v29 = vld [vmem:[#allocation5 + $0x2590] sm:$0xff]  ;;  %v1457_v31 = vld [vmem:[#allocation5 + $0x25e0] sm:$0xff] }
 0x168   : > { %4270 = vmatpush1.bf16.msra.mxu1 %v4269_v44  ;;  %v5384_v44 = vld [vmem:[%s5814_s5 + $0xa8] sm:$0xff] }
 0x169   : > { %4398 = vmatpush1.bf16.msra.mxu0 %v4397_v46  ;;  %4272 = vmatprep.subr.bf16.mxu1 %v4271_v47  ;;  %v650_v46 = vld [vmem:[#allocation5 + $0xca8] sm:$0xff]  ;;  %v660_v47 = vld [vmem:[#allocation5 + $0xcf8] sm:$0xff] }
 0x16a   : > { %4400 = vmatprep.subr.bf16.mxu0 %v4399_v50  ;;  %v5387_v50 = vld [vmem:[%s5814_s5 + $0x80] sm:$0xff] }
 0x16c   : > { %4274 = vmatpush1.bf16.msra.mxu1 %v4273_v55  ;;  %v4419_v55 = vpack.c.bf16 %v660_v47, %v650_v46  ;;  %v739_v46 = vld [vmem:[#allocation5 + $0xf70] sm:$0xff]  ;;  %v1388_v47 = vld [vmem:[#allocation5 + $0x23b8] sm:$0xff] }
 0x16d   : > { %4402 = vmatpush1.bf16.msra.mxu0 %v4401_v56  ;;  %4276 = vmatprep.subr.bf16.mxu1 %v4275_v57  ;;  %v659_v56 = vld [vmem:[#allocation5 + $0xcf0] sm:$0xff]  ;;  %v1308_v57 = vld [vmem:[#allocation5 + $0x2138] sm:$0xff] }
 0x16e   : > { %4404 = vmatprep.subr.bf16.mxu0 %v4403_v61  ;;  %v680_v61 = vld [vmem:[#allocation5 + $0xd98] sm:$0xff]  ;;  %v4421_v0 = vpack.c.bf16 %v659_v56, %v649_v54  ;;  %v4295_v45 = vpack.c.bf16 %v1318_v58, %v1308_v57  ;;  %v749_v54 = vld [vmem:[#allocation5 + $0xfc0] sm:$0xff]  ;;  %v759_v56 = vld [vmem:[#allocation5 + $0x1010] sm:$0xff] }
 0x16f   : > { %2088 = vmatmul.mubr.f32.vlgmr.msra.gmra.mrb[6].mxu1 %v5378_v10  ;;  %v4299_v10 = vpack.c.bf16 %v1338_v5, %v1328_v17  ;;  %v1408_v57 = vld [vmem:[#allocation5 + $0x2458] sm:$0xff]  ;;  %v1418_v58 = vld [vmem:[#allocation5 + $0x24a8] sm:$0xff] }
 0x170   : > { %4278 = vmatpush1.bf16.msra.mxu1 %v4277_v1  ;;  %2254 = vmatmul.mubr.f32.vlgmr.msra.gmra.mrb[6].mxu0 %v5379_v14  ;;  %v1317_v1 = vld [vmem:[#allocation5 + $0x2180] sm:$0xff]  ;;  %v790_v17 = vld [vmem:[#allocation5 + $0x1108] sm:$0xff]  ;;  %v800_v5 = vld [vmem:[#allocation5 + $0x1158] sm:$0xff] }
 0x171   : > { %4406 = vmatpush1.bf16.msra.mxu0 %v4405_v2  ;;  %4280 = vmatprep.subr.bf16.mxu1 %v4279_v3  ;;  %v669_v2 = vld [vmem:[#allocation5 + $0xd40] sm:$0xff]  ;;  %v4423_v3 = vpack.c.bf16 %v680_v61, %v670_v60  ;;  %v4297_v8 = vpack.c.bf16 %v1317_v1, %v1307_v16  ;;  %v780_v60 = vld [vmem:[#allocation5 + $0x10b8] sm:$0xff]  ;;  %v4313_v61 = vpack.c.bf16 %v1397_v53, %v1387_v52 }
 0x172   : > { %4408 = vmatprep.subr.bf16.mxu0 %v4407_v6  ;;  %2093 = vmatprep.mubr.f32.mxu1 %v5380_v28  ;;  %v690_v6 = vld [vmem:[#allocation5 + $0xde8] sm:$0xff]  ;;  %v4425_v9 = vpack.c.bf16 %v679_v4, %v669_v2  ;;  %v689_v14 = vld [vmem:[#allocation5 + $0xde0] sm:$0xff]  ;;  %v779_v2 = vld [vmem:[#allocation5 + $0x10b0] sm:$0xff] }
 0x173   : > { %2094 = vmatmul.mubr.f32.gmra.mrb[8].mxu1 %v5381_v32  ;;  %2259 = vmatprep.mubr.f32.mxu0 %v5382_v33  ;;  %v709_v32 = vld [vmem:[#allocation5 + $0xe80] sm:$0xff]  ;;  %v1438_v4 = vld [vmem:[#allocation5 + $0x2548] sm:$0xff] }
 0x174   : > { %4282 = vmatpush1.bf16.msra.mxu1 %v4281_v15  ;;  %2260 = vmatmul.mubr.f32.gmra.mrb[8].mxu0 %v5383_v21  ;;  %v4427_v15 = vpack.c.bf16 %v700_v7, %v690_v6  ;;  %v1368_v21 = vld [vmem:[#allocation5 + $0x2318] sm:$0xff]  ;;  %v769_v16 = vld [vmem:[#allocation5 + $0x1060] sm:$0xff] }
 0x175   : > { %4410 = vmatpush1.bf16.msra.mxu0 %v4409_v18  ;;  %4284 = vmatprep.subr.bf16.mxu1 %v4283_v20  ;;  %v699_v18 = vld [vmem:[#allocation5 + $0xe30] sm:$0xff]  ;;  %v1348_v20 = vld [vmem:[#allocation5 + $0x2278] sm:$0xff]  ;;  %v4445_v7 = vpack.c.bf16 %v779_v2, %v769_v16  ;;  %v869_v2 = vld [vmem:[#allocation5 + $0x1380] sm:$0xff] }
 0x176   : > { %4412 = vmatprep.subr.bf16.mxu0 %v4411_v24  ;;  %2099 = vmatprep.mubr.f32.mxu1 %v5384_v44  ;;  %v720_v24 = vld [vmem:[#allocation5 + $0xed8] sm:$0xff]  ;;  %v4429_v27 = vpack.c.bf16 %v699_v18, %v689_v14  ;;  %v4303_v28 = vpack.c.bf16 %v1358_v22, %v1348_v20  ;;  %v4447_v14 = vpack.c.bf16 %v800_v5, %v790_v17  ;;  %v1458_v20 = vld [vmem:[#allocation5 + $0x25e8] sm:$0xff]  ;;  %v1507_v16 = vld [vmem:[#allocation5 + $0x2770] sm:$0xff] }
 0x177   : > { %2100 = vmatmul.mubr.f32.gmra.mrb[10].mxu1 %v5385_v48  ;;  %2265 = vmatprep.mubr.f32.mxu0 %v5386_v37  ;;  %v4431_v33 = vpack.c.bf16 %v720_v24, %v710_v11  ;;  %v1398_v48 = vld [vmem:[#allocation5 + $0x2408] sm:$0xff]  ;;  %v1448_v18 = vld [vmem:[#allocation5 + $0x2598] sm:$0xff] }
 0x178   : > { %4286 = vmatpush1.bf16.msra.mxu1 %v4285_v34  ;;  %2266 = vmatmul.mubr.f32.gmra.mrb[10].mxu0 %v5387_v50  ;;  %v719_v34 = vld [vmem:[#allocation5 + $0xed0] sm:$0xff]  ;;  %v750_v37 = vld [vmem:[#allocation5 + $0xfc8] sm:$0xff]  ;;  %v4309_v50 = vpack.c.bf16 %v1377_v42, %v1367_v41  ;;  %v820_v24 = vld [vmem:[#allocation5 + $0x11f8] sm:$0xff] }
 0x179   : > { %4414 = vmatpush1.bf16.msra.mxu0 %v4413_v35  ;;  %4288 = vmatprep.subr.bf16.mxu1 %v4287_v36  ;;  %v1378_v35 = vld [vmem:[#allocation5 + $0x2368] sm:$0xff]  ;;  %v4433_v39 = vpack.c.bf16 %v719_v34, %v709_v32  ;;  %v809_v32 = vld [vmem:[#allocation5 + $0x11a0] sm:$0xff]  ;;  %v252_v17 = vld [vmem:[#allocation5 + $0x38] sm:$0xff] }
 0x17a   : > { %4416 = vmatprep.subr.bf16.mxu0 %v4415_v40  ;;  %2170 = vmatprep.mubr.f32.mxu1 %v5388_v59  ;;  %v730_v36 = vld [vmem:[#allocation5 + $0xf28] sm:$0xff]  ;;  %v4307_v40 = vpack.c.bf16 %v1378_v35, %v1368_v21  ;;  %v819_v21 = vld [vmem:[#allocation5 + $0x11f0] sm:$0xff]  ;;  %v1468_v35 = vld [vmem:[#allocation5 + $0x2638] sm:$0xff] }
 0x17b   : > { %2336 = vmatprep.mubr.f32.mxu0 %v5389_v62  ;;  %v4435_v44 = vpack.c.bf16 %v740_v30, %v730_v36  ;;  %v770_v59 = vld [vmem:[#allocation5 + $0x1068] sm:$0xff]  ;;  %v4441_v62 = vpack.c.bf16 %v759_v56, %v749_v54  ;;  %v4453_v41 = vpack.c.bf16 %v819_v21, %v809_v32  ;;  %v1487_v54 = vld [vmem:[#allocation5 + $0x26d0] sm:$0xff]  ;;  %v849_v56 = vld [vmem:[#allocation5 + $0x12e0] sm:$0xff] }
 0x17c   : > { %4290 = vmatpush1.bf16.msra.mxu1 %v4289_v49  ;;  %v760_v49 = vld [vmem:[#allocation5 + $0x1018] sm:$0xff]  ;;  %v4443_v1 = vpack.c.bf16 %v780_v60, %v770_v59  ;;  %v810_v11 = vld [vmem:[#allocation5 + $0x11a8] sm:$0xff]  ;;  %v271_v32 = vld [vmem:[#allocation5 + $0xd0] sm:$0xff] }
 0x17d   : > { %4418 = vmatpush1.bf16.msra.mxu0 %v4417_v19  ;;  %4292 = vmatprep.subr.bf16.mxu1 %v4291_v51  ;;  %v4437_v19 = vpack.c.bf16 %v739_v46, %v729_v43  ;;  %v4311_v51 = vpack.c.bf16 %v1398_v48, %v1388_v47  ;;  %v4451_v34 = vpack.c.bf16 %v820_v24, %v810_v11  ;;  %v1478_v36 = vld [vmem:[#allocation5 + $0x2688] sm:$0xff]  ;;  %v1467_v43 = vld [vmem:[#allocation5 + $0x2630] sm:$0xff]  ;;  %v829_v46 = vld [vmem:[#allocation5 + $0x1240] sm:$0xff] }
 0x17e   : > { %4420 = vmatprep.subr.bf16.mxu0 %v4419_v55  ;;  %v4439_v55 = vpack.c.bf16 %v760_v49, %v750_v37  ;;  %v4327_v42 = vpack.c.bf16 %v1478_v36, %v1468_v35  ;;  %v839_v48 = vld [vmem:[#allocation5 + $0x1290] sm:$0xff]  ;;  %v1488_v37 = vld [vmem:[#allocation5 + $0x26d8] sm:$0xff]  ;;  %v1498_v49 = vld [vmem:[#allocation5 + $0x2728] sm:$0xff] }
 0x17f   : > { %v4457_v52 = vpack.c.bf16 %v839_v48, %v829_v46  ;;  %v4331_v53 = vpack.c.bf16 %v1498_v49, %v1488_v37  ;;  %v1508_v59 = vld [vmem:[#allocation5 + $0x2778] sm:$0xff]  ;;  %v1518_v60 = vld [vmem:[#allocation5 + $0x27c8] sm:$0xff]  ;;  %v919_v36 = vld [vmem:[#allocation5 + $0x1510] sm:$0xff] }
 0x180   : > { %4294 = vmatpush1.bf16.msra.mxu1 %v4293_v63  ;;  %v4315_v63 = vpack.c.bf16 %v1418_v58, %v1408_v57  ;;  %v859_v58 = vld [vmem:[#allocation5 + $0x1330] sm:$0xff]  ;;  %v262_v5 = vld [vmem:[#allocation5 + $0x88] sm:$0xff]  ;;  %v920_v24 = vld [vmem:[#allocation5 + $0x1518] sm:$0xff] }
 0x181   : > { %4422 = vmatpush1.bf16.msra.mxu0 %v4421_v0  ;;  %4296 = vmatprep.subr.bf16.mxu1 %v4295_v45  ;;  %v1407_v0 = vld [vmem:[#allocation5 + $0x2450] sm:$0xff]  ;;  %v1417_v45 = vld [vmem:[#allocation5 + $0x24a0] sm:$0xff]  ;;  %v910_v11 = vld [vmem:[#allocation5 + $0x14c8] sm:$0xff] }
 0x182   : > { %4424 = vmatprep.subr.bf16.mxu0 %v4423_v3  ;;  %v5898_v23 = vpop.f32.mrb[0].mxu1  ;;  %v1428_v3 = vld [vmem:[#allocation5 + $0x24f8] sm:$0xff]  ;;  %v4317_v6 = vpack.c.bf16 %v1417_v45, %v1407_v0  ;;  %v4461_v0 = vpack.c.bf16 %v859_v58, %v849_v56  ;;  %v4335_v45 = vpack.c.bf16 %v1518_v60, %v1508_v59  ;;  %v4471_v21 = vpack.c.bf16 %v920_v24, %v910_v11  ;;  %v929_v37 = vld [vmem:[#allocation5 + $0x1560] sm:$0xff]  ;;  %v291_v49 = vld [vmem:[#allocation5 + $0x170] sm:$0xff] }
 0x183   : > { %v5900_v25 = vpop.f32.mrb[1].mxu1  ;;  %v5392_v46 = vld [vmem:[%s5814_s5 + $0x78] sm:$0xff]  ;;  %v362_v24 = vld [vmem:[#allocation5 + $0x3a8] sm:$0xff] }
 0x184   : > { %4298 = vmatpush1.bf16.msra.mxu1 %v4297_v8  ;;  %v4319_v8 = vpack.c.bf16 %v1438_v4, %v1428_v3  ;;  %v879_v4 = vld [vmem:[#allocation5 + $0x13d0] sm:$0xff]  ;;  %v960_v56 = vld [vmem:[#allocation5 + $0x1658] sm:$0xff] }
 0x185   : > { %4426 = vmatpush1.bf16.msra.mxu0 %v4425_v9  ;;  %4300 = vmatprep.subr.bf16.mxu1 %v4299_v10  ;;  %v1427_v9 = vld [vmem:[#allocation5 + $0x24f0] sm:$0xff]  ;;  %v1437_v10 = vld [vmem:[#allocation5 + $0x2540] sm:$0xff]  ;;  %v5395_v58 = vld [vmem:[%s5814_s5 + $0xb8] sm:$0xff] }
 0x186   : > { %4428 = vmatprep.subr.bf16.mxu0 %v4427_v15  ;;  %v5902_v13 = vpop.f32.mrb[2].mxu1  ;;  %v799_v15 = vld [vmem:[#allocation5 + $0x1150] sm:$0xff]  ;;  %v352_v11 = vld [vmem:[#allocation5 + $0x358] sm:$0xff] }
 0x187   : > { %v5904_v22 = vpop.f32.mrb[3].mxu1 }
 0x188   : > { %4302 = vmatpush1.bf16.msra.mxu1 %v4301_v26  ;;  %v4321_v26 = vpack.c.bf16 %v1437_v10, %v1427_v9  ;;  %v4465_v9 = vpack.c.bf16 %v879_v4, %v869_v2  ;;  %v4595_v10 = vpack.c.bf16 %v262_v5, %v252_v17  ;;  %v342_v2 = vld [vmem:[#allocation5 + $0x308] sm:$0xff]  ;;  %v5397_v4 = vld [vmem:[%s5814_s5 + $0xb0] sm:$0xff]  ;;  %v980_v5 = vld [vmem:[#allocation5 + $0x16f8] sm:$0xff] }
 0x189   : > { %4430 = vmatpush1.bf16.msra.mxu0 %v4429_v27  ;;  %4304 = vmatprep.subr.bf16.mxu1 %v4303_v28  ;;  %v4449_v27 = vpack.c.bf16 %v799_v15, %v789_v12  ;;  %v4323_v28 = vpack.c.bf16 %v1458_v20, %v1448_v18  ;;  %v251_v12 = vld [vmem:[#allocation5 + $0x30] sm:$0xff]  ;;  %v889_v18 = vld [vmem:[#allocation5 + $0x1420] sm:$0xff]  ;;  %v970_v17 = vld [vmem:[#allocation5 + $0x16a8] sm:$0xff] }
 0x18a   : > { %4432 = vmatprep.subr.bf16.mxu0 %v4431_v33  ;;  %v5906_v33 = vpop.f32.mrb[4].mxu1  ;;  %v899_v20 = vld [vmem:[#allocation5 + $0x1470] sm:$0xff] }
 0x18b   : > { %v5908_v30 = vpop.f32.mrb[5].mxu1 }
 0x18c   : > { %4306 = vmatpush1.bf16.msra.mxu1 %v4305_v38  ;;  %v830_v38 = vld [vmem:[#allocation5 + $0x1248] sm:$0xff] }
 0x18d   : > { %4434 = vmatpush1.bf16.msra.mxu0 %v4433_v39  ;;  %4308 = vmatprep.subr.bf16.mxu1 %v4307_v40  ;;  %v840_v39 = vld [vmem:[#allocation5 + $0x1298] sm:$0xff]  ;;  %v4325_v40 = vpack.c.bf16 %v1457_v31, %v1447_v29  ;;  %v4469_v29 = vpack.c.bf16 %v899_v20, %v889_v18  ;;  %v909_v31 = vld [vmem:[#allocation5 + $0x14c0] sm:$0xff]  ;;  %v4483_v18 = vpack.c.bf16 %v980_v5, %v970_v17  ;;  %v979_v20 = vld [vmem:[#allocation5 + $0x16f0] sm:$0xff] }
 0x18e   : > { %4436 = vmatprep.subr.bf16.mxu0 %v4435_v44  ;;  %v1477_v44 = vld [vmem:[#allocation5 + $0x2680] sm:$0xff]  ;;  %v4455_v47 = vpack.c.bf16 %v840_v39, %v830_v38  ;;  %v292_v38 = vld [vmem:[#allocation5 + $0x178] sm:$0xff]  ;;  %v302_v39 = vld [vmem:[#allocation5 + $0x1c8] sm:$0xff] }
 0x18f   : > { %v4603_v48 = vpack.c.bf16 %v302_v39, %v292_v38  ;;  %v999_v39 = vld [vmem:[#allocation5 + $0x1790] sm:$0xff]  ;;  %v421_v5 = vld [vmem:[#allocation5 + $0x580] sm:$0xff] }
 0x190   : > { %4310 = vmatpush1.bf16.msra.mxu1 %v4309_v50  ;;  %v850_v50 = vld [vmem:[#allocation5 + $0x12e8] sm:$0xff]  ;;  %v411_v17 = vld [vmem:[#allocation5 + $0x530] sm:$0xff] }
 0x191   : > { %4438 = vmatpush1.bf16.msra.mxu0 %v4437_v19  ;;  %4312 = vmatprep.subr.bf16.mxu1 %v4311_v51  ;;  %v860_v19 = vld [vmem:[#allocation5 + $0x1338] sm:$0xff]  ;;  %v4329_v51 = vpack.c.bf16 %v1477_v44, %v1467_v43  ;;  %v5391_v43 = vld [vmem:[%s5814_s5 + $0x10] sm:$0xff] }
 0x192   : > { %4440 = vmatprep.subr.bf16.mxu0 %v4439_v55  ;;  %v1497_v55 = vld [vmem:[#allocation5 + $0x2720] sm:$0xff]  ;;  %v4459_v57 = vpack.c.bf16 %v860_v19, %v850_v50 }
 0x193   : > { %v301_v50 = vld [vmem:[#allocation5 + $0x1c0] sm:$0xff] }
 0x194   : > { %4314 = vmatpush1.bf16.msra.mxu1 %v4313_v61  ;;  %v870_v61 = vld [vmem:[#allocation5 + $0x1388] sm:$0xff]  ;;  %v4605_v59 = vpack.c.bf16 %v301_v50, %v291_v49  ;;  %v381_v49 = vld [vmem:[#allocation5 + $0x440] sm:$0xff] }
 0x195   : > { %4442 = vmatpush1.bf16.msra.mxu0 %v4441_v62  ;;  %4316 = vmatprep.subr.bf16.mxu1 %v4315_v63  ;;  %v880_v62 = vld [vmem:[#allocation5 + $0x13d8] sm:$0xff]  ;;  %v4333_v63 = vpack.c.bf16 %v1497_v55, %v1487_v54  ;;  %v5393_v54 = vld [vmem:[%s5814_s5 + $0x70] sm:$0xff]  ;;  %v950_v55 = vld [vmem:[#allocation5 + $0x1608] sm:$0xff] }
 0x196   : > { %4444 = vmatprep.subr.bf16.mxu0 %v4443_v1  ;;  %v1517_v1 = vld [vmem:[#allocation5 + $0x27c0] sm:$0xff]  ;;  %v4463_v3 = vpack.c.bf16 %v880_v62, %v870_v61 }
 0x197   : > { %v949_v62 = vld [vmem:[#allocation5 + $0x1600] sm:$0xff] }
 0x198   : > { %4318 = vmatpush1.bf16.msra.mxu1 %v4317_v6  ;;  %v890_v6 = vld [vmem:[#allocation5 + $0x1428] sm:$0xff] }
 0x199   : > { %4446 = vmatpush1.bf16.msra.mxu0 %v4445_v7  ;;  %4320 = vmatprep.subr.bf16.mxu1 %v4319_v8  ;;  %v900_v7 = vld [vmem:[#allocation5 + $0x1478] sm:$0xff]  ;;  %v4337_v8 = vpack.c.bf16 %v1517_v1, %v1507_v16  ;;  %v959_v16 = vld [vmem:[#allocation5 + $0x1650] sm:$0xff] }
 0x19a   : > { %4448 = vmatprep.subr.bf16.mxu0 %v4447_v14  ;;  %v261_v14 = vld [vmem:[#allocation5 + $0x80] sm:$0xff]  ;;  %v4467_v15 = vpack.c.bf16 %v900_v7, %v890_v6  ;;  %v332_v1 = vld [vmem:[#allocation5 + $0x2b8] sm:$0xff] }
 0x19b   : > { %v5398_v6 = vld [vmem:[%s5814_s5 + $0x98] sm:$0xff] }
 0x19c   : > { %4322 = vmatpush1.bf16.msra.mxu1 %v4321_v26  ;;  %v272_v26 = vld [vmem:[#allocation5 + $0xd8] sm:$0xff] }
 0x19d   : > { %4450 = vmatpush1.bf16.msra.mxu0 %v4449_v27  ;;  %4324 = vmatprep.subr.bf16.mxu1 %v4323_v28  ;;  %v282_v27 = vld [vmem:[#allocation5 + $0x128] sm:$0xff]  ;;  %v4597_v28 = vpack.c.bf16 %v261_v14, %v251_v12  ;;  %v969_v12 = vld [vmem:[#allocation5 + $0x16a0] sm:$0xff]  ;;  %v331_v14 = vld [vmem:[#allocation5 + $0x2b0] sm:$0xff] }
 0x19e   : > { %4452 = vmatprep.subr.bf16.mxu0 %v4451_v34  ;;  %v281_v34 = vld [vmem:[#allocation5 + $0x120] sm:$0xff]  ;;  %v4599_v35 = vpack.c.bf16 %v282_v27, %v272_v26  ;;  %v5400_v26 = vld [vmem:[%s5814_s5 + $0x90] sm:$0xff]  ;;  %v990_v27 = vld [vmem:[#allocation5 + $0x1748] sm:$0xff] }
 0x19f   : > { %v4601_v44 = vpack.c.bf16 %v281_v34, %v271_v32  ;;  %v4485_v32 = vpack.c.bf16 %v979_v20, %v969_v12  ;;  %v4615_v34 = vpack.c.bf16 %v362_v24, %v352_v11  ;;  %v1080_v12 = vld [vmem:[#allocation5 + $0x1a18] sm:$0xff]  ;;  %v1069_v20 = vld [vmem:[#allocation5 + $0x19c0] sm:$0xff]  ;;  %v431_v11 = vld [vmem:[#allocation5 + $0x5d0] sm:$0xff] }
 0x1a0   : > { %4326 = vmatpush1.bf16.msra.mxu1 %v4325_v40  ;;  %v5390_v40 = vld [vmem:[%s5814_s5 + $0x30] sm:$0xff]  ;;  %v441_v24 = vld [vmem:[#allocation5 + $0x620] sm:$0xff] }
 0x1a1   : > { %4454 = vmatpush1.bf16.msra.mxu0 %v4453_v41  ;;  %4328 = vmatprep.subr.bf16.mxu1 %v4327_v42  ;;  %v930_v41 = vld [vmem:[#allocation5 + $0x1568] sm:$0xff]  ;;  %v940_v42 = vld [vmem:[#allocation5 + $0x15b8] sm:$0xff] }
 0x1a2   : > { %4456 = vmatprep.subr.bf16.mxu0 %v4455_v47  ;;  %v4473_v47 = vpack.c.bf16 %v919_v36, %v909_v31  ;;  %v4475_v19 = vpack.c.bf16 %v940_v42, %v930_v41  ;;  %v361_v36 = vld [vmem:[#allocation5 + $0x3a0] sm:$0xff]  ;;  %v382_v41 = vld [vmem:[#allocation5 + $0x448] sm:$0xff] }
 0x1a3   : > { %v1010_v42 = vld [vmem:[#allocation5 + $0x17e8] sm:$0xff] }
 0x1a4   : > { %4330 = vmatpush1.bf16.msra.mxu1 %v4329_v51  ;;  %v939_v51 = vld [vmem:[#allocation5 + $0x15b0] sm:$0xff] }
 0x1a5   : > { %4458 = vmatpush1.bf16.msra.mxu0 %v4457_v52  ;;  %4332 = vmatprep.subr.bf16.mxu1 %v4331_v53  ;;  %v312_v52 = vld [vmem:[#allocation5 + $0x218] sm:$0xff]  ;;  %v322_v53 = vld [vmem:[#allocation5 + $0x268] sm:$0xff]  ;;  %v4477_v60 = vpack.c.bf16 %v939_v51, %v929_v37  ;;  %v371_v37 = vld [vmem:[#allocation5 + $0x3f0] sm:$0xff] }
 0x1a6   : > { %4460 = vmatprep.subr.bf16.mxu0 %v4459_v57  ;;  %v5394_v57 = vld [vmem:[%s5814_s5 + $0x58] sm:$0xff]  ;;  %v4607_v61 = vpack.c.bf16 %v322_v53, %v312_v52  ;;  %v402_v52 = vld [vmem:[#allocation5 + $0x4e8] sm:$0xff] }
 0x1a7   : > { %v392_v51 = vld [vmem:[#allocation5 + $0x498] sm:$0xff]  ;;  %v1030_v53 = vld [vmem:[#allocation5 + $0x1888] sm:$0xff] }
 0x1a8   : > { %4334 = vmatpush1.bf16.msra.mxu1 %v4333_v63  ;;  %v311_v63 = vld [vmem:[#allocation5 + $0x210] sm:$0xff] }
 0x1a9   : > { %4462 = vmatpush1.bf16.msra.mxu0 %v4461_v0  ;;  %4336 = vmatprep.subr.bf16.mxu1 %v4335_v45  ;;  %v321_v0 = vld [vmem:[#allocation5 + $0x260] sm:$0xff]  ;;  %v4479_v45 = vpack.c.bf16 %v960_v56, %v950_v55  ;;  %v4621_v55 = vpack.c.bf16 %v381_v49, %v371_v37 }
 0x1aa   : > { %4464 = vmatprep.subr.bf16.mxu0 %v4463_v3  ;;  %v5396_v3 = vld [vmem:[%s5814_s5 + $0x50] sm:$0xff]  ;;  %v4609_v7 = vpack.c.bf16 %v321_v0, %v311_v63  ;;  %v412_v63 = vld [vmem:[#allocation5 + $0x538] sm:$0xff]  ;;  %v422_v0 = vld [vmem:[#allocation5 + $0x588] sm:$0xff] }
 0x1ab   : > { %v1109_v49 = vld [vmem:[#allocation5 + $0x1b00] sm:$0xff] }
 0x1ac   : > { %4338 = vmatpush1.bf16.msra.mxu1 %v4337_v8  ;;  %v5399_v8 = vld [vmem:[%s5814_s5 + $0x8] sm:$0xff] }
 0x1ad   : > { %4466 = vmatpush1.bf16.msra.mxu0 %v4465_v9  ;;  %4596 = vmatprep.subr.bf16.mxu1 %v4595_v10  ;;  %v4481_v9 = vpack.c.bf16 %v959_v16, %v949_v62  ;;  %v4611_v10 = vpack.c.bf16 %v342_v2, %v332_v1  ;;  %v1039_v62 = vld [vmem:[#allocation5 + $0x18d0] sm:$0xff]  ;;  %v1060_v16 = vld [vmem:[#allocation5 + $0x1978] sm:$0xff] }
 0x1ae   : > { %4468 = vmatprep.subr.bf16.mxu0 %v4467_v15  ;;  %v341_v15 = vld [vmem:[#allocation5 + $0x300] sm:$0xff] }
 0x1af   : > { %2171 = vmatmul.mubr.f32.vlgmr.msra.gmra.mrb[6].mxu1 %v5390_v40  ;;  %v4613_v31 = vpack.c.bf16 %v341_v15, %v331_v14  ;;  %v372_v40 = vld [vmem:[#allocation5 + $0x3f8] sm:$0xff]  ;;  %v4629_v14 = vpack.c.bf16 %v421_v5, %v411_v17  ;;  %v1149_v5 = vld [vmem:[#allocation5 + $0x1c40] sm:$0xff] }
 0x1b0   : > { %2337 = vmatmul.mubr.f32.vlgmr.msra.gmra.mrb[6].mxu0 %v5391_v43  ;;  %4598 = vmatpush1.bf16.msra.mxu1 %v4597_v28  ;;  %v1000_v28 = vld [vmem:[#allocation5 + $0x1798] sm:$0xff] }
 0x1b1   : > { %4470 = vmatpush1.bf16.msra.mxu0 %v4469_v29  ;;  %2176 = vmatprep.mubr.f32.mxu1 %v5392_v46  ;;  %v5401_v29 = vld [vmem:[%s5814_s5 + $0x28] sm:$0xff]  ;;  %v4487_v38 = vpack.c.bf16 %v1000_v28, %v990_v27  ;;  %v1020_v43 = vld [vmem:[#allocation5 + $0x1838] sm:$0xff]  ;;  %v1079_v27 = vld [vmem:[#allocation5 + $0x1a10] sm:$0xff] }
 0x1b2   : > { %4472 = vmatprep.subr.bf16.mxu0 %v4471_v21  ;;  %4600 = vmatprep.subr.bf16.mxu1 %v4599_v35  ;;  %v989_v21 = vld [vmem:[#allocation5 + $0x1740] sm:$0xff]  ;;  %v351_v35 = vld [vmem:[#allocation5 + $0x350] sm:$0xff]  ;;  %v4491_v50 = vpack.c.bf16 %v1020_v43, %v1010_v42  ;;  %v452_v28 = vld [vmem:[#allocation5 + $0x678] sm:$0xff] }
 0x1b3   : > { %2177 = vmatmul.mubr.f32.gmra.mrb[8].mxu1 %v5393_v54  ;;  %2342 = vmatprep.mubr.f32.mxu0 %v5394_v57  ;;  %v4489_v46 = vpack.c.bf16 %v999_v39, %v989_v21  ;;  %v1040_v54 = vld [vmem:[#allocation5 + $0x18d8] sm:$0xff]  ;;  %v4623_v57 = vpack.c.bf16 %v402_v52, %v392_v51  ;;  %v4505_v21 = vpack.c.bf16 %v1079_v27, %v1069_v20  ;;  %v461_v39 = vld [vmem:[#allocation5 + $0x6c0] sm:$0xff]  ;;  %v482_v43 = vld [vmem:[#allocation5 + $0x768] sm:$0xff] }
 0x1b4   : > { %4602 = vmatpush1.bf16.msra.mxu1 %v4601_v44  ;;  %2182 = vmatprep.mubr.f32.mxu1 %v5395_v58  ;;  %v4617_v44 = vpack.c.bf16 %v361_v36, %v351_v35  ;;  %v1029_v58 = vld [vmem:[#allocation5 + $0x1880] sm:$0xff]  ;;  %v472_v42 = vld [vmem:[#allocation5 + $0x718] sm:$0xff]  ;;  %v1119_v52 = vld [vmem:[#allocation5 + $0x1b50] sm:$0xff] }
 0x1b5   : > { %4474 = vmatpush1.bf16.msra.mxu0 %v4473_v47  ;;  %4604 = vmatprep.subr.bf16.mxu1 %v4603_v48  ;;  %v4619_v47 = vpack.c.bf16 %v382_v41, %v372_v40  ;;  %v1009_v48 = vld [vmem:[#allocation5 + $0x17e0] sm:$0xff]  ;;  %v4497_v2 = vpack.c.bf16 %v1039_v62, %v1029_v58  ;;  %v1099_v41 = vld [vmem:[#allocation5 + $0x1ab0] sm:$0xff]  ;;  %v4639_v37 = vpack.c.bf16 %v482_v43, %v472_v42 }
 0x1b6   : > { %4476 = vmatprep.subr.bf16.mxu0 %v4475_v19  ;;  %2343 = vmatmul.mubr.f32.gmra.mrb[8].mxu0 %v5396_v3  ;;  %v1019_v19 = vld [vmem:[#allocation5 + $0x1830] sm:$0xff]  ;;  %v4627_v3 = vpack.c.bf16 %v422_v0, %v412_v63  ;;  %v1089_v36 = vld [vmem:[#allocation5 + $0x1a60] sm:$0xff]  ;;  %v4513_v58 = vpack.c.bf16 %v1119_v52, %v1109_v49 }
 0x1b7   : > { %2183 = vmatmul.mubr.f32.gmra.mrb[10].mxu1 %v5397_v4  ;;  %2348 = vmatprep.mubr.f32.mxu0 %v5398_v6  ;;  %v4493_v56 = vpack.c.bf16 %v1019_v19, %v1009_v48  ;;  %v1049_v4 = vld [vmem:[#allocation5 + $0x1920] sm:$0xff]  ;;  %v4509_v48 = vpack.c.bf16 %v1099_v41, %v1089_v36  ;;  %v1139_v0 = vld [vmem:[#allocation5 + $0x1bf0] sm:$0xff] }
 0x1b8   : > { %4606 = vmatpush1.bf16.msra.mxu1 %v4605_v59  ;;  %2585 = vmatprep.mubr.f32.mxu1 %v5399_v8  ;;  %v391_v59 = vld [vmem:[#allocation5 + $0x490] sm:$0xff]  ;;  %v432_v8 = vld [vmem:[#allocation5 + $0x5d8] sm:$0xff]  ;;  %v481_v19 = vld [vmem:[#allocation5 + $0x760] sm:$0xff] }
 0x1b9   : > { %4478 = vmatpush1.bf16.msra.mxu0 %v4477_v60  ;;  %4608 = vmatprep.subr.bf16.mxu1 %v4607_v61  ;;  %v401_v60 = vld [vmem:[#allocation5 + $0x4e0] sm:$0xff]  ;;  %v4495_v61 = vpack.c.bf16 %v1040_v54, %v1030_v53  ;;  %v492_v53 = vld [vmem:[#allocation5 + $0x7b8] sm:$0xff]  ;;  %v502_v54 = vld [vmem:[#allocation5 + $0x808] sm:$0xff] }
 0x1ba   : > { %4480 = vmatprep.subr.bf16.mxu0 %v4479_v45  ;;  %2349 = vmatmul.mubr.f32.gmra.mrb[10].mxu0 %v5400_v26  ;;  %v1050_v45 = vld [vmem:[#allocation5 + $0x1928] sm:$0xff]  ;;  %v4625_v1 = vpack.c.bf16 %v401_v60, %v391_v59  ;;  %v4643_v59 = vpack.c.bf16 %v502_v54, %v492_v53  ;;  %v1129_v60 = vld [vmem:[#allocation5 + $0x1ba0] sm:$0xff]  ;;  %v1199_v43 = vld [vmem:[#allocation5 + $0x1dd0] sm:$0xff] }
 0x1bb   : > { %2419 = vmatprep.mubr.f32.mxu0 %v5401_v29  ;;  %v4499_v6 = vpack.c.bf16 %v1060_v16, %v1050_v45  ;;  %v462_v29 = vld [vmem:[#allocation5 + $0x6c8] sm:$0xff]  ;;  %v501_v62 = vld [vmem:[#allocation5 + $0x800] sm:$0xff]  ;;  %v512_v45 = vld [vmem:[#allocation5 + $0x858] sm:$0xff] }
 0x1bc   : > { %4610 = vmatpush1.bf16.msra.mxu1 %v4609_v7  ;;  %v1059_v7 = vld [vmem:[#allocation5 + $0x1970] sm:$0xff]  ;;  %v4635_v35 = vpack.c.bf16 %v462_v29, %v452_v28  ;;  %v522_v16 = vld [vmem:[#allocation5 + $0x8a8] sm:$0xff]  ;;  %v541_v27 = vld [vmem:[#allocation5 + $0x940] sm:$0xff] }
 0x1bd   : > { %4482 = vmatpush1.bf16.msra.mxu0 %v4481_v9  ;;  %4612 = vmatprep.subr.bf16.mxu1 %v4611_v10  ;;  %v442_v9 = vld [vmem:[#allocation5 + $0x628] sm:$0xff]  ;;  %v4501_v15 = vpack.c.bf16 %v1059_v7, %v1049_v4  ;;  %v4517_v4 = vpack.c.bf16 %v1139_v0, %v1129_v60  ;;  %v4647_v17 = vpack.c.bf16 %v522_v16, %v512_v45  ;;  %v521_v7 = vld [vmem:[#allocation5 + $0x8a0] sm:$0xff]  ;;  %v1179_v29 = vld [vmem:[#allocation5 + $0x1d30] sm:$0xff] }
 0x1be   : > { %4484 = vmatprep.subr.bf16.mxu0 %v4483_v18  ;;  %v1070_v10 = vld [vmem:[#allocation5 + $0x19c8] sm:$0xff]  ;;  %v4631_v18 = vpack.c.bf16 %v442_v9, %v432_v8  ;;  %v1159_v9 = vld [vmem:[#allocation5 + $0x1c90] sm:$0xff]  ;;  %v561_v41 = vld [vmem:[#allocation5 + $0x9e0] sm:$0xff] }
 0x1bf   : > { %v4503_v26 = vpack.c.bf16 %v1080_v12, %v1070_v10  ;;  %v532_v10 = vld [vmem:[#allocation5 + $0x8f8] sm:$0xff]  ;;  %v542_v12 = vld [vmem:[#allocation5 + $0x948] sm:$0xff]  ;;  %v4521_v20 = vpack.c.bf16 %v1159_v9, %v1149_v5  ;;  %v581_v52 = vld [vmem:[#allocation5 + $0xa80] sm:$0xff] }
 0x1c0   : > { %4614 = vmatpush1.bf16.msra.mxu1 %v4613_v31  ;;  %v1090_v31 = vld [vmem:[#allocation5 + $0x1a68] sm:$0xff]  ;;  %v1219_v54 = vld [vmem:[#allocation5 + $0x1e70] sm:$0xff]  ;;  %v601_v0 = vld [vmem:[#allocation5 + $0xb20] sm:$0xff] }
 0x1c1   : > { %4486 = vmatpush1.bf16.msra.mxu0 %v4485_v32  ;;  %4616 = vmatprep.subr.bf16.mxu1 %v4615_v34  ;;  %v1100_v32 = vld [vmem:[#allocation5 + $0x1ab8] sm:$0xff]  ;;  %v4633_v34 = vpack.c.bf16 %v441_v24, %v431_v11  ;;  %v4651_v11 = vpack.c.bf16 %v542_v12, %v532_v10  ;;  %v1169_v24 = vld [vmem:[#allocation5 + $0x1ce0] sm:$0xff]  ;;  %v1239_v16 = vld [vmem:[#allocation5 + $0x1f10] sm:$0xff] }
 0x1c2   : > { %4488 = vmatprep.subr.bf16.mxu0 %v4487_v38  ;;  %v451_v38 = vld [vmem:[#allocation5 + $0x670] sm:$0xff]  ;;  %v4507_v40 = vpack.c.bf16 %v1100_v32, %v1090_v31  ;;  %v552_v31 = vld [vmem:[#allocation5 + $0x998] sm:$0xff]  ;;  %v562_v32 = vld [vmem:[#allocation5 + $0x9e8] sm:$0xff]  ;;  %v4525_v36 = vpack.c.bf16 %v1179_v29, %v1169_v24 }
 0x1c3   : > { %v5403_v5 = vld [vmem:[%s5814_s5 + $0x20] sm:$0xff]  ;;  %v611_v10 = vld [vmem:[#allocation5 + $0xb70] sm:$0xff]  ;;  %v1270_v24 = vld [vmem:[#allocation5 + $0x2008] sm:$0xff] }
 0x1c4   : > { %4618 = vmatpush1.bf16.msra.mxu1 %v4617_v44  ;;  %v1110_v44 = vld [vmem:[#allocation5 + $0x1b08] sm:$0xff]  ;;  %v1249_v9 = vld [vmem:[#allocation5 + $0x1f60] sm:$0xff] }
 0x1c5   : > { %4490 = vmatpush1.bf16.msra.mxu0 %v4489_v46  ;;  %4620 = vmatprep.subr.bf16.mxu1 %v4619_v47  ;;  %v1120_v46 = vld [vmem:[#allocation5 + $0x1b58] sm:$0xff]  ;;  %v4637_v47 = vpack.c.bf16 %v461_v39, %v451_v38  ;;  %v4655_v38 = vpack.c.bf16 %v562_v32, %v552_v31  ;;  %v1189_v39 = vld [vmem:[#allocation5 + $0x1d80] sm:$0xff] }
 0x1c6   : > { %4492 = vmatprep.subr.bf16.mxu0 %v4491_v50  ;;  %v471_v50 = vld [vmem:[#allocation5 + $0x710] sm:$0xff]  ;;  %v4511_v51 = vpack.c.bf16 %v1120_v46, %v1110_v44  ;;  %v572_v44 = vld [vmem:[#allocation5 + $0xa38] sm:$0xff]  ;;  %v582_v46 = vld [vmem:[#allocation5 + $0xa88] sm:$0xff]  ;;  %v4529_v49 = vpack.c.bf16 %v1199_v43, %v1189_v39 }
 0x1c7   : > { %v621_v12 = vld [vmem:[#allocation5 + $0xbc0] sm:$0xff]  ;;  %v652_v39 = vld [vmem:[#allocation5 + $0xcb8] sm:$0xff] }
 0x1c8   : > { %4622 = vmatpush1.bf16.msra.mxu1 %v4621_v55  ;;  %v1130_v55 = vld [vmem:[#allocation5 + $0x1ba8] sm:$0xff]  ;;  %v5406_v29 = vld [vmem:[%s5814_s5 + $0x60] sm:$0xff]  ;;  %v1300_v43 = vld [vmem:[#allocation5 + $0x20f8] sm:$0xff] }
 0x1c9   : > { %4494 = vmatpush1.bf16.msra.mxu0 %v4493_v56  ;;  %4624 = vmatprep.subr.bf16.mxu1 %v4623_v57  ;;  %v1140_v56 = vld [vmem:[#allocation5 + $0x1bf8] sm:$0xff]  ;;  %v4641_v57 = vpack.c.bf16 %v481_v19, %v471_v50  ;;  %v4659_v50 = vpack.c.bf16 %v582_v46, %v572_v44  ;;  %v1209_v19 = vld [vmem:[#allocation5 + $0x1e20] sm:$0xff]  ;;  %v5408_v44 = vld [vmem:[%s5814_s5 + $0xa8] sm:$0xff] }
 0x1ca   : > { %4496 = vmatprep.subr.bf16.mxu0 %v4495_v61  ;;  %v491_v61 = vld [vmem:[#allocation5 + $0x7b0] sm:$0xff]  ;;  %v4515_v63 = vpack.c.bf16 %v1140_v56, %v1130_v55  ;;  %v592_v55 = vld [vmem:[#allocation5 + $0xad8] sm:$0xff]  ;;  %v602_v56 = vld [vmem:[#allocation5 + $0xb28] sm:$0xff]  ;;  %v4533_v60 = vpack.c.bf16 %v1219_v54, %v1209_v19 }
 0x1cb   : > { %v5409_v46 = vld [vmem:[%s5814_s5 + $0x88] sm:$0xff]  ;;  %v651_v19 = vld [vmem:[#allocation5 + $0xcb0] sm:$0xff]  ;;  %v672_v54 = vld [vmem:[#allocation5 + $0xd58] sm:$0xff] }
 0x1cc   : > { %4626 = vmatpush1.bf16.msra.mxu1 %v4625_v1  ;;  %v1150_v1 = vld [vmem:[#allocation5 + $0x1c48] sm:$0xff] }
 0x1cd   : > { %4498 = vmatpush1.bf16.msra.mxu0 %v4497_v2  ;;  %4628 = vmatprep.subr.bf16.mxu1 %v4627_v3  ;;  %v1160_v2 = vld [vmem:[#allocation5 + $0x1c98] sm:$0xff]  ;;  %v4645_v3 = vpack.c.bf16 %v501_v62, %v491_v61  ;;  %v4663_v61 = vpack.c.bf16 %v602_v56, %v592_v55  ;;  %v1229_v62 = vld [vmem:[#allocation5 + $0x1ec0] sm:$0xff]  ;;  %v682_v55 = vld [vmem:[#allocation5 + $0xda8] sm:$0xff] }
 0x1ce   : > { %4500 = vmatprep.subr.bf16.mxu0 %v4499_v6  ;;  %v511_v6 = vld [vmem:[#allocation5 + $0x850] sm:$0xff]  ;;  %v4519_v8 = vpack.c.bf16 %v1160_v2, %v1150_v1  ;;  %v612_v1 = vld [vmem:[#allocation5 + $0xb78] sm:$0xff]  ;;  %v622_v2 = vld [vmem:[#allocation5 + $0xbc8] sm:$0xff] }
 0x1cf   : > { %v5411_v56 = vld [vmem:[%s5814_s5 + $0x80] sm:$0xff] }
 0x1d0   : > { %4630 = vmatpush1.bf16.msra.mxu1 %v4629_v14  ;;  %v1170_v14 = vld [vmem:[#allocation5 + $0x1ce8] sm:$0xff] }
 0x1d1   : > { %4502 = vmatpush1.bf16.msra.mxu0 %v4501_v15  ;;  %4632 = vmatprep.subr.bf16.mxu1 %v4631_v18  ;;  %v1180_v15 = vld [vmem:[#allocation5 + $0x1d38] sm:$0xff]  ;;  %v4649_v18 = vpack.c.bf16 %v521_v7, %v511_v6  ;;  %v4537_v7 = vpack.c.bf16 %v1239_v16, %v1229_v62  ;;  %v681_v16 = vld [vmem:[#allocation5 + $0xda0] sm:$0xff] }
 0x1d2   : > { %4504 = vmatprep.subr.bf16.mxu0 %v4503_v26  ;;  %v531_v26 = vld [vmem:[#allocation5 + $0x8f0] sm:$0xff]  ;;  %v4523_v28 = vpack.c.bf16 %v1180_v15, %v1170_v14 }
 0x1d3   : > { %v1259_v15 = vld [vmem:[#allocation5 + $0x1fb0] sm:$0xff] }
 0x1d4   : > { %4634 = vmatpush1.bf16.msra.mxu1 %v4633_v34  ;;  %v1190_v34 = vld [vmem:[#allocation5 + $0x1d88] sm:$0xff]  ;;  %v4541_v31 = vpack.c.bf16 %v1259_v15, %v1249_v9  ;;  %v1329_v9 = vld [vmem:[#allocation5 + $0x21e0] sm:$0xff]  ;;  %v1339_v15 = vld [vmem:[#allocation5 + $0x2230] sm:$0xff] }
 0x1d5   : > { %4506 = vmatpush1.bf16.msra.mxu0 %v4505_v21  ;;  %4636 = vmatprep.subr.bf16.mxu1 %v4635_v35  ;;  %v1200_v21 = vld [vmem:[#allocation5 + $0x1dd8] sm:$0xff]  ;;  %v4653_v35 = vpack.c.bf16 %v541_v27, %v531_v26  ;;  %v5405_v27 = vld [vmem:[%s5814_s5 + $0x48] sm:$0xff] }
 0x1d6   : > { %4508 = vmatprep.subr.bf16.mxu0 %v4507_v40  ;;  %v551_v40 = vld [vmem:[#allocation5 + $0x990] sm:$0xff]  ;;  %v4527_v42 = vpack.c.bf16 %v1200_v21, %v1190_v34  ;;  %v1280_v26 = vld [vmem:[#allocation5 + $0x2058] sm:$0xff]  ;;  %v1269_v34 = vld [vmem:[#allocation5 + $0x2000] sm:$0xff] }
 0x1d7   : > { %v631_v21 = vld [vmem:[#allocation5 + $0xc10] sm:$0xff] }
 0x1d8   : > { %4638 = vmatpush1.bf16.msra.mxu1 %v4637_v47  ;;  %v1210_v47 = vld [vmem:[#allocation5 + $0x1e28] sm:$0xff] }
 0x1d9   : > { %4510 = vmatpush1.bf16.msra.mxu0 %v4509_v48  ;;  %4640 = vmatprep.subr.bf16.mxu1 %v4639_v37  ;;  %v1220_v48 = vld [vmem:[#allocation5 + $0x1e78] sm:$0xff]  ;;  %v4657_v37 = vpack.c.bf16 %v561_v41, %v551_v40  ;;  %v662_v40 = vld [vmem:[#allocation5 + $0xd08] sm:$0xff]  ;;  %v5407_v41 = vld [vmem:[%s5814_s5 + $0x40] sm:$0xff] }
 0x1da   : > { %4512 = vmatprep.subr.bf16.mxu0 %v4511_v51  ;;  %v571_v51 = vld [vmem:[#allocation5 + $0xa30] sm:$0xff]  ;;  %v4531_v53 = vpack.c.bf16 %v1220_v48, %v1210_v47  ;;  %v5410_v48 = vld [vmem:[%s5814_s5 + $0xa0] sm:$0xff] }
 0x1dc   : > { %4642 = vmatpush1.bf16.msra.mxu1 %v4641_v57  ;;  %v1230_v57 = vld [vmem:[#allocation5 + $0x1ec8] sm:$0xff] }
 0x1dd   : > { %4514 = vmatpush1.bf16.msra.mxu0 %v4513_v58  ;;  %4644 = vmatprep.subr.bf16.mxu1 %v4643_v59  ;;  %v1240_v58 = vld [vmem:[#allocation5 + $0x1f18] sm:$0xff]  ;;  %v4661_v59 = vpack.c.bf16 %v581_v52, %v571_v51  ;;  %v661_v51 = vld [vmem:[#allocation5 + $0xd00] sm:$0xff] }
 0x1de   : > { %4516 = vmatprep.subr.bf16.mxu0 %v4515_v63  ;;  %v591_v63 = vld [vmem:[#allocation5 + $0xad0] sm:$0xff]  ;;  %v4535_v45 = vpack.c.bf16 %v1240_v58, %v1230_v57  ;;  %v1310_v57 = vld [vmem:[#allocation5 + $0x2148] sm:$0xff]  ;;  %v1320_v58 = vld [vmem:[#allocation5 + $0x2198] sm:$0xff] }
 0x1df   : > { %v4665_v6 = vpack.c.bf16 %v601_v0, %v591_v63  ;;  %v4679_v63 = vpack.c.bf16 %v682_v55, %v672_v54  ;;  %v1309_v0 = vld [vmem:[#allocation5 + $0x2140] sm:$0xff]  ;;  %v762_v54 = vld [vmem:[#allocation5 + $0x1028] sm:$0xff] }
 0x1e0   : > { %4646 = vmatpush1.bf16.msra.mxu1 %v4645_v3  ;;  %v5402_v3 = vld [vmem:[%s5814_s5] sm:$0xff]  ;;  %v1390_v55 = vld [vmem:[#allocation5 + $0x23c8] sm:$0xff] }
 0x1e1   : > { %4518 = vmatpush1.bf16.msra.mxu0 %v4517_v4  ;;  %4648 = vmatprep.subr.bf16.mxu1 %v4647_v17  ;;  %v1250_v4 = vld [vmem:[#allocation5 + $0x1f68] sm:$0xff]  ;;  %v1260_v17 = vld [vmem:[#allocation5 + $0x1fb8] sm:$0xff] }
 0x1e2   : > { %4520 = vmatprep.subr.bf16.mxu0 %v4519_v8  ;;  %v4667_v8 = vpack.c.bf16 %v622_v2, %v612_v1  ;;  %v4539_v14 = vpack.c.bf16 %v1260_v17, %v1250_v4  ;;  %v4551_v1 = vpack.c.bf16 %v1320_v58, %v1310_v57  ;;  %v1319_v2 = vld [vmem:[#allocation5 + $0x2190] sm:$0xff]  ;;  %v702_v4 = vld [vmem:[#allocation5 + $0xe48] sm:$0xff] }
 0x1e3   : > { %v1330_v17 = vld [vmem:[#allocation5 + $0x21e8] sm:$0xff] }
 0x1e4   : > { %4650 = vmatpush1.bf16.msra.mxu1 %v4649_v18  ;;  %v632_v18 = vld [vmem:[#allocation5 + $0xc18] sm:$0xff] }
 0x1e5   : > { %4522 = vmatpush1.bf16.msra.mxu0 %v4521_v20  ;;  %4652 = vmatprep.subr.bf16.mxu1 %v4651_v11  ;;  %v642_v20 = vld [vmem:[#allocation5 + $0xc68] sm:$0xff] }
 0x1e6   : > { %4524 = vmatprep.subr.bf16.mxu0 %v4523_v28  ;;  %v5404_v11 = vld [vmem:[%s5814_s5 + $0x68] sm:$0xff]  ;;  %v4669_v28 = vpack.c.bf16 %v621_v12, %v611_v10  ;;  %v4671_v32 = vpack.c.bf16 %v642_v20, %v632_v18  ;;  %v691_v10 = vld [vmem:[#allocation5 + $0xdf0] sm:$0xff]  ;;  %v701_v12 = vld [vmem:[#allocation5 + $0xe40] sm:$0xff] }
 0x1e7   : > { %v712_v18 = vld [vmem:[#allocation5 + $0xe98] sm:$0xff]  ;;  %v722_v20 = vld [vmem:[#allocation5 + $0xee8] sm:$0xff] }
 0x1e8   : > { %4654 = vmatpush1.bf16.msra.mxu1 %v4653_v35  ;;  %v641_v35 = vld [vmem:[#allocation5 + $0xc60] sm:$0xff] }
 0x1e9   : > { %4526 = vmatpush1.bf16.msra.mxu0 %v4525_v36  ;;  %4656 = vmatprep.subr.bf16.mxu1 %v4655_v38  ;;  %v4543_v36 = vpack.c.bf16 %v1280_v26, %v1270_v24  ;;  %v1279_v38 = vld [vmem:[#allocation5 + $0x2050] sm:$0xff]  ;;  %v4673_v47 = vpack.c.bf16 %v641_v35, %v631_v21  ;;  %v1350_v24 = vld [vmem:[#allocation5 + $0x2288] sm:$0xff]  ;;  %v1360_v26 = vld [vmem:[#allocation5 + $0x22d8] sm:$0xff] }
 0x1ea   : > { %4528 = vmatprep.subr.bf16.mxu0 %v4527_v42  ;;  %v1290_v42 = vld [vmem:[#allocation5 + $0x20a8] sm:$0xff]  ;;  %v1349_v21 = vld [vmem:[#allocation5 + $0x2280] sm:$0xff]  ;;  %v711_v35 = vld [vmem:[#allocation5 + $0xe90] sm:$0xff] }
 0x1eb   : > { %v4547_v52 = vpack.c.bf16 %v1300_v43, %v1290_v42  ;;  %v1370_v42 = vld [vmem:[#allocation5 + $0x2328] sm:$0xff]  ;;  %v1380_v43 = vld [vmem:[#allocation5 + $0x2378] sm:$0xff] }
 0x1ec   : > { %4658 = vmatpush1.bf16.msra.mxu1 %v4657_v37  ;;  %v4545_v37 = vpack.c.bf16 %v1279_v38, %v1269_v34  ;;  %v4687_v34 = vpack.c.bf16 %v722_v20, %v712_v18  ;;  %v4559_v38 = vpack.c.bf16 %v1360_v26, %v1350_v24  ;;  %v1429_v24 = vld [vmem:[#allocation5 + $0x2500] sm:$0xff]  ;;  %v791_v26 = vld [vmem:[#allocation5 + $0x1110] sm:$0xff] }
 0x1ed   : > { %4530 = vmatpush1.bf16.msra.mxu0 %v4529_v49  ;;  %4660 = vmatprep.subr.bf16.mxu1 %v4659_v50  ;;  %v4675_v49 = vpack.c.bf16 %v662_v40, %v652_v39  ;;  %v1289_v50 = vld [vmem:[#allocation5 + $0x20a0] sm:$0xff]  ;;  %v1359_v39 = vld [vmem:[#allocation5 + $0x22d0] sm:$0xff]  ;;  %v732_v40 = vld [vmem:[#allocation5 + $0xf38] sm:$0xff] }
 0x1ee   : > { %4532 = vmatprep.subr.bf16.mxu0 %v4531_v53  ;;  %v1299_v53 = vld [vmem:[#allocation5 + $0x20f0] sm:$0xff] }
 0x1ef   : > { %2586 = vmatmul.mubr.f32.vlgmr.msra.gmra.mrb[12].mxu1 %v5402_v3  ;;  %v4549_v62 = vpack.c.bf16 %v1299_v53, %v1289_v50  ;;  %v692_v3 = vld [vmem:[#allocation5 + $0xdf8] sm:$0xff]  ;;  %v731_v50 = vld [vmem:[#allocation5 + $0xf30] sm:$0xff] }
 0x1f0   : > { %2420 = vmatmul.mubr.f32.vlgmr.msra.gmra.mrb[6].mxu0 %v5403_v5  ;;  %4662 = vmatpush1.bf16.msra.mxu1 %v4661_v59  ;;  %v5412_v59 = vld [vmem:[%s5814_s5 + $0x38] sm:$0xff] }
 0x1f1   : > { %4534 = vmatpush1.bf16.msra.mxu0 %v4533_v60  ;;  %4664 = vmatprep.subr.bf16.mxu1 %v4663_v61  ;;  %v5413_v60 = vld [vmem:[%s5814_s5 + $0x18] sm:$0xff]  ;;  %v4677_v61 = vpack.c.bf16 %v661_v51, %v651_v19  ;;  %v741_v19 = vld [vmem:[#allocation5 + $0xf80] sm:$0xff]  ;;  %v4563_v51 = vpack.c.bf16 %v1380_v43, %v1370_v42 }
 0x1f2   : > { %4536 = vmatprep.subr.bf16.mxu0 %v4535_v45  ;;  %2425 = vmatprep.mubr.f32.mxu0 %v5404_v11  ;;  %v671_v45 = vld [vmem:[#allocation5 + $0xd50] sm:$0xff]  ;;  %v1340_v5 = vld [vmem:[#allocation5 + $0x2238] sm:$0xff]  ;;  %v4693_v58 = vpack.c.bf16 %v741_v19, %v731_v50  ;;  %v821_v42 = vld [vmem:[#allocation5 + $0x1200] sm:$0xff] }
 0x1f3   : > { %2591 = vmatprep.mubr.f32.mxu1 %v5405_v27  ;;  %v752_v53 = vld [vmem:[#allocation5 + $0xfd8] sm:$0xff] }
 0x1f4   : > { %4666 = vmatpush1.bf16.msra.mxu1 %v4665_v6  ;;  %2426 = vmatmul.mubr.f32.gmra.mrb[8].mxu0 %v5406_v29  ;;  %v4681_v6 = vpack.c.bf16 %v681_v16, %v671_v45  ;;  %v4685_v29 = vpack.c.bf16 %v701_v12, %v691_v10  ;;  %v1399_v16 = vld [vmem:[#allocation5 + $0x2410] sm:$0xff]  ;;  %v792_v10 = vld [vmem:[#allocation5 + $0x1118] sm:$0xff]  ;;  %v802_v12 = vld [vmem:[#allocation5 + $0x1168] sm:$0xff] }
 0x1f5   : > { %4538 = vmatpush1.bf16.msra.mxu0 %v4537_v7  ;;  %4668 = vmatprep.subr.bf16.mxu1 %v4667_v8  ;;  %v4553_v7 = vpack.c.bf16 %v1319_v2, %v1309_v0  ;;  %v4683_v8 = vpack.c.bf16 %v702_v4, %v692_v3  ;;  %v761_v0 = vld [vmem:[#allocation5 + $0x1020] sm:$0xff]  ;;  %v782_v2 = vld [vmem:[#allocation5 + $0x10c8] sm:$0xff]  ;;  %v1420_v3 = vld [vmem:[#allocation5 + $0x24b8] sm:$0xff] }
 0x1f6   : > { %4540 = vmatprep.subr.bf16.mxu0 %v4539_v14  ;;  %2592 = vmatmul.mubr.f32.gmra.mrb[14].mxu1 %v5407_v41  ;;  %v4555_v14 = vpack.c.bf16 %v1340_v5, %v1330_v17  ;;  %v742_v41 = vld [vmem:[#allocation5 + $0xf88] sm:$0xff]  ;;  %v1409_v5 = vld [vmem:[#allocation5 + $0x2460] sm:$0xff] }
 0x1f7   : > { %2431 = vmatprep.mubr.f32.mxu0 %v5408_v44  ;;  %2597 = vmatprep.mubr.f32.mxu1 %v5409_v46 }
 0x1f8   : > { %4670 = vmatpush1.bf16.msra.mxu1 %v4669_v28  ;;  %2432 = vmatmul.mubr.f32.gmra.mrb[10].mxu0 %v5410_v48  ;;  %v4561_v48 = vpack.c.bf16 %v1359_v39, %v1349_v21  ;;  %v822_v21 = vld [vmem:[#allocation5 + $0x1208] sm:$0xff] }
 0x1f9   : > { %4542 = vmatpush1.bf16.msra.mxu0 %v4541_v31  ;;  %4672 = vmatprep.subr.bf16.mxu1 %v4671_v32  ;;  %v4557_v32 = vpack.c.bf16 %v1339_v15, %v1329_v9  ;;  %v1419_v9 = vld [vmem:[#allocation5 + $0x24b0] sm:$0xff]  ;;  %v1440_v15 = vld [vmem:[#allocation5 + $0x2558] sm:$0xff] }
 0x1fa   : > { %4544 = vmatprep.subr.bf16.mxu0 %v4543_v36  ;;  %2598 = vmatmul.mubr.f32.gmra.mrb[16].mxu1 %v5411_v56  ;;  %v721_v36 = vld [vmem:[#allocation5 + $0xee0] sm:$0xff]  ;;  %v1400_v56 = vld [vmem:[#allocation5 + $0x2418] sm:$0xff]  ;;  %v4573_v20 = vpack.c.bf16 %v1419_v9, %v1409_v5 }
 0x1fb   : > { %2502 = vmatprep.mubr.f32.mxu0 %v5412_v59  ;;  %2668 = vmatprep.mubr.f32.mxu1 %v5413_v60  ;;  %v4689_v46 = vpack.c.bf16 %v721_v36, %v711_v35  ;;  %v4567_v45 = vpack.c.bf16 %v1400_v56, %v1390_v55  ;;  %v1450_v35 = vld [vmem:[#allocation5 + $0x25a8] sm:$0xff]  ;;  %v1460_v36 = vld [vmem:[#allocation5 + $0x25f8] sm:$0xff]  ;;  %v1479_v55 = vld [vmem:[#allocation5 + $0x2690] sm:$0xff] }
 0x1fc   : > { %4674 = vmatpush1.bf16.msra.mxu1 %v4673_v47  ;;  %v4579_v43 = vpack.c.bf16 %v1460_v36, %v1450_v35  ;;  %v852_v56 = vld [vmem:[#allocation5 + $0x12f8] sm:$0xff]  ;;  %v881_v9 = vld [vmem:[#allocation5 + $0x13e0] sm:$0xff]  ;;  %v922_v36 = vld [vmem:[#allocation5 + $0x1528] sm:$0xff] }
 0x1fd   : > { %4546 = vmatpush1.bf16.msra.mxu0 %v4545_v37  ;;  %4676 = vmatprep.subr.bf16.mxu1 %v4675_v49  ;;  %v4691_v37 = vpack.c.bf16 %v742_v41, %v732_v40  ;;  %v1369_v49 = vld [vmem:[#allocation5 + $0x2320] sm:$0xff]  ;;  %v912_v35 = vld [vmem:[#allocation5 + $0x14d8] sm:$0xff] }
 0x1fe   : > { %4548 = vmatprep.subr.bf16.mxu0 %v4547_v52  ;;  %v1379_v52 = vld [vmem:[#allocation5 + $0x2370] sm:$0xff]  ;;  %v1449_v41 = vld [vmem:[#allocation5 + $0x25a0] sm:$0xff] }
 0x1ff   : > { %v4565_v60 = vpack.c.bf16 %v1379_v52, %v1369_v49  ;;  %v1480_v49 = vld [vmem:[#allocation5 + $0x2698] sm:$0xff]  ;;  %v1469_v52 = vld [vmem:[#allocation5 + $0x2640] sm:$0xff] }
 0x200   : > { %4678 = vmatpush1.bf16.msra.mxu1 %v4677_v61  ;;  %v4695_v61 = vpack.c.bf16 %v762_v54, %v752_v53  ;;  %v831_v53 = vld [vmem:[#allocation5 + $0x1250] sm:$0xff]  ;;  %v841_v54 = vld [vmem:[#allocation5 + $0x12a0] sm:$0xff] }
 0x201   : > { %4550 = vmatpush1.bf16.msra.mxu0 %v4549_v62  ;;  %4680 = vmatprep.subr.bf16.mxu1 %v4679_v63  ;;  %v1389_v62 = vld [vmem:[#allocation5 + $0x23c0] sm:$0xff]  ;;  %v751_v63 = vld [vmem:[#allocation5 + $0xfd0] sm:$0xff] }
 0x202   : > { %4552 = vmatprep.subr.bf16.mxu0 %v4551_v1  ;;  %v772_v1 = vld [vmem:[#allocation5 + $0x1078] sm:$0xff]  ;;  %v4697_v4 = vpack.c.bf16 %v761_v0, %v751_v63  ;;  %v1489_v0 = vld [vmem:[#allocation5 + $0x26e0] sm:$0xff] }
 0x203   : > { %v1840_v11 = vpop.f32.mrb[0].mxu0  ;;  %v4699_v17 = vpack.c.bf16 %v782_v2, %v772_v1  ;;  %v1499_v2 = vld [vmem:[#allocation5 + $0x2730] sm:$0xff] }
 0x204   : > { %v5935_v27 = vadd.f32 %v1840_v11, %v5898_v23  ;;  %v1842_v28 = vpop.f32.mrb[1].mxu0  ;;  %4682 = vmatpush1.bf16.msra.mxu1 %v4681_v6  ;;  %v771_v6 = vld [vmem:[#allocation5 + $0x1070] sm:$0xff]  ;;  %v4703_v11 = vpack.c.bf16 %v802_v12, %v792_v10  ;;  %v4589_v5 = vpack.c.bf16 %v1499_v2, %v1489_v0  ;;  %v314_v0 = vld [vmem:[#allocation5 + $0x228] sm:$0xff] }
 0x205   : > { %v5938_v31 = vadd.f32 %v1842_v28, %v5900_v25  ;;  %4554 = vmatpush1.bf16.msra.mxu0 %v4553_v7  ;;  %4684 = vmatprep.subr.bf16.mxu1 %v4683_v8  ;;  %v781_v7 = vld [vmem:[#allocation5 + $0x10c0] sm:$0xff]  ;;  %v1519_v12 = vld [vmem:[#allocation5 + $0x27d0] sm:$0xff] }
 0x206   : > { %4556 = vmatprep.subr.bf16.mxu0 %v4555_v14  ;;  %v1430_v14 = vld [vmem:[#allocation5 + $0x2508] sm:$0xff]  ;;  %v4701_v18 = vpack.c.bf16 %v781_v7, %v771_v6  ;;  %v801_v28 = vld [vmem:[#allocation5 + $0x1160] sm:$0xff] }
 0x207   : > { %v1846_v23 = vpop.f32.mrb[2].mxu0  ;;  %v1509_v7 = vld [vmem:[#allocation5 + $0x2780] sm:$0xff] }
 0x208   : > { %v5941_v44 = vadd.f32 %v1846_v23, %v5902_v13  ;;  %v1848_v25 = vpop.f32.mrb[3].mxu0  ;;  %4686 = vmatpush1.bf16.msra.mxu1 %v4685_v29  ;;  %v4575_v29 = vpack.c.bf16 %v1440_v15, %v1430_v14  ;;  %v811_v23 = vld [vmem:[#allocation5 + $0x11b0] sm:$0xff]  ;;  %v892_v14 = vld [vmem:[#allocation5 + $0x1438] sm:$0xff]  ;;  %v902_v15 = vld [vmem:[#allocation5 + $0x1488] sm:$0xff] }
 0x209   : > { %v5944_v47 = vadd.f32 %v1848_v25, %v5904_v22  ;;  %4558 = vmatpush1.bf16.msra.mxu0 %v4557_v32  ;;  %4688 = vmatprep.subr.bf16.mxu1 %v4687_v34  ;;  %v1439_v32 = vld [vmem:[#allocation5 + $0x2550] sm:$0xff]  ;;  %v812_v34 = vld [vmem:[#allocation5 + $0x11b8] sm:$0xff]  ;;  %v4709_v50 = vpack.c.bf16 %v821_v42, %v811_v23  ;;  %v921_v42 = vld [vmem:[#allocation5 + $0x1520] sm:$0xff] }
 0x20a   : > { %4560 = vmatprep.subr.bf16.mxu0 %v4559_v38  ;;  %v4705_v38 = vpack.c.bf16 %v801_v28, %v791_v26  ;;  %v4577_v39 = vpack.c.bf16 %v1439_v32, %v1429_v24  ;;  %v4707_v40 = vpack.c.bf16 %v822_v21, %v812_v34  ;;  %v1459_v25 = vld [vmem:[#allocation5 + $0x25f0] sm:$0xff]  ;;  %v4593_v24 = vpack.c.bf16 %v1519_v12, %v1509_v7  ;;  %v253_v34 = vld [vmem:[#allocation5 + $0x40] sm:$0xff]  ;;  %v344_v12 = vld [vmem:[#allocation5 + $0x318] sm:$0xff] }
 0x20b   : > { %v1852_v13 = vpop.f32.mrb[4].mxu0  ;;  %v4581_v19 = vpack.c.bf16 %v1459_v25, %v1449_v41  ;;  %v4723_v26 = vpack.c.bf16 %v902_v15, %v892_v14  ;;  %v891_v28 = vld [vmem:[#allocation5 + $0x1430] sm:$0xff] }
 0x20c   : > { %v5947_v57 = vadd.f32 %v1852_v13, %v5906_v33  ;;  %v1854_v22 = vpop.f32.mrb[5].mxu0  ;;  %4690 = vmatpush1.bf16.msra.mxu1 %v4689_v46  ;;  %v1410_v33 = vld [vmem:[#allocation5 + $0x2468] sm:$0xff]  ;;  %v832_v46 = vld [vmem:[#allocation5 + $0x1258] sm:$0xff]  ;;  %v263_v21 = vld [vmem:[#allocation5 + $0x90] sm:$0xff] }
 0x20d   : > { %v5950_v59 = vadd.f32 %v1854_v22, %v5908_v30  ;;  %4562 = vmatpush1.bf16.msra.mxu0 %v4561_v48  ;;  %4692 = vmatprep.subr.bf16.mxu1 %v4691_v37  ;;  %v4569_v30 = vpack.c.bf16 %v1399_v16, %v1389_v62  ;;  %v4571_v8 = vpack.c.bf16 %v1420_v3, %v1410_v33  ;;  %v842_v48 = vld [vmem:[#allocation5 + $0x12a8] sm:$0xff]  ;;  %v861_v16 = vld [vmem:[#allocation5 + $0x1340] sm:$0xff]  ;;  %v872_v33 = vld [vmem:[#allocation5 + $0x1398] sm:$0xff] }
 0x20e   : > { %4564 = vmatprep.subr.bf16.mxu0 %v4563_v51  ;;  %v1470_v37 = vld [vmem:[#allocation5 + $0x2648] sm:$0xff]  ;;  %v4711_v51 = vpack.c.bf16 %v842_v48, %v832_v46  ;;  %v4585_v62 = vpack.c.bf16 %v1479_v55, %v1469_v52  ;;  %v4853_v41 = vpack.c.bf16 %v263_v21, %v253_v34  ;;  %v911_v23 = vld [vmem:[#allocation5 + $0x14d0] sm:$0xff]  ;;  %v273_v46 = vld [vmem:[#allocation5 + $0xe0] sm:$0xff] }
 0x20f   : > { %v4583_v13 = vpack.c.bf16 %v1480_v49, %v1470_v37  ;;  %v862_v22 = vld [vmem:[#allocation5 + $0x1348] sm:$0xff]  ;;  %v283_v48 = vld [vmem:[#allocation5 + $0x130] sm:$0xff]  ;;  %v932_v37 = vld [vmem:[#allocation5 + $0x1578] sm:$0xff] }
 0x210   : > { %4694 = vmatpush1.bf16.msra.mxu1 %v4693_v58  ;;  %v1490_v58 = vld [vmem:[#allocation5 + $0x26e8] sm:$0xff]  ;;  %v4715_v63 = vpack.c.bf16 %v862_v22, %v852_v56  ;;  %v5414_v49 = vld [vmem:[%s5814_s5 + $0x10] sm:$0xff]  ;;  %v941_v56 = vld [vmem:[#allocation5 + $0x15c0] sm:$0xff] }
 0x211   : > { %4566 = vmatpush1.bf16.msra.mxu0 %v4565_v60  ;;  %4696 = vmatprep.subr.bf16.mxu1 %v4695_v61  ;;  %v1500_v60 = vld [vmem:[#allocation5 + $0x2738] sm:$0xff]  ;;  %v4713_v61 = vpack.c.bf16 %v841_v54, %v831_v53  ;;  %v882_v3 = vld [vmem:[#allocation5 + $0x13e8] sm:$0xff]  ;;  %v5415_v52 = vld [vmem:[%s5814_s5 + $0x30] sm:$0xff]  ;;  %v4729_v53 = vpack.c.bf16 %v921_v42, %v911_v23 }
 0x212   : > { %4568 = vmatprep.subr.bf16.mxu0 %v4567_v45  ;;  %v851_v45 = vld [vmem:[#allocation5 + $0x12f0] sm:$0xff]  ;;  %v4587_v1 = vpack.c.bf16 %v1500_v60, %v1490_v58  ;;  %v4719_v6 = vpack.c.bf16 %v882_v3, %v872_v33  ;;  %v5416_v54 = vld [vmem:[%s5814_s5 + $0x78] sm:$0xff]  ;;  %v293_v22 = vld [vmem:[#allocation5 + $0x180] sm:$0xff] }
 0x213   : > { %v931_v55 = vld [vmem:[#allocation5 + $0x1570] sm:$0xff]  ;;  %v5419_v33 = vld [vmem:[%s5814_s5 + $0xb8] sm:$0xff]  ;;  %v1002_v21 = vld [vmem:[#allocation5 + $0x17a8] sm:$0xff] }
 0x214   : > { %4698 = vmatpush1.bf16.msra.mxu1 %v4697_v4  ;;  %v1510_v4 = vld [vmem:[#allocation5 + $0x2788] sm:$0xff]  ;;  %v4733_v2 = vpack.c.bf16 %v941_v56, %v931_v55  ;;  %v323_v7 = vld [vmem:[#allocation5 + $0x270] sm:$0xff]  ;;  %v992_v34 = vld [vmem:[#allocation5 + $0x1758] sm:$0xff] }
 0x215   : > { %4570 = vmatpush1.bf16.msra.mxu0 %v4569_v30  ;;  %4700 = vmatprep.subr.bf16.mxu1 %v4699_v17  ;;  %v1520_v30 = vld [vmem:[#allocation5 + $0x27d8] sm:$0xff]  ;;  %v4717_v17 = vpack.c.bf16 %v861_v16, %v851_v45  ;;  %v5959_v14 = vld [vmem:[%s5814_s5 + $0x50] sm:$0xff]  ;;  %v5976_v23 = vld [vmem:[%s5814_s5 + $0x28] sm:$0xff] }
 0x216   : > { %4572 = vmatprep.subr.bf16.mxu0 %v4571_v8  ;;  %v871_v8 = vld [vmem:[#allocation5 + $0x1390] sm:$0xff]  ;;  %v4591_v10 = vpack.c.bf16 %v1520_v30, %v1510_v4  ;;  %v324_v45 = vld [vmem:[#allocation5 + $0x278] sm:$0xff]  ;;  %v1021_v56 = vld [vmem:[#allocation5 + $0x1840] sm:$0xff] }
 0x217   : > { %v5417_v16 = vld [vmem:[%s5814_s5 + $0x58] sm:$0xff]  ;;  %v951_v30 = vld [vmem:[#allocation5 + $0x1610] sm:$0xff] }
 0x218   : > { %4702 = vmatpush1.bf16.msra.mxu1 %v4701_v18  ;;  %v254_v18 = vld [vmem:[#allocation5 + $0x48] sm:$0xff]  ;;  %v5963_v15 = vld [vmem:[%s5814_s5 + $0xb0] sm:$0xff] }
 0x219   : > { %4574 = vmatpush1.bf16.msra.mxu0 %v4573_v20  ;;  %4704 = vmatprep.subr.bf16.mxu1 %v4703_v11  ;;  %v264_v20 = vld [vmem:[#allocation5 + $0x98] sm:$0xff]  ;;  %v4721_v11 = vpack.c.bf16 %v881_v9, %v871_v8  ;;  %v982_v9 = vld [vmem:[#allocation5 + $0x1708] sm:$0xff]  ;;  %v1011_v55 = vld [vmem:[#allocation5 + $0x17f0] sm:$0xff] }
 0x21a   : > { %4576 = vmatprep.subr.bf16.mxu0 %v4575_v29  ;;  %v901_v29 = vld [vmem:[#allocation5 + $0x1480] sm:$0xff]  ;;  %v4851_v32 = vpack.c.bf16 %v264_v20, %v254_v18  ;;  %v972_v8 = vld [vmem:[#allocation5 + $0x16b8] sm:$0xff] }
 0x21c   : > { %4706 = vmatpush1.bf16.msra.mxu1 %v4705_v38  ;;  %v274_v38 = vld [vmem:[#allocation5 + $0xe8] sm:$0xff] }
 0x21d   : > { %4578 = vmatpush1.bf16.msra.mxu0 %v4577_v39  ;;  %4708 = vmatprep.subr.bf16.mxu1 %v4707_v40  ;;  %v284_v39 = vld [vmem:[#allocation5 + $0x138] sm:$0xff]  ;;  %v4725_v40 = vpack.c.bf16 %v901_v29, %v891_v28  ;;  %v333_v28 = vld [vmem:[#allocation5 + $0x2c0] sm:$0xff] }
 0x21e   : > { %4580 = vmatprep.subr.bf16.mxu0 %v4579_v43  ;;  %v4727_v43 = vpack.c.bf16 %v922_v36, %v912_v35  ;;  %v4855_v25 = vpack.c.bf16 %v284_v39, %v274_v38  ;;  %v5967_v35 = vld [vmem:[%s5814_s5 + $0x98] sm:$0xff]  ;;  %v354_v36 = vld [vmem:[#allocation5 + $0x368] sm:$0xff]  ;;  %v5971_v39 = vld [vmem:[%s5814_s5 + $0x90] sm:$0xff] }
 0x21f   : > { %v364_v38 = vld [vmem:[#allocation5 + $0x3b8] sm:$0xff] }
 0x220   : > { %4710 = vmatpush1.bf16.msra.mxu1 %v4709_v50  ;;  %v942_v50 = vld [vmem:[#allocation5 + $0x15c8] sm:$0xff] }
 0x221   : > { %4582 = vmatpush1.bf16.msra.mxu0 %v4581_v19  ;;  %4712 = vmatprep.subr.bf16.mxu1 %v4711_v51  ;;  %v294_v19 = vld [vmem:[#allocation5 + $0x188] sm:$0xff]  ;;  %v304_v51 = vld [vmem:[#allocation5 + $0x1d8] sm:$0xff]  ;;  %v4731_v58 = vpack.c.bf16 %v942_v50, %v932_v37  ;;  %v4871_v37 = vpack.c.bf16 %v364_v38, %v354_v36  ;;  %v1071_v38 = vld [vmem:[#allocation5 + $0x19d0] sm:$0xff] }
 0x222   : > { %4584 = vmatprep.subr.bf16.mxu0 %v4583_v13  ;;  %v4857_v13 = vpack.c.bf16 %v283_v48, %v273_v46  ;;  %v4859_v60 = vpack.c.bf16 %v304_v51, %v294_v19  ;;  %v1001_v46 = vld [vmem:[#allocation5 + $0x17a0] sm:$0xff]  ;;  %v1012_v50 = vld [vmem:[#allocation5 + $0x17f8] sm:$0xff]  ;;  %v1022_v19 = vld [vmem:[#allocation5 + $0x1848] sm:$0xff] }
 0x223   : > { %v353_v48 = vld [vmem:[#allocation5 + $0x360] sm:$0xff]  ;;  %v374_v51 = vld [vmem:[#allocation5 + $0x408] sm:$0xff] }
 0x224   : > { %4714 = vmatpush1.bf16.msra.mxu1 %v4713_v61  ;;  %v303_v61 = vld [vmem:[#allocation5 + $0x1d0] sm:$0xff] }
 0x225   : > { %4586 = vmatpush1.bf16.msra.mxu0 %v4585_v62  ;;  %4716 = vmatprep.subr.bf16.mxu1 %v4715_v63  ;;  %v952_v62 = vld [vmem:[#allocation5 + $0x1618] sm:$0xff]  ;;  %v962_v63 = vld [vmem:[#allocation5 + $0x1668] sm:$0xff]  ;;  %v4861_v3 = vpack.c.bf16 %v303_v61, %v293_v22  ;;  %v373_v22 = vld [vmem:[#allocation5 + $0x400] sm:$0xff] }
 0x226   : > { %4588 = vmatprep.subr.bf16.mxu0 %v4587_v1  ;;  %v5418_v1 = vld [vmem:[%s5814_s5 + $0x70] sm:$0xff]  ;;  %v4735_v4 = vpack.c.bf16 %v962_v63, %v952_v62  ;;  %v1032_v61 = vld [vmem:[#allocation5 + $0x1898] sm:$0xff]  ;;  %v1042_v62 = vld [vmem:[#allocation5 + $0x18e8] sm:$0xff] }
 0x227   : > { %v394_v63 = vld [vmem:[#allocation5 + $0x4a8] sm:$0xff] }
 0x228   : > { %4718 = vmatpush1.bf16.msra.mxu1 %v4717_v17  ;;  %v961_v17 = vld [vmem:[#allocation5 + $0x1660] sm:$0xff] }
 0x229   : > { %4590 = vmatpush1.bf16.msra.mxu0 %v4589_v5  ;;  %4720 = vmatprep.subr.bf16.mxu1 %v4719_v6  ;;  %v313_v5 = vld [vmem:[#allocation5 + $0x220] sm:$0xff]  ;;  %v4863_v6 = vpack.c.bf16 %v324_v45, %v314_v0  ;;  %v4737_v18 = vpack.c.bf16 %v961_v17, %v951_v30  ;;  %v404_v0 = vld [vmem:[#allocation5 + $0x4f8] sm:$0xff]  ;;  %v4749_v45 = vpack.c.bf16 %v1021_v56, %v1011_v55  ;;  %v403_v30 = vld [vmem:[#allocation5 + $0x4f0] sm:$0xff] }
 0x22a   : > { %4592 = vmatprep.subr.bf16.mxu0 %v4591_v10  ;;  %v334_v10 = vld [vmem:[#allocation5 + $0x2c8] sm:$0xff]  ;;  %v4865_v20 = vpack.c.bf16 %v323_v7, %v313_v5  ;;  %v1052_v17 = vld [vmem:[#allocation5 + $0x1938] sm:$0xff] }
 0x22b   : > { %v4867_v29 = vpack.c.bf16 %v344_v12, %v334_v10  ;;  %v1062_v5 = vld [vmem:[#allocation5 + $0x1988] sm:$0xff]  ;;  %v424_v7 = vld [vmem:[#allocation5 + $0x598] sm:$0xff]  ;;  %v1051_v12 = vld [vmem:[#allocation5 + $0x1930] sm:$0xff] }
 0x22c   : > { %4722 = vmatpush1.bf16.msra.mxu1 %v4721_v11  ;;  %v4739_v11 = vpack.c.bf16 %v982_v9, %v972_v8  ;;  %v4755_v10 = vpack.c.bf16 %v1062_v5, %v1052_v17  ;;  %v1112_v55 = vld [vmem:[#allocation5 + $0x1b18] sm:$0xff]  ;;  %v1122_v56 = vld [vmem:[#allocation5 + $0x1b68] sm:$0xff] }
 0x22d   : > { %4594 = vmatpush1.bf16.msra.mxu0 %v4593_v24  ;;  %4724 = vmatprep.subr.bf16.mxu1 %v4723_v26  ;;  %v971_v24 = vld [vmem:[#allocation5 + $0x16b0] sm:$0xff]  ;;  %v981_v26 = vld [vmem:[#allocation5 + $0x1700] sm:$0xff] }
 0x22e   : > { %4852 = vmatprep.subr.bf16.mxu0 %v4851_v32  ;;  %v343_v32 = vld [vmem:[#allocation5 + $0x310] sm:$0xff] }
 0x22f   : > { %2669 = vmatmul.mubr.f32.vlgmr.msra.gmra.mrb[12].mxu1 %v5414_v49  ;;  %v4869_v42 = vpack.c.bf16 %v343_v32, %v333_v28  ;;  %v363_v49 = vld [vmem:[#allocation5 + $0x3b0] sm:$0xff]  ;;  %v1082_v28 = vld [vmem:[#allocation5 + $0x1a28] sm:$0xff]  ;;  %v444_v32 = vld [vmem:[#allocation5 + $0x638] sm:$0xff] }
 0x230   : > { %2503 = vmatmul.mubr.f32.vlgmr.msra.gmra.mrb[6].mxu0 %v5415_v52  ;;  %4726 = vmatpush1.bf16.msra.mxu1 %v4725_v40  ;;  %v5424_v40 = vld [vmem:[%s5814_s5 + $0x8] sm:$0xff]  ;;  %v384_v52 = vld [vmem:[#allocation5 + $0x458] sm:$0xff] }
 0x231   : > { %4854 = vmatpush1.bf16.msra.mxu0 %v4853_v41  ;;  %2508 = vmatprep.mubr.f32.mxu0 %v5416_v54  ;;  %v4741_v41 = vpack.c.bf16 %v981_v26, %v971_v24  ;;  %v4873_v54 = vpack.c.bf16 %v363_v49, %v353_v48  ;;  %v423_v24 = vld [vmem:[#allocation5 + $0x590] sm:$0xff]  ;;  %v1072_v26 = vld [vmem:[#allocation5 + $0x19d8] sm:$0xff]  ;;  %v454_v48 = vld [vmem:[#allocation5 + $0x688] sm:$0xff] }
 0x232   : > { %4728 = vmatprep.subr.bf16.mxu1 %v4727_v43  ;;  %4856 = vmatprep.subr.bf16.mxu0 %v4855_v25  ;;  %v4743_v43 = vpack.c.bf16 %v1002_v21, %v992_v34  ;;  %v991_v25 = vld [vmem:[#allocation5 + $0x1750] sm:$0xff]  ;;  %v4759_v36 = vpack.c.bf16 %v1082_v28, %v1072_v26 }
 0x233   : > { %2674 = vmatprep.mubr.f32.mxu1 %v5417_v16 }
 0x234   : > { %2509 = vmatmul.mubr.f32.gmra.mrb[8].mxu0 %v5418_v1  ;;  %4730 = vmatpush1.bf16.msra.mxu1 %v4729_v53  ;;  %v4745_v53 = vpack.c.bf16 %v1001_v46, %v991_v25  ;;  %v4751_v1 = vpack.c.bf16 %v1042_v62, %v1032_v61  ;;  %v1092_v25 = vld [vmem:[#allocation5 + $0x1a78] sm:$0xff]  ;;  %v1102_v46 = vld [vmem:[#allocation5 + $0x1ac8] sm:$0xff]  ;;  %v4767_v62 = vpack.c.bf16 %v1122_v56, %v1112_v55 }
 0x235   : > { %4858 = vmatpush1.bf16.msra.mxu0 %v4857_v13  ;;  %2514 = vmatprep.mubr.f32.mxu0 %v5419_v33  ;;  %v4747_v13 = vpack.c.bf16 %v1022_v19, %v1012_v50  ;;  %v1041_v33 = vld [vmem:[#allocation5 + $0x18e0] sm:$0xff]  ;;  %v4763_v19 = vpack.c.bf16 %v1102_v46, %v1092_v25 }
 0x236   : > { %4732 = vmatprep.subr.bf16.mxu1 %v4731_v58  ;;  %4860 = vmatprep.subr.bf16.mxu0 %v4859_v60  ;;  %v4875_v58 = vpack.c.bf16 %v384_v52, %v374_v51  ;;  %v383_v60 = vld [vmem:[#allocation5 + $0x450] sm:$0xff]  ;;  %v1101_v52 = vld [vmem:[#allocation5 + $0x1ac0] sm:$0xff] }
 0x237   : > { %2675 = vmatmul.mubr.f32.gmra.mrb[14].mxu1 %v5959_v14  ;;  %v4877_v16 = vpack.c.bf16 %v383_v60, %v373_v22  ;;  %v1091_v51 = vld [vmem:[#allocation5 + $0x1a70] sm:$0xff]  ;;  %v474_v22 = vld [vmem:[#allocation5 + $0x728] sm:$0xff] }
 0x238   : > { %2515 = vmatmul.mubr.f32.gmra.mrb[10].mxu0 %v5963_v15  ;;  %4734 = vmatpush1.bf16.msra.mxu1 %v4733_v2  ;;  %v1031_v2 = vld [vmem:[#allocation5 + $0x1890] sm:$0xff]  ;;  %v4765_v60 = vpack.c.bf16 %v1101_v52, %v1091_v51  ;;  %v1192_v51 = vld [vmem:[#allocation5 + $0x1d98] sm:$0xff]  ;;  %v1202_v52 = vld [vmem:[#allocation5 + $0x1de8] sm:$0xff] }
 0x239   : > { %4862 = vmatpush1.bf16.msra.mxu0 %v4861_v3  ;;  %4736 = vmatprep.subr.bf16.mxu1 %v4735_v4  ;;  %v393_v3 = vld [vmem:[#allocation5 + $0x4a0] sm:$0xff]  ;;  %v4879_v4 = vpack.c.bf16 %v404_v0, %v394_v63  ;;  %v4753_v8 = vpack.c.bf16 %v1041_v33, %v1031_v2  ;;  %v1111_v63 = vld [vmem:[#allocation5 + $0x1b10] sm:$0xff]  ;;  %v1132_v2 = vld [vmem:[#allocation5 + $0x1bb8] sm:$0xff]  ;;  %v4783_v56 = vpack.c.bf16 %v1202_v52, %v1192_v51 }
 0x23a   : > { %4864 = vmatprep.subr.bf16.mxu0 %v4863_v6  ;;  %2680 = vmatprep.mubr.f32.mxu1 %v5967_v35  ;;  %v414_v6 = vld [vmem:[#allocation5 + $0x548] sm:$0xff]  ;;  %v4881_v9 = vpack.c.bf16 %v403_v30, %v393_v3  ;;  %v1121_v0 = vld [vmem:[#allocation5 + $0x1b60] sm:$0xff]  ;;  %v644_v52 = vld [vmem:[#allocation5 + $0xc78] sm:$0xff] }
 0x23b   : > { %2681 = vmatmul.mubr.f32.gmra.mrb[16].mxu1 %v5971_v39  ;;  %2917 = vmatprep.mubr.f32.mxu0 %v5424_v40  ;;  %v1081_v40 = vld [vmem:[#allocation5 + $0x1a20] sm:$0xff]  ;;  %v1142_v33 = vld [vmem:[#allocation5 + $0x1c08] sm:$0xff]  ;;  %v4769_v30 = vpack.c.bf16 %v1121_v0, %v1111_v63  ;;  %v1212_v63 = vld [vmem:[#allocation5 + $0x1e38] sm:$0xff] }
 0x23c   : > { %4738 = vmatpush1.bf16.msra.mxu1 %v4737_v18  ;;  %2751 = vmatprep.mubr.f32.mxu1 %v5976_v23  ;;  %v1061_v18 = vld [vmem:[#allocation5 + $0x1980] sm:$0xff]  ;;  %v4761_v49 = vpack.c.bf16 %v1081_v40, %v1071_v38  ;;  %v494_v3 = vld [vmem:[#allocation5 + $0x7c8] sm:$0xff]  ;;  %v4771_v5 = vpack.c.bf16 %v1142_v33, %v1132_v2  ;;  %v1172_v38 = vld [vmem:[#allocation5 + $0x1cf8] sm:$0xff] }
 0x23d   : > { %4866 = vmatpush1.bf16.msra.mxu0 %v4865_v20  ;;  %4740 = vmatprep.subr.bf16.mxu1 %v4739_v11  ;;  %v413_v20 = vld [vmem:[#allocation5 + $0x540] sm:$0xff]  ;;  %v4883_v11 = vpack.c.bf16 %v424_v7, %v414_v6  ;;  %v4757_v34 = vpack.c.bf16 %v1061_v18, %v1051_v12  ;;  %v1131_v6 = vld [vmem:[#allocation5 + $0x1bb0] sm:$0xff]  ;;  %v1152_v12 = vld [vmem:[#allocation5 + $0x1c58] sm:$0xff] }
 0x23e   : > { %4868 = vmatprep.subr.bf16.mxu0 %v4867_v29  ;;  %v434_v29 = vld [vmem:[#allocation5 + $0x5e8] sm:$0xff]  ;;  %v4885_v21 = vpack.c.bf16 %v423_v24, %v413_v20  ;;  %v1141_v7 = vld [vmem:[#allocation5 + $0x1c00] sm:$0xff] }
 0x23f   : > { %v1162_v18 = vld [vmem:[#allocation5 + $0x1ca8] sm:$0xff]  ;;  %v4773_v24 = vpack.c.bf16 %v1141_v7, %v1131_v6  ;;  %v1232_v6 = vld [vmem:[#allocation5 + $0x1ed8] sm:$0xff] }
 0x240   : > { %4742 = vmatpush1.bf16.msra.mxu1 %v4741_v41  ;;  %v433_v41 = vld [vmem:[#allocation5 + $0x5e0] sm:$0xff]  ;;  %v514_v20 = vld [vmem:[#allocation5 + $0x868] sm:$0xff]  ;;  %v4775_v28 = vpack.c.bf16 %v1162_v18, %v1152_v12 }
 0x241   : > { %4870 = vmatpush1.bf16.msra.mxu0 %v4869_v42  ;;  %4744 = vmatprep.subr.bf16.mxu1 %v4743_v43  ;;  %v4887_v42 = vpack.c.bf16 %v444_v32, %v434_v29  ;;  %v443_v43 = vld [vmem:[#allocation5 + $0x630] sm:$0xff]  ;;  %v1161_v32 = vld [vmem:[#allocation5 + $0x1ca0] sm:$0xff]  ;;  %v1182_v40 = vld [vmem:[#allocation5 + $0x1d48] sm:$0xff] }
 0x242   : > { %4872 = vmatprep.subr.bf16.mxu0 %v4871_v37  ;;  %v464_v37 = vld [vmem:[#allocation5 + $0x6d8] sm:$0xff]  ;;  %v4889_v50 = vpack.c.bf16 %v443_v43, %v433_v41  ;;  %v1151_v29 = vld [vmem:[#allocation5 + $0x1c50] sm:$0xff]  ;;  %v534_v41 = vld [vmem:[#allocation5 + $0x908] sm:$0xff]  ;;  %v4779_v46 = vpack.c.bf16 %v1182_v40, %v1172_v38 }
 0x243   : > { %v4777_v43 = vpack.c.bf16 %v1161_v32, %v1151_v29  ;;  %v1222_v0 = vld [vmem:[#allocation5 + $0x1e88] sm:$0xff]  ;;  %v1252_v29 = vld [vmem:[#allocation5 + $0x1f78] sm:$0xff]  ;;  %v5427_v38 = vld [vmem:[%s5814_s5] sm:$0xff] }
 0x244   : > { %4746 = vmatpush1.bf16.msra.mxu1 %v4745_v53  ;;  %v453_v53 = vld [vmem:[#allocation5 + $0x680] sm:$0xff]  ;;  %v4787_v33 = vpack.c.bf16 %v1222_v0, %v1212_v63  ;;  %v1242_v7 = vld [vmem:[#allocation5 + $0x1f28] sm:$0xff]  ;;  %v643_v63 = vld [vmem:[#allocation5 + $0xc70] sm:$0xff] }
 0x245   : > { %4874 = vmatpush1.bf16.msra.mxu0 %v4873_v54  ;;  %4748 = vmatprep.subr.bf16.mxu1 %v4747_v13  ;;  %v4891_v54 = vpack.c.bf16 %v464_v37, %v454_v48  ;;  %v463_v13 = vld [vmem:[#allocation5 + $0x6d0] sm:$0xff]  ;;  %v1181_v37 = vld [vmem:[#allocation5 + $0x1d40] sm:$0xff]  ;;  %v4791_v18 = vpack.c.bf16 %v1242_v7, %v1232_v6  ;;  %v1262_v32 = vld [vmem:[#allocation5 + $0x1fc8] sm:$0xff] }
 0x246   : > { %4876 = vmatprep.subr.bf16.mxu0 %v4875_v58  ;;  %v484_v58 = vld [vmem:[#allocation5 + $0x778] sm:$0xff]  ;;  %v4893_v61 = vpack.c.bf16 %v463_v13, %v453_v53  ;;  %v1171_v48 = vld [vmem:[#allocation5 + $0x1cf0] sm:$0xff]  ;;  %v554_v53 = vld [vmem:[#allocation5 + $0x9a8] sm:$0xff] }
 0x247   : > { %v4781_v13 = vpack.c.bf16 %v1181_v37, %v1171_v48  ;;  %v623_v37 = vld [vmem:[#allocation5 + $0xbd0] sm:$0xff]  ;;  %v634_v51 = vld [vmem:[#allocation5 + $0xc28] sm:$0xff]  ;;  %v1292_v0 = vld [vmem:[#allocation5 + $0x20b8] sm:$0xff] }
 0x248   : > { %4750 = vmatpush1.bf16.msra.mxu1 %v4749_v45  ;;  %v473_v45 = vld [vmem:[#allocation5 + $0x720] sm:$0xff]  ;;  %v1291_v6 = vld [vmem:[#allocation5 + $0x20b0] sm:$0xff] }
 0x249   : > { %4878 = vmatpush1.bf16.msra.mxu0 %v4877_v16  ;;  %4752 = vmatprep.subr.bf16.mxu1 %v4751_v1  ;;  %v4895_v16 = vpack.c.bf16 %v484_v58, %v474_v22  ;;  %v483_v1 = vld [vmem:[#allocation5 + $0x770] sm:$0xff]  ;;  %v1201_v58 = vld [vmem:[#allocation5 + $0x1de0] sm:$0xff] }
 0x24a   : > { %4880 = vmatprep.subr.bf16.mxu0 %v4879_v4  ;;  %v504_v4 = vld [vmem:[#allocation5 + $0x818] sm:$0xff]  ;;  %v4897_v17 = vpack.c.bf16 %v483_v1, %v473_v45  ;;  %v1191_v22 = vld [vmem:[#allocation5 + $0x1d90] sm:$0xff]  ;;  %v574_v45 = vld [vmem:[#allocation5 + $0xa48] sm:$0xff] }
 0x24b   : > { %v4785_v1 = vpack.c.bf16 %v1201_v58, %v1191_v22  ;;  %v1271_v58 = vld [vmem:[#allocation5 + $0x2010] sm:$0xff]  ;;  %v1301_v7 = vld [vmem:[#allocation5 + $0x2100] sm:$0xff] }
 0x24c   : > { %4754 = vmatpush1.bf16.msra.mxu1 %v4753_v8  ;;  %v493_v8 = vld [vmem:[#allocation5 + $0x7c0] sm:$0xff] }
 0x24d   : > { %4882 = vmatpush1.bf16.msra.mxu0 %v4881_v9  ;;  %4756 = vmatprep.subr.bf16.mxu1 %v4755_v10  ;;  %v4899_v9 = vpack.c.bf16 %v504_v4, %v494_v3  ;;  %v503_v10 = vld [vmem:[#allocation5 + $0x810] sm:$0xff]  ;;  %v1221_v4 = vld [vmem:[#allocation5 + $0x1e80] sm:$0xff] }
 0x24e   : > { %4884 = vmatprep.subr.bf16.mxu0 %v4883_v11  ;;  %v524_v11 = vld [vmem:[#allocation5 + $0x8b8] sm:$0xff]  ;;  %v4901_v26 = vpack.c.bf16 %v503_v10, %v493_v8  ;;  %v1211_v3 = vld [vmem:[#allocation5 + $0x1e30] sm:$0xff]  ;;  %v594_v8 = vld [vmem:[#allocation5 + $0xae8] sm:$0xff] }
 0x24f   : > { %v4789_v10 = vpack.c.bf16 %v1221_v4, %v1211_v3  ;;  %v5434_v3 = vld [vmem:[%s5814_s5 + $0x88] sm:$0xff] }
 0x250   : > { %4758 = vmatpush1.bf16.msra.mxu1 %v4757_v34  ;;  %v513_v34 = vld [vmem:[#allocation5 + $0x860] sm:$0xff] }
 0x251   : > { %4886 = vmatpush1.bf16.msra.mxu0 %v4885_v21  ;;  %4760 = vmatprep.subr.bf16.mxu1 %v4759_v36  ;;  %v4903_v21 = vpack.c.bf16 %v524_v11, %v514_v20  ;;  %v523_v36 = vld [vmem:[#allocation5 + $0x8b0] sm:$0xff]  ;;  %v1241_v11 = vld [vmem:[#allocation5 + $0x1f20] sm:$0xff] }
 0x252   : > { %4888 = vmatprep.subr.bf16.mxu0 %v4887_v42  ;;  %v544_v42 = vld [vmem:[#allocation5 + $0x958] sm:$0xff]  ;;  %v4905_v25 = vpack.c.bf16 %v523_v36, %v513_v34  ;;  %v1231_v20 = vld [vmem:[#allocation5 + $0x1ed0] sm:$0xff]  ;;  %v5980_v34 = vld [vmem:[%s5814_s5 + $0x20] sm:$0xff] }
 0x253   : > { %v624_v36 = vld [vmem:[#allocation5 + $0xbd8] sm:$0xff]  ;;  %v4793_v40 = vpack.c.bf16 %v1241_v11, %v1231_v20  ;;  %v674_v11 = vld [vmem:[#allocation5 + $0xd68] sm:$0xff] }
 0x254   : > { %4762 = vmatpush1.bf16.msra.mxu1 %v4761_v49  ;;  %v533_v49 = vld [vmem:[#allocation5 + $0x900] sm:$0xff]  ;;  %v6005_v20 = vld [vmem:[%s5814_s5 + $0x38] sm:$0xff] }
 0x255   : > { %4890 = vmatpush1.bf16.msra.mxu0 %v4889_v50  ;;  %4764 = vmatprep.subr.bf16.mxu1 %v4763_v19  ;;  %v4907_v50 = vpack.c.bf16 %v544_v42, %v534_v41  ;;  %v543_v19 = vld [vmem:[#allocation5 + $0x950] sm:$0xff]  ;;  %v4795_v42 = vpack.c.bf16 %v1262_v32, %v1252_v29 }
 0x256   : > { %4892 = vmatprep.subr.bf16.mxu0 %v4891_v54  ;;  %v564_v54 = vld [vmem:[#allocation5 + $0x9f8] sm:$0xff]  ;;  %v4909_v55 = vpack.c.bf16 %v543_v19, %v533_v49  ;;  %v5985_v19 = vld [vmem:[%s5814_s5 + $0x68] sm:$0xff] }
 0x257   : > { %v1272_v49 = vld [vmem:[#allocation5 + $0x2018] sm:$0xff] }
 0x258   : > { %4766 = vmatpush1.bf16.msra.mxu1 %v4765_v60  ;;  %v553_v60 = vld [vmem:[#allocation5 + $0x9a0] sm:$0xff] }
 0x259   : > { %4894 = vmatpush1.bf16.msra.mxu0 %v4893_v61  ;;  %4768 = vmatprep.subr.bf16.mxu1 %v4767_v62  ;;  %v4911_v61 = vpack.c.bf16 %v564_v54, %v554_v53  ;;  %v563_v62 = vld [vmem:[#allocation5 + $0x9f0] sm:$0xff]  ;;  %v5989_v53 = vld [vmem:[%s5814_s5 + $0x60] sm:$0xff]  ;;  %v5430_v54 = vld [vmem:[%s5814_s5 + $0x48] sm:$0xff] }
 0x25a   : > { %4896 = vmatprep.subr.bf16.mxu0 %v4895_v16  ;;  %v584_v16 = vld [vmem:[#allocation5 + $0xa98] sm:$0xff]  ;;  %v4913_v2 = vpack.c.bf16 %v563_v62, %v553_v60  ;;  %v1281_v60 = vld [vmem:[#allocation5 + $0x2060] sm:$0xff]  ;;  %v4927_v62 = vpack.c.bf16 %v644_v52, %v634_v51 }
 0x25b   : > { %v4801_v4 = vpack.c.bf16 %v1281_v60, %v1271_v58  ;;  %v1341_v51 = vld [vmem:[#allocation5 + $0x2240] sm:$0xff]  ;;  %v714_v60 = vld [vmem:[#allocation5 + $0xea8] sm:$0xff] }
 0x25c   : > { %4770 = vmatpush1.bf16.msra.mxu1 %v4769_v30  ;;  %v573_v30 = vld [vmem:[#allocation5 + $0xa40] sm:$0xff] }
 0x25d   : > { %4898 = vmatpush1.bf16.msra.mxu0 %v4897_v17  ;;  %4772 = vmatprep.subr.bf16.mxu1 %v4771_v5  ;;  %v4915_v17 = vpack.c.bf16 %v584_v16, %v574_v45  ;;  %v583_v5 = vld [vmem:[#allocation5 + $0xa90] sm:$0xff]  ;;  %v1302_v45 = vld [vmem:[#allocation5 + $0x2108] sm:$0xff]  ;;  %v693_v52 = vld [vmem:[#allocation5 + $0xe00] sm:$0xff] }
 0x25e   : > { %4900 = vmatprep.subr.bf16.mxu0 %v4899_v9  ;;  %v604_v9 = vld [vmem:[#allocation5 + $0xb38] sm:$0xff]  ;;  %v4917_v12 = vpack.c.bf16 %v583_v5, %v573_v30  ;;  %v5995_v16 = vld [vmem:[%s5814_s5 + $0xa8] sm:$0xff]  ;;  %v5435_v30 = vld [vmem:[%s5814_s5 + $0x80] sm:$0xff]  ;;  %v4803_v5 = vpack.c.bf16 %v1302_v45, %v1292_v0 }
 0x25f   : > { %v1351_v45 = vld [vmem:[#allocation5 + $0x2290] sm:$0xff] }
 0x260   : > { %4774 = vmatpush1.bf16.msra.mxu1 %v4773_v24  ;;  %v593_v24 = vld [vmem:[#allocation5 + $0xae0] sm:$0xff] }
 0x261   : > { %4902 = vmatpush1.bf16.msra.mxu0 %v4901_v26  ;;  %4776 = vmatprep.subr.bf16.mxu1 %v4775_v28  ;;  %v4919_v26 = vpack.c.bf16 %v604_v9, %v594_v8  ;;  %v603_v28 = vld [vmem:[#allocation5 + $0xb30] sm:$0xff]  ;;  %v653_v8 = vld [vmem:[#allocation5 + $0xcc0] sm:$0xff] }
 0x262   : > { %4904 = vmatprep.subr.bf16.mxu0 %v4903_v21  ;;  %v614_v21 = vld [vmem:[#allocation5 + $0xb88] sm:$0xff]  ;;  %v4921_v41 = vpack.c.bf16 %v603_v28, %v593_v24  ;;  %v684_v24 = vld [vmem:[#allocation5 + $0xdb8] sm:$0xff]  ;;  %v4805_v28 = vpack.c.bf16 %v1301_v7, %v1291_v6 }
 0x263   : > { %v4923_v48 = vpack.c.bf16 %v624_v36, %v614_v21  ;;  %v1311_v21 = vld [vmem:[#allocation5 + $0x2150] sm:$0xff]  ;;  %v1321_v36 = vld [vmem:[#allocation5 + $0x21a0] sm:$0xff]  ;;  %v734_v7 = vld [vmem:[#allocation5 + $0xf48] sm:$0xff] }
 0x264   : > { %4778 = vmatpush1.bf16.msra.mxu1 %v4777_v43  ;;  %v1251_v43 = vld [vmem:[#allocation5 + $0x1f70] sm:$0xff] }
 0x265   : > { %4906 = vmatpush1.bf16.msra.mxu0 %v4905_v25  ;;  %4780 = vmatprep.subr.bf16.mxu1 %v4779_v46  ;;  %v1261_v25 = vld [vmem:[#allocation5 + $0x1fc0] sm:$0xff] }
 0x266   : > { %4908 = vmatprep.subr.bf16.mxu0 %v4907_v50  ;;  %v613_v46 = vld [vmem:[#allocation5 + $0xb80] sm:$0xff]  ;;  %v1282_v50 = vld [vmem:[#allocation5 + $0x2068] sm:$0xff] }
 0x267   : > { %v4799_v22 = vpack.c.bf16 %v1282_v50, %v1272_v49  ;;  %v1331_v50 = vld [vmem:[#allocation5 + $0x21f0] sm:$0xff] }
 0x268   : > { %4782 = vmatpush1.bf16.msra.mxu1 %v4781_v13  ;;  %v4797_v13 = vpack.c.bf16 %v1261_v25, %v1251_v43  ;;  %v1342_v43 = vld [vmem:[#allocation5 + $0x2248] sm:$0xff] }
 0x269   : > { %4910 = vmatpush1.bf16.msra.mxu0 %v4909_v55  ;;  %4784 = vmatprep.subr.bf16.mxu1 %v4783_v56  ;;  %v5431_v55 = vld [vmem:[%s5814_s5 + $0x40] sm:$0xff]  ;;  %v4925_v56 = vpack.c.bf16 %v623_v37, %v613_v46  ;;  %v694_v25 = vld [vmem:[#allocation5 + $0xe08] sm:$0xff]  ;;  %v704_v46 = vld [vmem:[#allocation5 + $0xe58] sm:$0xff] }
 0x26a   : > { %4912 = vmatprep.subr.bf16.mxu0 %v4911_v61  ;;  %v633_v61 = vld [vmem:[#allocation5 + $0xc20] sm:$0xff] }
 0x26c   : > { %4786 = vmatpush1.bf16.msra.mxu1 %v4785_v1  ;;  %v654_v1 = vld [vmem:[#allocation5 + $0xcc8] sm:$0xff] }
 0x26d   : > { %4914 = vmatpush1.bf16.msra.mxu0 %v4913_v2  ;;  %4788 = vmatprep.subr.bf16.mxu1 %v4787_v33  ;;  %v664_v2 = vld [vmem:[#allocation5 + $0xd18] sm:$0xff]  ;;  %v5999_v33 = vld [vmem:[%s5814_s5 + $0xa0] sm:$0xff] }
 0x26e   : > { %4916 = vmatprep.subr.bf16.mxu0 %v4915_v17  ;;  %v4929_v17 = vpack.c.bf16 %v643_v63, %v633_v61  ;;  %v4931_v9 = vpack.c.bf16 %v664_v2, %v654_v1  ;;  %v724_v61 = vld [vmem:[#allocation5 + $0xef8] sm:$0xff]  ;;  %v1361_v1 = vld [vmem:[#allocation5 + $0x22e0] sm:$0xff] }
 0x26f   : > { %2752 = vmatmul.mubr.f32.vlgmr.msra.gmra.mrb[12].mxu1 %v5980_v34  ;;  %v713_v2 = vld [vmem:[#allocation5 + $0xea0] sm:$0xff] }
 0x270   : > { %4790 = vmatpush1.bf16.msra.mxu1 %v4789_v10  ;;  %2918 = vmatmul.mubr.f32.vlgmr.msra.gmra.mrb[12].mxu0 %v5427_v38  ;;  %v663_v10 = vld [vmem:[#allocation5 + $0xd10] sm:$0xff]  ;;  %v673_v38 = vld [vmem:[#allocation5 + $0xd60] sm:$0xff] }
 0x271   : > { %4918 = vmatpush1.bf16.msra.mxu0 %v4917_v12  ;;  %4792 = vmatprep.subr.bf16.mxu1 %v4791_v18  ;;  %v1312_v12 = vld [vmem:[#allocation5 + $0x2158] sm:$0xff]  ;;  %v1322_v18 = vld [vmem:[#allocation5 + $0x21a8] sm:$0xff]  ;;  %v4933_v29 = vpack.c.bf16 %v663_v10, %v653_v8 }
 0x272   : > { %4920 = vmatprep.subr.bf16.mxu0 %v4919_v26  ;;  %2757 = vmatprep.mubr.f32.mxu1 %v5985_v19  ;;  %v5437_v26 = vld [vmem:[%s5814_s5 + $0x18] sm:$0xff]  ;;  %v4807_v32 = vpack.c.bf16 %v1322_v18, %v1312_v12  ;;  %v1371_v18 = vld [vmem:[#allocation5 + $0x2330] sm:$0xff] }
 0x273   : > { %2758 = vmatmul.mubr.f32.gmra.mrb[14].mxu1 %v5989_v53  ;;  %2923 = vmatprep.mubr.f32.mxu0 %v5430_v54  ;;  %v744_v8 = vld [vmem:[#allocation5 + $0xf98] sm:$0xff] }
 0x274   : > { %4794 = vmatpush1.bf16.msra.mxu1 %v4793_v40  ;;  %2924 = vmatmul.mubr.f32.gmra.mrb[14].mxu0 %v5431_v55  ;;  %v4935_v40 = vpack.c.bf16 %v684_v24, %v674_v11  ;;  %v703_v55 = vld [vmem:[#allocation5 + $0xe50] sm:$0xff]  ;;  %v1381_v11 = vld [vmem:[#allocation5 + $0x2380] sm:$0xff] }
 0x275   : > { %4922 = vmatpush1.bf16.msra.mxu0 %v4921_v41  ;;  %4796 = vmatprep.subr.bf16.mxu1 %v4795_v42  ;;  %v683_v41 = vld [vmem:[#allocation5 + $0xdb0] sm:$0xff]  ;;  %v1332_v42 = vld [vmem:[#allocation5 + $0x21f8] sm:$0xff]  ;;  %v4941_v63 = vpack.c.bf16 %v703_v55, %v693_v52  ;;  %v733_v24 = vld [vmem:[#allocation5 + $0xf40] sm:$0xff] }
 0x276   : > { %4924 = vmatprep.subr.bf16.mxu0 %v4923_v48  ;;  %2763 = vmatprep.mubr.f32.mxu1 %v5995_v16  ;;  %v4809_v48 = vpack.c.bf16 %v1321_v36, %v1311_v21  ;;  %v4937_v37 = vpack.c.bf16 %v683_v41, %v673_v38  ;;  %v4811_v49 = vpack.c.bf16 %v1342_v43, %v1332_v42  ;;  %v1402_v21 = vld [vmem:[#allocation5 + $0x2428] sm:$0xff] }
 0x277   : > { %2764 = vmatmul.mubr.f32.gmra.mrb[16].mxu1 %v5999_v33  ;;  %2929 = vmatprep.mubr.f32.mxu0 %v5434_v3  ;;  %v754_v38 = vld [vmem:[#allocation5 + $0xfe8] sm:$0xff]  ;;  %v4821_v41 = vpack.c.bf16 %v1381_v11, %v1371_v18  ;;  %v1452_v18 = vld [vmem:[#allocation5 + $0x25b8] sm:$0xff] }
 0x278   : > { %4798 = vmatpush1.bf16.msra.mxu1 %v4797_v13  ;;  %2930 = vmatmul.mubr.f32.gmra.mrb[16].mxu0 %v5435_v30  ;;  %v4939_v13 = vpack.c.bf16 %v704_v46, %v694_v25  ;;  %v723_v30 = vld [vmem:[#allocation5 + $0xef0] sm:$0xff]  ;;  %v1401_v46 = vld [vmem:[#allocation5 + $0x2420] sm:$0xff]  ;;  %v774_v52 = vld [vmem:[#allocation5 + $0x1088] sm:$0xff] }
 0x279   : > { %4926 = vmatpush1.bf16.msra.mxu0 %v4925_v56  ;;  %4800 = vmatprep.subr.bf16.mxu1 %v4799_v22  ;;  %v1352_v56 = vld [vmem:[#allocation5 + $0x2298] sm:$0xff]  ;;  %v1362_v22 = vld [vmem:[#allocation5 + $0x22e8] sm:$0xff]  ;;  %v4945_v10 = vpack.c.bf16 %v723_v30, %v713_v2  ;;  %v1391_v25 = vld [vmem:[#allocation5 + $0x23d0] sm:$0xff] }
 0x27a   : > { %4928 = vmatprep.subr.bf16.mxu0 %v4927_v62  ;;  %2834 = vmatprep.mubr.f32.mxu1 %v6005_v20  ;;  %v4813_v62 = vpack.c.bf16 %v1341_v51, %v1331_v50  ;;  %v4815_v0 = vpack.c.bf16 %v1362_v22, %v1352_v56  ;;  %v1412_v50 = vld [vmem:[#allocation5 + $0x2478] sm:$0xff]  ;;  %v1422_v51 = vld [vmem:[#allocation5 + $0x24c8] sm:$0xff]  ;;  %v4825_v55 = vpack.c.bf16 %v1401_v46, %v1391_v25 }
 0x27b   : > { %3000 = vmatprep.mubr.f32.mxu0 %v5437_v26  ;;  %v4827_v22 = vpack.c.bf16 %v1422_v51, %v1412_v50  ;;  %v794_v2 = vld [vmem:[#allocation5 + $0x1128] sm:$0xff]  ;;  %v1472_v25 = vld [vmem:[#allocation5 + $0x2658] sm:$0xff] }
 0x27c   : > { %4802 = vmatpush1.bf16.msra.mxu1 %v4801_v4  ;;  %v4943_v4 = vpack.c.bf16 %v724_v61, %v714_v60  ;;  %v1411_v60 = vld [vmem:[#allocation5 + $0x2470] sm:$0xff]  ;;  %v1421_v61 = vld [vmem:[#allocation5 + $0x24c0] sm:$0xff]  ;;  %v1462_v11 = vld [vmem:[#allocation5 + $0x2608] sm:$0xff] }
 0x27d   : > { %4930 = vmatpush1.bf16.msra.mxu0 %v4929_v17  ;;  %4804 = vmatprep.subr.bf16.mxu1 %v4803_v5  ;;  %v1372_v17 = vld [vmem:[#allocation5 + $0x2338] sm:$0xff]  ;;  %v1382_v5 = vld [vmem:[#allocation5 + $0x2388] sm:$0xff]  ;;  %v4829_v30 = vpack.c.bf16 %v1421_v61, %v1411_v60 }
 0x27e   : > { %4932 = vmatprep.subr.bf16.mxu0 %v4931_v9  ;;  %v4817_v9 = vpack.c.bf16 %v1361_v1, %v1351_v45  ;;  %v4819_v12 = vpack.c.bf16 %v1382_v5, %v1372_v17  ;;  %v1432_v45 = vld [vmem:[#allocation5 + $0x2518] sm:$0xff]  ;;  %v1442_v1 = vld [vmem:[#allocation5 + $0x2568] sm:$0xff] }
 0x27f   : > { %v4831_v5 = vpack.c.bf16 %v1442_v1, %v1432_v45  ;;  %v1482_v46 = vld [vmem:[#allocation5 + $0x26a8] sm:$0xff]  ;;  %v1492_v60 = vld [vmem:[#allocation5 + $0x26f8] sm:$0xff] }
 0x280   : > { %4806 = vmatpush1.bf16.msra.mxu1 %v4805_v28  ;;  %v4947_v28 = vpack.c.bf16 %v744_v8, %v734_v7  ;;  %v1431_v7 = vld [vmem:[#allocation5 + $0x2510] sm:$0xff]  ;;  %v1441_v8 = vld [vmem:[#allocation5 + $0x2560] sm:$0xff]  ;;  %v4839_v51 = vpack.c.bf16 %v1482_v46, %v1472_v25  ;;  %v1502_v61 = vld [vmem:[#allocation5 + $0x2748] sm:$0xff] }
 0x281   : > { %4934 = vmatpush1.bf16.msra.mxu0 %v4933_v29  ;;  %4808 = vmatprep.subr.bf16.mxu1 %v4807_v32  ;;  %v743_v29 = vld [vmem:[#allocation5 + $0xf90] sm:$0xff]  ;;  %v1392_v32 = vld [vmem:[#allocation5 + $0x23d8] sm:$0xff]  ;;  %v4843_v1 = vpack.c.bf16 %v1502_v61, %v1492_v60  ;;  %v893_v25 = vld [vmem:[#allocation5 + $0x1440] sm:$0xff] }
 0x282   : > { %v6009_v54 = vpop.f32.mrb[6].mxu1  ;;  %4936 = vmatprep.subr.bf16.mxu0 %v4935_v40  ;;  %v764_v40 = vld [vmem:[#allocation5 + $0x1038] sm:$0xff]  ;;  %v4949_v42 = vpack.c.bf16 %v743_v29, %v733_v24  ;;  %v4823_v43 = vpack.c.bf16 %v1402_v21, %v1392_v32  ;;  %v814_v24 = vld [vmem:[#allocation5 + $0x11c8] sm:$0xff]  ;;  %v4833_v29 = vpack.c.bf16 %v1441_v8, %v1431_v7  ;;  %v4835_v21 = vpack.c.bf16 %v1462_v11, %v1452_v18  ;;  %v903_v46 = vld [vmem:[#allocation5 + $0x1490] sm:$0xff] }
 0x283   : > { %v6011_v58 = vpop.f32.mrb[7].mxu1  ;;  %v1512_v7 = vld [vmem:[#allocation5 + $0x2798] sm:$0xff]  ;;  %v1522_v8 = vld [vmem:[#allocation5 + $0x27e8] sm:$0xff] }
 0x284   : > { %4810 = vmatpush1.bf16.msra.mxu1 %v4809_v48  ;;  %v753_v48 = vld [vmem:[#allocation5 + $0xfe0] sm:$0xff]  ;;  %v4847_v11 = vpack.c.bf16 %v1522_v8, %v1512_v7  ;;  %v6027_v60 = vld [vmem:[%s5814_s5 + $0x78] sm:$0xff]  ;;  %v963_v8 = vld [vmem:[#allocation5 + $0x1670] sm:$0xff] }
 0x285   : > { %4938 = vmatpush1.bf16.msra.mxu0 %v4937_v37  ;;  %4812 = vmatprep.subr.bf16.mxu1 %v4811_v49  ;;  %v4951_v37 = vpack.c.bf16 %v764_v40, %v754_v38  ;;  %v763_v49 = vld [vmem:[#allocation5 + $0x1030] sm:$0xff]  ;;  %v1461_v40 = vld [vmem:[#allocation5 + $0x2600] sm:$0xff] }
 0x286   : > { %v6013_v3 = vpop.f32.mrb[8].mxu1  ;;  %4940 = vmatprep.subr.bf16.mxu0 %v4939_v13  ;;  %v784_v13 = vld [vmem:[#allocation5 + $0x10d8] sm:$0xff]  ;;  %v4953_v56 = vpack.c.bf16 %v763_v49, %v753_v48  ;;  %v1451_v38 = vld [vmem:[#allocation5 + $0x25b0] sm:$0xff]  ;;  %v834_v48 = vld [vmem:[#allocation5 + $0x1268] sm:$0xff] }
 0x287   : > { %v6015_v6 = vpop.f32.mrb[9].mxu1  ;;  %v4837_v49 = vpack.c.bf16 %v1461_v40, %v1451_v38  ;;  %v894_v38 = vld [vmem:[#allocation5 + $0x1448] sm:$0xff]  ;;  %v904_v40 = vld [vmem:[#allocation5 + $0x1498] sm:$0xff]  ;;  %v953_v7 = vld [vmem:[#allocation5 + $0x1620] sm:$0xff] }
 0x288   : > { %4814 = vmatpush1.bf16.msra.mxu1 %v4813_v62  ;;  %v773_v62 = vld [vmem:[#allocation5 + $0x1080] sm:$0xff] }
 0x289   : > { %4942 = vmatpush1.bf16.msra.mxu0 %v4941_v63  ;;  %4816 = vmatprep.subr.bf16.mxu1 %v4815_v0  ;;  %v4955_v63 = vpack.c.bf16 %v784_v13, %v774_v52  ;;  %v783_v0 = vld [vmem:[#allocation5 + $0x10d0] sm:$0xff]  ;;  %v1481_v13 = vld [vmem:[#allocation5 + $0x26a0] sm:$0xff] }
 0x28a   : > { %v6017_v26 = vpop.f32.mrb[10].mxu1  ;;  %4944 = vmatprep.subr.bf16.mxu0 %v4943_v4  ;;  %v804_v4 = vld [vmem:[#allocation5 + $0x1178] sm:$0xff]  ;;  %v4957_v17 = vpack.c.bf16 %v783_v0, %v773_v62  ;;  %v1471_v52 = vld [vmem:[#allocation5 + $0x2650] sm:$0xff]  ;;  %v854_v62 = vld [vmem:[#allocation5 + $0x1308] sm:$0xff] }
 0x28b   : > { %v6019_v36 = vpop.f32.mrb[11].mxu1  ;;  %v4841_v0 = vpack.c.bf16 %v1481_v13, %v1471_v52  ;;  %v923_v52 = vld [vmem:[#allocation5 + $0x1530] sm:$0xff] }
 0x28c   : > { %4818 = vmatpush1.bf16.msra.mxu1 %v4817_v9  ;;  %v793_v9 = vld [vmem:[#allocation5 + $0x1120] sm:$0xff]  ;;  %v6022_v13 = vld [vmem:[%s5814_s5 + $0x30] sm:$0xff] }
 0x28d   : > { %4946 = vmatpush1.bf16.msra.mxu0 %v4945_v10  ;;  %4820 = vmatprep.subr.bf16.mxu1 %v4819_v12  ;;  %v4959_v10 = vpack.c.bf16 %v804_v4, %v794_v2  ;;  %v803_v12 = vld [vmem:[#allocation5 + $0x1170] sm:$0xff]  ;;  %v1501_v4 = vld [vmem:[#allocation5 + $0x2740] sm:$0xff] }
 0x28e   : > { %4948 = vmatprep.subr.bf16.mxu0 %v4947_v28  ;;  %v824_v28 = vld [vmem:[#allocation5 + $0x1218] sm:$0xff]  ;;  %v4961_v32 = vpack.c.bf16 %v803_v12, %v793_v9  ;;  %v1491_v2 = vld [vmem:[#allocation5 + $0x26f0] sm:$0xff]  ;;  %v874_v9 = vld [vmem:[#allocation5 + $0x13a8] sm:$0xff] }
 0x28f   : > { %v4845_v12 = vpack.c.bf16 %v1501_v4, %v1491_v2  ;;  %v954_v2 = vld [vmem:[#allocation5 + $0x1628] sm:$0xff]  ;;  %v964_v4 = vld [vmem:[#allocation5 + $0x1678] sm:$0xff] }
 0x290   : > { %4822 = vmatpush1.bf16.msra.mxu1 %v4821_v41  ;;  %v813_v41 = vld [vmem:[#allocation5 + $0x11c0] sm:$0xff] }
 0x291   : > { %4950 = vmatpush1.bf16.msra.mxu0 %v4949_v42  ;;  %4824 = vmatprep.subr.bf16.mxu1 %v4823_v43  ;;  %v4963_v42 = vpack.c.bf16 %v824_v28, %v814_v24  ;;  %v823_v43 = vld [vmem:[#allocation5 + $0x1210] sm:$0xff]  ;;  %v1521_v28 = vld [vmem:[#allocation5 + $0x27e0] sm:$0xff] }
 0x292   : > { %4952 = vmatprep.subr.bf16.mxu0 %v4951_v37  ;;  %v844_v37 = vld [vmem:[#allocation5 + $0x12b8] sm:$0xff]  ;;  %v4965_v50 = vpack.c.bf16 %v823_v43, %v813_v41  ;;  %v1511_v24 = vld [vmem:[#allocation5 + $0x2790] sm:$0xff]  ;;  %v4979_v43 = vpack.c.bf16 %v904_v40, %v894_v38 }
 0x293   : > { %v4849_v41 = vpack.c.bf16 %v1521_v28, %v1511_v24  ;;  %v3247_v24 = vld [vmem:[#allocation7 + $0x88] sm:$0xff]  ;;  %v3230_v28 = vld [vmem:[#allocation7] sm:$0xff] }
 0x294   : > { %4826 = vmatpush1.bf16.msra.mxu1 %v4825_v55  ;;  %v833_v55 = vld [vmem:[#allocation5 + $0x1260] sm:$0xff] }
 0x295   : > { %4954 = vmatpush1.bf16.msra.mxu0 %v4953_v56  ;;  %4828 = vmatprep.subr.bf16.mxu1 %v4827_v22  ;;  %v4967_v56 = vpack.c.bf16 %v844_v37, %v834_v48  ;;  %v843_v22 = vld [vmem:[#allocation5 + $0x12b0] sm:$0xff]  ;;  %v914_v48 = vld [vmem:[#allocation5 + $0x14e8] sm:$0xff]  ;;  %v924_v37 = vld [vmem:[#allocation5 + $0x1538] sm:$0xff] }
 0x296   : > { %4956 = vmatprep.subr.bf16.mxu0 %v4955_v63  ;;  %v864_v63 = vld [vmem:[#allocation5 + $0x1358] sm:$0xff]  ;;  %v4969_v45 = vpack.c.bf16 %v843_v22, %v833_v55  ;;  %v934_v55 = vld [vmem:[#allocation5 + $0x1588] sm:$0xff]  ;;  %v5439_v22 = vld [vmem:[%s5814_s5 + $0x10] sm:$0xff] }
 0x298   : > { %4830 = vmatpush1.bf16.msra.mxu1 %v4829_v30  ;;  %v853_v30 = vld [vmem:[#allocation5 + $0x1300] sm:$0xff] }
 0x299   : > { %4958 = vmatpush1.bf16.msra.mxu0 %v4957_v17  ;;  %4832 = vmatprep.subr.bf16.mxu1 %v4831_v5  ;;  %v4971_v17 = vpack.c.bf16 %v864_v63, %v854_v62  ;;  %v863_v5 = vld [vmem:[#allocation5 + $0x1350] sm:$0xff]  ;;  %v5441_v62 = vld [vmem:[%s5814_s5 + $0x58] sm:$0xff] }
 0x29a   : > { %4960 = vmatprep.subr.bf16.mxu0 %v4959_v10  ;;  %v884_v10 = vld [vmem:[#allocation5 + $0x13f8] sm:$0xff]  ;;  %v4973_v18 = vpack.c.bf16 %v863_v5, %v853_v30  ;;  %v4991_v5 = vpack.c.bf16 %v964_v4, %v954_v2  ;;  %v3236_v4 = vld [vmem:[#allocation7 + $0x30] sm:$0xff] }
 0x29b   : > { %v6036_v30 = vld [vmem:[%s5814_s5 + $0xb8] sm:$0xff] }
 0x29c   : > { %4834 = vmatpush1.bf16.msra.mxu1 %v4833_v29  ;;  %v4975_v29 = vpack.c.bf16 %v884_v10, %v874_v9  ;;  %v974_v9 = vld [vmem:[#allocation5 + $0x16c8] sm:$0xff]  ;;  %v984_v10 = vld [vmem:[#allocation5 + $0x1718] sm:$0xff] }
 0x29d   : > { %4962 = vmatpush1.bf16.msra.mxu0 %v4961_v32  ;;  %4836 = vmatprep.subr.bf16.mxu1 %v4835_v21  ;;  %v873_v32 = vld [vmem:[#allocation5 + $0x13a0] sm:$0xff]  ;;  %v883_v21 = vld [vmem:[#allocation5 + $0x13f0] sm:$0xff]  ;;  %v4995_v38 = vpack.c.bf16 %v984_v10, %v974_v9  ;;  %v3255_v9 = vld [vmem:[#allocation7 + $0xc8] sm:$0xff] }
 0x29e   : > { %4964 = vmatprep.subr.bf16.mxu0 %v4963_v42  ;;  %v4977_v42 = vpack.c.bf16 %v883_v21, %v873_v32  ;;  %v3248_v32 = vld [vmem:[#allocation7 + $0x90] sm:$0xff]  ;;  %v3249_v21 = vld [vmem:[#allocation7 + $0x98] sm:$0xff]  ;;  %v1034_v10 = vld [vmem:[#allocation5 + $0x18a8] sm:$0xff] }
 0x29f   : > { %v5111_v40 = vpack.c.bf16 %v3249_v21, %v3248_v32  ;;  %v1043_v32 = vld [vmem:[#allocation5 + $0x18f0] sm:$0xff] }
 0x2a0   : > { %4838 = vmatpush1.bf16.msra.mxu1 %v4837_v49  ;;  %v4981_v49 = vpack.c.bf16 %v903_v46, %v893_v25  ;;  %v994_v25 = vld [vmem:[#allocation5 + $0x1768] sm:$0xff]  ;;  %v3256_v21 = vld [vmem:[#allocation7 + $0xd0] sm:$0xff] }
 0x2a1   : > { %4966 = vmatpush1.bf16.msra.mxu0 %v4965_v50  ;;  %4840 = vmatprep.subr.bf16.mxu1 %v4839_v51  ;;  %v4983_v50 = vpack.c.bf16 %v924_v37, %v914_v48  ;;  %v913_v51 = vld [vmem:[#allocation5 + $0x14e0] sm:$0xff]  ;;  %v3251_v46 = vld [vmem:[#allocation7 + $0xa8] sm:$0xff] }
 0x2a2   : > { %4968 = vmatprep.subr.bf16.mxu0 %v4967_v56  ;;  %v944_v56 = vld [vmem:[#allocation5 + $0x15d8] sm:$0xff]  ;;  %v4985_v61 = vpack.c.bf16 %v923_v52, %v913_v51  ;;  %v3235_v51 = vld [vmem:[#allocation7 + $0x28] sm:$0xff] }
 0x2a3   : > { %v4987_v63 = vpack.c.bf16 %v944_v56, %v934_v55  ;;  %v1003_v55 = vld [vmem:[#allocation5 + $0x17b0] sm:$0xff] }
 0x2a4   : > { %4842 = vmatpush1.bf16.msra.mxu1 %v4841_v0  ;;  %v933_v0 = vld [vmem:[#allocation5 + $0x1580] sm:$0xff]  ;;  %v3252_v56 = vld [vmem:[#allocation7 + $0xb0] sm:$0xff] }
 0x2a5   : > { %4970 = vmatpush1.bf16.msra.mxu0 %v4969_v45  ;;  %4844 = vmatprep.subr.bf16.mxu1 %v4843_v1  ;;  %v943_v45 = vld [vmem:[#allocation5 + $0x15d0] sm:$0xff] }
 0x2a6   : > { %4972 = vmatprep.subr.bf16.mxu0 %v4971_v17  ;;  %v6032_v1 = vld [vmem:[%s5814_s5 + $0x70] sm:$0xff]  ;;  %v4989_v17 = vpack.c.bf16 %v943_v45, %v933_v0  ;;  %v1013_v45 = vld [vmem:[#allocation5 + $0x1800] sm:$0xff] }
 0x2a8   : > { %4846 = vmatpush1.bf16.msra.mxu1 %v4845_v12  ;;  %v973_v12 = vld [vmem:[#allocation5 + $0x16c0] sm:$0xff] }
 0x2a9   : > { %4974 = vmatpush1.bf16.msra.mxu0 %v4973_v18  ;;  %4848 = vmatprep.subr.bf16.mxu1 %v4847_v11  ;;  %v983_v18 = vld [vmem:[#allocation5 + $0x1710] sm:$0xff]  ;;  %v3246_v11 = vld [vmem:[#allocation7 + $0x80] sm:$0xff] }
 0x2aa   : > { %4976 = vmatprep.subr.bf16.mxu0 %v4975_v29  ;;  %v3231_v29 = vld [vmem:[#allocation7 + $0x8] sm:$0xff]  ;;  %v4997_v37 = vpack.c.bf16 %v983_v18, %v973_v12  ;;  %v1044_v12 = vld [vmem:[#allocation5 + $0x18f8] sm:$0xff] }
 0x2ac   : > { %4850 = vmatpush1.bf16.msra.mxu1 %v4849_v41  ;;  %v3232_v41 = vld [vmem:[#allocation7 + $0x10] sm:$0xff] }
 0x2ad   : > { %4978 = vmatpush1.bf16.msra.mxu0 %v4977_v42  ;;  %v3233_v42 = vld [vmem:[#allocation7 + $0x18] sm:$0xff] }
 0x2ae   : > { %4980 = vmatprep.subr.bf16.mxu0 %v4979_v43  ;;  %v3250_v43 = vld [vmem:[#allocation7 + $0xa0] sm:$0xff]  ;;  %v5113_v48 = vpack.c.bf16 %v3233_v42, %v3232_v41 }
 0x2af   : > { %2835 = vmatmul.mubr.f32.vlgmr.msra.gmra.mrb[12].mxu1 %v6022_v13 }
 0x2b0   : > { %3001 = vmatmul.mubr.f32.vlgmr.msra.gmra.mrb[12].mxu0 %v5439_v22  ;;  %2840 = vmatprep.mubr.f32.mxu1 %v6027_v60  ;;  %v3253_v22 = vld [vmem:[#allocation7 + $0xb8] sm:$0xff] }
 0x2b1   : > { %4982 = vmatpush1.bf16.msra.mxu0 %v4981_v49  ;;  %3006 = vmatprep.mubr.f32.mxu0 %v5441_v62  ;;  %v5115_v49 = vpack.c.bf16 %v3251_v46, %v3250_v43  ;;  %v1024_v62 = vld [vmem:[#allocation5 + $0x1858] sm:$0xff]  ;;  %v5119_v2 = vpack.c.bf16 %v3253_v22, %v3252_v56  ;;  %v1053_v43 = vld [vmem:[#allocation5 + $0x1940] sm:$0xff] }
 0x2b2   : > { %4984 = vmatprep.subr.bf16.mxu0 %v4983_v50  ;;  %v3234_v50 = vld [vmem:[#allocation7 + $0x20] sm:$0xff]  ;;  %v3241_v46 = vld [vmem:[#allocation7 + $0x58] sm:$0xff] }
 0x2b3   : > { %2841 = vmatmul.mubr.f32.gmra.mrb[14].mxu1 %v6032_v1  ;;  %v3242_v22 = vld [vmem:[#allocation7 + $0x60] sm:$0xff] }
 0x2b4   : > { %2846 = vmatprep.mubr.f32.mxu1 %v6036_v30  ;;  %3007 = vmatmul.mubr.f32.gmra.mrb[14].mxu0 %v5959_v14  ;;  %v4993_v14 = vpack.c.bf16 %v963_v8, %v953_v7  ;;  %v1023_v7 = vld [vmem:[#allocation5 + $0x1850] sm:$0xff]  ;;  %v3254_v8 = vld [vmem:[#allocation7 + $0xc0] sm:$0xff] }
 0x2b5   : > { %4986 = vmatpush1.bf16.msra.mxu0 %v4985_v61  ;;  %3012 = vmatprep.mubr.f32.mxu0 %v5967_v35  ;;  %v5107_v35 = vpack.c.bf16 %v3247_v24, %v3246_v11  ;;  %v1014_v61 = vld [vmem:[#allocation5 + $0x1808] sm:$0xff]  ;;  %v5005_v11 = vpack.c.bf16 %v1023_v7, %v1013_v45  ;;  %v1033_v24 = vld [vmem:[#allocation5 + $0x18a0] sm:$0xff] }
 0x2b6   : > { %4988 = vmatprep.subr.bf16.mxu0 %v4987_v63  ;;  %v5117_v63 = vpack.c.bf16 %v3235_v51, %v3234_v50  ;;  %v5009_v42 = vpack.c.bf16 %v1043_v32, %v1033_v24  ;;  %v1074_v50 = vld [vmem:[#allocation5 + $0x19e8] sm:$0xff]  ;;  %v1084_v51 = vld [vmem:[#allocation5 + $0x1a38] sm:$0xff]  ;;  %v1093_v7 = vld [vmem:[#allocation5 + $0x1a80] sm:$0xff] }
 0x2b7   : > { %2847 = vmatmul.mubr.f32.gmra.mrb[16].mxu1 %v5963_v15  ;;  %v5109_v15 = vpack.c.bf16 %v3231_v29, %v3230_v28  ;;  %5108 = vmatprep.subr.bf16.mxu1 %v5107_v35  ;;  %v5123_v28 = vpack.c.bf16 %v3255_v9, %v3254_v8  ;;  %v3239_v35 = vld [vmem:[#allocation7 + $0x48] sm:$0xff]  ;;  %v5007_v29 = vpack.c.bf16 %v1044_v12, %v1034_v10  ;;  %v1103_v8 = vld [vmem:[#allocation5 + $0x1ad0] sm:$0xff]  ;;  %v1124_v10 = vld [vmem:[#allocation5 + $0x1b78] sm:$0xff] }
 0x2b8   : > { %3013 = vmatmul.mubr.f32.gmra.mrb[16].mxu0 %v5971_v39  ;;  %v1004_v39 = vld [vmem:[#allocation5 + $0x17b8] sm:$0xff]  ;;  %v1094_v45 = vld [vmem:[#allocation5 + $0x1a88] sm:$0xff]  ;;  %v5021_v12 = vpack.c.bf16 %v1103_v8, %v1093_v7  ;;  %v1123_v24 = vld [vmem:[#allocation5 + $0x1b70] sm:$0xff] }
 0x2b9   : > { %4990 = vmatpush1.bf16.msra.mxu0 %v4989_v17  ;;  %3083 = vmatprep.mubr.f32.mxu0 %v5976_v23  ;;  %v993_v23 = vld [vmem:[#allocation5 + $0x1760] sm:$0xff]  ;;  %v4999_v52 = vpack.c.bf16 %v1004_v39, %v994_v25  ;;  %v3237_v17 = vld [vmem:[#allocation7 + $0x38] sm:$0xff]  ;;  %v3240_v39 = vld [vmem:[#allocation7 + $0x50] sm:$0xff] }
 0x2ba   : > { %4992 = vmatprep.subr.bf16.mxu0 %v4991_v5  ;;  %5110 = vmatpush3.bf16.msra.mxu1 %v5109_v15  ;;  %v5001_v0 = vpack.c.bf16 %v1003_v55, %v993_v23  ;;  %v5003_v5 = vpack.c.bf16 %v1024_v62, %v1014_v61  ;;  %v5121_v18 = vpack.c.bf16 %v3237_v17, %v3236_v4  ;;  %v1054_v15 = vld [vmem:[#allocation5 + $0x1948] sm:$0xff]  ;;  %v3258_v23 = vld [vmem:[#allocation7 + $0xe0] sm:$0xff]  ;;  %v1243_v8 = vld [vmem:[#allocation5 + $0x1f30] sm:$0xff] }
 0x2bb   : > { %5112 = vmatprep.subr.bf16.mxu1 %v5111_v40  ;;  %v1064_v40 = vld [vmem:[#allocation5 + $0x1998] sm:$0xff]  ;;  %v3243_v61 = vld [vmem:[#allocation7 + $0x68] sm:$0xff]  ;;  %v5015_v62 = vpack.c.bf16 %v1084_v51, %v1074_v50  ;;  %v1133_v32 = vld [vmem:[#allocation5 + $0x1bc0] sm:$0xff] }
 0x2bc   : > { %v5133_v4 = vpack.c.bf16 %v3243_v61, %v3242_v22  ;;  %v1114_v9 = vld [vmem:[#allocation5 + $0x1b28] sm:$0xff]  ;;  %v1204_v50 = vld [vmem:[#allocation5 + $0x1df8] sm:$0xff]  ;;  %v1233_v7 = vld [vmem:[#allocation5 + $0x1ee0] sm:$0xff] }
 0x2bd   : > { %4994 = vmatpush1.bf16.msra.mxu0 %v4993_v14  ;;  %v3238_v14 = vld [vmem:[#allocation7 + $0x40] sm:$0xff]  ;;  %v1214_v22 = vld [vmem:[#allocation5 + $0x1e48] sm:$0xff]  ;;  %v1224_v61 = vld [vmem:[#allocation5 + $0x1e98] sm:$0xff] }
 0x2be   : > { %4996 = vmatprep.subr.bf16.mxu0 %v4995_v38  ;;  %5114 = vmatpush3.bf16.msra.mxu1 %v5113_v48  ;;  %v3257_v38 = vld [vmem:[#allocation7 + $0xd8] sm:$0xff]  ;;  %v5125_v41 = vpack.c.bf16 %v3239_v35, %v3238_v14  ;;  %v5011_v48 = vpack.c.bf16 %v1064_v40, %v1054_v15 }
 0x2bf   : > { %5116 = vmatprep.subr.bf16.mxu1 %v5115_v49  ;;  %v5127_v25 = vpack.c.bf16 %v3257_v38, %v3256_v21  ;;  %v3259_v49 = vld [vmem:[#allocation7 + $0xe8] sm:$0xff]  ;;  %v1144_v14 = vld [vmem:[#allocation5 + $0x1c18] sm:$0xff]  ;;  %v1143_v21 = vld [vmem:[#allocation5 + $0x1c10] sm:$0xff] }
 0x2c0   : > { %v5131_v56 = vpack.c.bf16 %v3259_v49, %v3258_v23  ;;  %v1154_v38 = vld [vmem:[#allocation5 + $0x1c68] sm:$0xff]  ;;  %v1164_v15 = vld [vmem:[#allocation5 + $0x1cb8] sm:$0xff]  ;;  %v5029_v40 = vpack.c.bf16 %v1143_v21, %v1133_v32  ;;  %v1183_v23 = vld [vmem:[#allocation5 + $0x1d50] sm:$0xff] }
 0x2c1   : > { %4998 = vmatpush1.bf16.msra.mxu0 %v4997_v37  ;;  %v1063_v37 = vld [vmem:[#allocation5 + $0x1990] sm:$0xff]  ;;  %v1194_v49 = vld [vmem:[#allocation5 + $0x1da8] sm:$0xff]  ;;  %v1273_v32 = vld [vmem:[#allocation5 + $0x2020] sm:$0xff] }
 0x2c2   : > { %5000 = vmatprep.subr.bf16.mxu0 %v4999_v52  ;;  %5118 = vmatpush3.bf16.msra.mxu1 %v5117_v63  ;;  %v5129_v52 = vpack.c.bf16 %v3241_v46, %v3240_v39  ;;  %v5013_v55 = vpack.c.bf16 %v1063_v37, %v1053_v43  ;;  %v1073_v63 = vld [vmem:[#allocation5 + $0x19e0] sm:$0xff]  ;;  %v1163_v43 = vld [vmem:[#allocation5 + $0x1cb0] sm:$0xff]  ;;  %v1184_v39 = vld [vmem:[#allocation5 + $0x1d58] sm:$0xff] }
 0x2c3   : > { %5120 = vmatprep.subr.bf16.mxu1 %v5119_v2  ;;  %v1104_v2 = vld [vmem:[#allocation5 + $0x1ad8] sm:$0xff]  ;;  %v1173_v37 = vld [vmem:[#allocation5 + $0x1d00] sm:$0xff]  ;;  %v1294_v21 = vld [vmem:[#allocation5 + $0x20c8] sm:$0xff] }
 0x2c4   : > { %v5037_v51 = vpack.c.bf16 %v1183_v23, %v1173_v37  ;;  %v1333_v37 = vld [vmem:[#allocation5 + $0x2200] sm:$0xff]  ;;  %v1343_v23 = vld [vmem:[#allocation5 + $0x2250] sm:$0xff] }
 0x2c5   : > { %5002 = vmatpush1.bf16.msra.mxu0 %v5001_v0  ;;  %v1083_v0 = vld [vmem:[#allocation5 + $0x1a30] sm:$0xff] }
 0x2c6   : > { %5004 = vmatprep.subr.bf16.mxu0 %v5003_v5  ;;  %5122 = vmatpush3.bf16.msra.mxu1 %v5121_v18  ;;  %v5017_v17 = vpack.c.bf16 %v1083_v0, %v1073_v63  ;;  %v5019_v5 = vpack.c.bf16 %v1104_v2, %v1094_v45  ;;  %v5023_v18 = vpack.c.bf16 %v1124_v10, %v1114_v9  ;;  %v1213_v0 = vld [vmem:[#allocation5 + $0x1e40] sm:$0xff]  ;;  %v1223_v45 = vld [vmem:[#allocation5 + $0x1e90] sm:$0xff]  ;;  %v1234_v2 = vld [vmem:[#allocation5 + $0x1ee8] sm:$0xff] }
 0x2c7   : > { %5124 = vmatprep.subr.bf16.mxu1 %v5123_v28  ;;  %v1134_v28 = vld [vmem:[#allocation5 + $0x1bc8] sm:$0xff]  ;;  %v5043_v63 = vpack.c.bf16 %v1224_v61, %v1214_v22  ;;  %v1264_v10 = vld [vmem:[#allocation5 + $0x1fd8] sm:$0xff]  ;;  %v3244_v22 = vld [vmem:[#allocation7 + $0x70] sm:$0xff] }
 0x2c8   : > { %v1254_v9 = vld [vmem:[#allocation5 + $0x1f88] sm:$0xff]  ;;  %v3245_v61 = vld [vmem:[#allocation7 + $0x78] sm:$0xff] }
 0x2c9   : > { %5006 = vmatpush1.bf16.msra.mxu0 %v5005_v11  ;;  %v1113_v11 = vld [vmem:[#allocation5 + $0x1b20] sm:$0xff] }
 0x2ca   : > { %5008 = vmatprep.subr.bf16.mxu0 %v5007_v29  ;;  %5126 = vmatpush3.bf16.msra.mxu1 %v5125_v41  ;;  %v5025_v35 = vpack.c.bf16 %v1123_v24, %v1113_v11  ;;  %v5027_v29 = vpack.c.bf16 %v1144_v14, %v1134_v28  ;;  %v5031_v41 = vpack.c.bf16 %v1164_v15, %v1154_v38  ;;  %v1253_v11 = vld [vmem:[#allocation5 + $0x1f80] sm:$0xff]  ;;  %v1263_v24 = vld [vmem:[#allocation5 + $0x1fd0] sm:$0xff]  ;;  %v1274_v28 = vld [vmem:[#allocation5 + $0x2028] sm:$0xff] }
 0x2cb   : > { %5128 = vmatprep.subr.bf16.mxu1 %v5127_v25  ;;  %v1174_v25 = vld [vmem:[#allocation5 + $0x1d08] sm:$0xff]  ;;  %v1284_v14 = vld [vmem:[#allocation5 + $0x2078] sm:$0xff] }
 0x2cc   : > { %v1304_v38 = vld [vmem:[#allocation5 + $0x2118] sm:$0xff] }
 0x2cd   : > { %5010 = vmatpush1.bf16.msra.mxu0 %v5009_v42  ;;  %v1153_v42 = vld [vmem:[#allocation5 + $0x1c60] sm:$0xff]  ;;  %v5059_v15 = vpack.c.bf16 %v1304_v38, %v1294_v21  ;;  %v3195_v38 = vmul.f32 %v5947_v57, %v5947_v57  ;;  %v1423_v57 = vld [vmem:[#allocation5 + $0x24d0] sm:$0xff] }
 0x2ce   : > { %5012 = vmatprep.subr.bf16.mxu0 %v5011_v48  ;;  %5130 = vmatpush3.bf16.msra.mxu1 %v5129_v52  ;;  %v5033_v46 = vpack.c.bf16 %v1163_v43, %v1153_v42  ;;  %v5035_v48 = vpack.c.bf16 %v1184_v39, %v1174_v25  ;;  %v5039_v52 = vpack.c.bf16 %v1204_v50, %v1194_v49  ;;  %v1324_v42 = vld [vmem:[#allocation5 + $0x21b8] sm:$0xff]  ;;  %v1313_v25 = vld [vmem:[#allocation5 + $0x2160] sm:$0xff]  ;;  %v1323_v39 = vld [vmem:[#allocation5 + $0x21b0] sm:$0xff] }
 0x2cf   : > { %5132 = vmatprep.subr.bf16.mxu1 %v5131_v56  ;;  %v1203_v56 = vld [vmem:[#allocation5 + $0x1df0] sm:$0xff]  ;;  %v1354_v49 = vld [vmem:[#allocation5 + $0x22a8] sm:$0xff] }
 0x2d0   : > { %v3260_v50 = vld [vmem:[#allocation7 + $0xf0] sm:$0xff] }
 0x2d1   : > { %5014 = vmatpush1.bf16.msra.mxu0 %v5013_v55  ;;  %v1193_v55 = vld [vmem:[#allocation5 + $0x1da0] sm:$0xff] }
 0x2d2   : > { %5016 = vmatprep.subr.bf16.mxu0 %v5015_v62  ;;  %5134 = vmatpush3.bf16.msra.mxu1 %v5133_v4  ;;  %v5041_v62 = vpack.c.bf16 %v1203_v56, %v1193_v55  ;;  %v1244_v4 = vld [vmem:[#allocation5 + $0x1f38] sm:$0xff] }
 0x2d3   : > { %v1364_v55 = vld [vmem:[#allocation5 + $0x22f8] sm:$0xff] }
 0x2d5   : > { %5018 = vmatpush1.bf16.msra.mxu0 %v5017_v17  ;;  %v5045_v17 = vpack.c.bf16 %v1223_v45, %v1213_v0  ;;  %v3185_v0 = vmul.f32 %v5935_v27, %v5935_v27 }
 0x2d6   : > { %5020 = vmatprep.subr.bf16.mxu0 %v5019_v5  ;;  %v5047_v5 = vpack.c.bf16 %v1244_v4, %v1234_v2  ;;  %v5069_v2 = vpack.c.bf16 %v1343_v23, %v1333_v37  ;;  %v5071_v4 = vpack.c.bf16 %v1364_v55, %v1354_v49  ;;  %v1434_v37 = vld [vmem:[#allocation5 + $0x2528] sm:$0xff]  ;;  %v1444_v23 = vld [vmem:[#allocation5 + $0x2578] sm:$0xff] }
 0x2d7   : > { %v5087_v49 = vpack.c.bf16 %v1444_v23, %v1434_v37  ;;  %v1454_v55 = vld [vmem:[#allocation5 + $0x25c8] sm:$0xff]  ;;  %v3191_v37 = vmul.f32 %v5944_v47, %v5944_v47  ;;  %v3266_v47 = vld [vmem:[#allocation7 + $0x120] sm:$0xff] }
 0x2d9   : > { %5022 = vmatpush1.bf16.msra.mxu0 %v5021_v12  ;;  %v5049_v12 = vpack.c.bf16 %v1243_v8, %v1233_v7 }
 0x2da   : > { %5024 = vmatprep.subr.bf16.mxu0 %v5023_v18  ;;  %v5051_v18 = vpack.c.bf16 %v1264_v10, %v1254_v9  ;;  %v1374_v9 = vld [vmem:[#allocation5 + $0x2348] sm:$0xff]  ;;  %v1384_v10 = vld [vmem:[#allocation5 + $0x2398] sm:$0xff] }
 0x2dd   : > { %5026 = vmatpush1.bf16.msra.mxu0 %v5025_v35  ;;  %v5053_v35 = vpack.c.bf16 %v1263_v24, %v1253_v11  ;;  %v5075_v24 = vpack.c.bf16 %v1384_v10, %v1374_v9  ;;  %v1494_v9 = vld [vmem:[#allocation5 + $0x2708] sm:$0xff]  ;;  %v1504_v10 = vld [vmem:[#allocation5 + $0x2758] sm:$0xff] }
 0x2de   : > { %5028 = vmatprep.subr.bf16.mxu0 %v5027_v29  ;;  %v5055_v29 = vpack.c.bf16 %v1284_v14, %v1274_v28  ;;  %v1373_v28 = vld [vmem:[#allocation5 + $0x2340] sm:$0xff]  ;;  %v1383_v14 = vld [vmem:[#allocation5 + $0x2390] sm:$0xff] }
 0x2e1   : > { %5030 = vmatpush1.bf16.msra.mxu0 %v5029_v40  ;;  %v1293_v40 = vld [vmem:[#allocation5 + $0x20c0] sm:$0xff] }
 0x2e2   : > { %5032 = vmatprep.subr.bf16.mxu0 %v5031_v41  ;;  %v1314_v41 = vld [vmem:[#allocation5 + $0x2168] sm:$0xff] }
 0x2e3   : > { %v5063_v43 = vpack.c.bf16 %v1324_v42, %v1314_v41  ;;  %v1414_v42 = vld [vmem:[#allocation5 + $0x2488] sm:$0xff] }
 0x2e5   : > { %5034 = vmatpush1.bf16.msra.mxu0 %v5033_v46  ;;  %v1334_v46 = vld [vmem:[#allocation5 + $0x2208] sm:$0xff] }
 0x2e6   : > { %5036 = vmatprep.subr.bf16.mxu0 %v5035_v48  ;;  %v1344_v48 = vld [vmem:[#allocation5 + $0x2258] sm:$0xff] }
 0x2e9   : > { %5038 = vmatpush1.bf16.msra.mxu0 %v5037_v51  ;;  %v3261_v51 = vld [vmem:[#allocation7 + $0xf8] sm:$0xff] }
 0x2ea   : > { %5040 = vmatprep.subr.bf16.mxu0 %v5039_v52  ;;  %v5135_v56 = vpack.c.bf16 %v3261_v51, %v3260_v50  ;;  %v1433_v50 = vld [vmem:[#allocation5 + $0x2520] sm:$0xff]  ;;  %v1443_v51 = vld [vmem:[#allocation5 + $0x2570] sm:$0xff] }
 0x2ec   : > { %5136 = vmatprep.subr.bf16.mxu1 %v5135_v56  ;;  %v1464_v56 = vld [vmem:[#allocation5 + $0x2618] sm:$0xff] }
 0x2ed   : > { %5042 = vmatpush1.bf16.msra.mxu0 %v5041_v62 }
 0x2ee   : > { %5044 = vmatprep.subr.bf16.mxu0 %v5043_v63  ;;  %v5137_v63 = vpack.c.bf16 %v3245_v61, %v3244_v22  ;;  %v5089_v22 = vpack.c.bf16 %v1443_v51, %v1433_v50  ;;  %v5091_v61 = vpack.c.bf16 %v1464_v56, %v1454_v55 }
 0x2f0   : > { %3084 = vmatmul.mubr.f32.vlgmr.msra.gmra.mrb[12].mxu0 %v5980_v34  ;;  %v1283_v34 = vld [vmem:[#allocation5 + $0x2070] sm:$0xff]  ;;  %5138 = vmatpush3.bf16.msra.mxu1 %v5137_v63 }
 0x2f1   : > { %5046 = vmatpush1.bf16.msra.mxu0 %v5045_v17  ;;  %3089 = vmatprep.mubr.f32.mxu0 %v5985_v19  ;;  %v5057_v19 = vpack.c.bf16 %v1283_v34, %v1273_v32  ;;  %v1353_v17 = vld [vmem:[#allocation5 + $0x22a0] sm:$0xff]  ;;  %v1394_v32 = vld [vmem:[#allocation5 + $0x23e8] sm:$0xff]  ;;  %v1404_v34 = vld [vmem:[#allocation5 + $0x2438] sm:$0xff] }
 0x2f2   : > { %5048 = vmatprep.subr.bf16.mxu0 %v5047_v5  ;;  %v1363_v5 = vld [vmem:[#allocation5 + $0x22f0] sm:$0xff] }
 0x2f3   : > { %v5073_v11 = vpack.c.bf16 %v1363_v5, %v1353_v17  ;;  %v1463_v63 = vld [vmem:[#allocation5 + $0x2610] sm:$0xff]  ;;  %v1473_v17 = vld [vmem:[#allocation5 + $0x2660] sm:$0xff] }
 0x2f4   : > { %3090 = vmatmul.mubr.f32.gmra.mrb[14].mxu0 %v5989_v53  ;;  %v1303_v53 = vld [vmem:[#allocation5 + $0x2110] sm:$0xff] }
 0x2f5   : > { %5050 = vmatpush1.bf16.msra.mxu0 %v5049_v12  ;;  %3095 = vmatprep.mubr.f32.mxu0 %v5995_v16  ;;  %v5061_v16 = vpack.c.bf16 %v1303_v53, %v1293_v40  ;;  %v1393_v40 = vld [vmem:[#allocation5 + $0x23e0] sm:$0xff]  ;;  %v1403_v53 = vld [vmem:[#allocation5 + $0x2430] sm:$0xff] }
 0x2f6   : > { %5052 = vmatprep.subr.bf16.mxu0 %v5051_v18  ;;  %v3190_v18 = vmul.f32 %v5941_v44, %v5941_v44  ;;  %v5077_v44 = vpack.c.bf16 %v1383_v14, %v1373_v28  ;;  %v1483_v5 = vld [vmem:[#allocation5 + $0x26b0] sm:$0xff]  ;;  %v1524_v28 = vld [vmem:[#allocation5 + $0x27f8] sm:$0xff] }
 0x2f8   : > { %3096 = vmatmul.mubr.f32.gmra.mrb[16].mxu0 %v5999_v33  ;;  %v5065_v33 = vpack.c.bf16 %v1323_v39, %v1313_v25  ;;  %v3279_v25 = vld [vmem:[#allocation7 + $0x188] sm:$0xff]  ;;  %v5081_v39 = vpack.c.bf16 %v1403_v53, %v1393_v40  ;;  %v3186_v53 = vmul.f32 %v5938_v31, %v5938_v31 }
 0x2f9   : > { %5054 = vmatpush1.bf16.msra.mxu0 %v5053_v35  ;;  %3166 = vmatprep.mubr.f32.mxu0 %v6005_v20  ;;  %v5067_v20 = vpack.c.bf16 %v1344_v48, %v1334_v46  ;;  %v3263_v40 = vld [vmem:[#allocation7 + $0x108] sm:$0xff] }
 0x2fa   : > { %5056 = vmatprep.subr.bf16.mxu0 %v5055_v29 }
 0x2fd   : > { %5058 = vmatpush1.bf16.msra.mxu0 %v5057_v19 }
 0x2fe   : > { %5060 = vmatprep.subr.bf16.mxu0 %v5059_v15  ;;  %v5079_v15 = vpack.c.bf16 %v1404_v34, %v1394_v32  ;;  %v1513_v34 = vld [vmem:[#allocation5 + $0x27a0] sm:$0xff] }
 0x301   : > { %5062 = vmatpush1.bf16.msra.mxu0 %v5061_v16  ;;  %v1424_v16 = vld [vmem:[#allocation5 + $0x24d8] sm:$0xff] }
 0x302   : > { %5064 = vmatprep.subr.bf16.mxu0 %v5063_v43  ;;  %v3278_v43 = vld [vmem:[#allocation7 + $0x180] sm:$0xff]  ;;  %v5083_v48 = vpack.c.bf16 %v1424_v16, %v1414_v42 }
 0x303   : > { %v6050_v52 = vpop.f32.mrb[6].mxu0  ;;  %v5139_v46 = vpack.c.bf16 %v3279_v25, %v3278_v43  ;;  %v3280_v43 = vld [vmem:[#allocation7 + $0x190] sm:$0xff]  ;;  %v3281_v25 = vld [vmem:[#allocation7 + $0x198] sm:$0xff] }
 0x304   : > { %v2506_v62 = vpop.f32.mrb[7].mxu0 }
 0x305   : > { %v3200_v45 = vmul.f32 %v2506_v62, %v2506_v62  ;;  %5066 = vmatpush1.bf16.msra.mxu0 %v5065_v33  ;;  %v1413_v33 = vld [vmem:[#allocation5 + $0x2480] sm:$0xff]  ;;  %5140 = vmatprep.subr.bf16.mxu1 %v5139_v46 }
 0x306   : > { %5068 = vmatprep.subr.bf16.mxu0 %v5067_v20  ;;  %v5085_v20 = vpack.c.bf16 %v1423_v57, %v1413_v33  ;;  %v1453_v62 = vld [vmem:[#allocation5 + $0x25c0] sm:$0xff]  ;;  %v3264_v33 = vld [vmem:[#allocation7 + $0x110] sm:$0xff]  ;;  %v3265_v57 = vld [vmem:[#allocation7 + $0x118] sm:$0xff] }
 0x307   : > { %v6054_v7 = vadd.f32 %v3200_v45, %v3185_v0  ;;  %v6056_v8 = vpop.f32.mrb[8].mxu0  ;;  %v1474_v0 = vld [vmem:[#allocation5 + $0x2668] sm:$0xff]  ;;  %v1484_v45 = vld [vmem:[#allocation5 + $0x26b8] sm:$0xff]  ;;  %v5145_v55 = vpack.c.bf16 %v3265_v57, %v3264_v33  ;;  %v3188_v57 = vmul.f32 %v6011_v58, %v6011_v58 }
 0x308   : > { %v2512_v12 = vpop.f32.mrb[9].mxu0  ;;  %v3295_v33 = vld [vmem:[#allocation7 + $0x208] sm:$0xff]  ;;  %v3194_v58 = vmul.f32 %v6056_v8, %v6056_v8 }
 0x309   : > { %v3205_v27 = vmul.f32 %v2512_v12, %v2512_v12  ;;  %5070 = vmatpush1.bf16.msra.mxu0 %v5069_v2  ;;  %v5093_v2 = vpack.c.bf16 %v1463_v63, %v1453_v62  ;;  %v5097_v12 = vpack.c.bf16 %v1483_v5, %v1473_v17  ;;  %v3267_v62 = vld [vmem:[#allocation7 + $0x128] sm:$0xff]  ;;  %v3196_v63 = vmul.f32 %v5950_v59, %v5950_v59  ;;  %v3269_v59 = vld [vmem:[#allocation7 + $0x138] sm:$0xff] }
 0x30a   : > { %5072 = vmatprep.subr.bf16.mxu0 %v5071_v4  ;;  %v5095_v4 = vpack.c.bf16 %v1484_v45, %v1474_v0  ;;  %v5149_v5 = vpack.c.bf16 %v3267_v62, %v3266_v47 }
 0x30b   : > { %v6060_v35 = vadd.f32 %v3205_v27, %v3190_v18  ;;  %v6062_v29 = vpop.f32.mrb[10].mxu0  ;;  %v5099_v18 = vpack.c.bf16 %v1504_v10, %v1494_v9  ;;  %v1493_v27 = vld [vmem:[#allocation5 + $0x2700] sm:$0xff] }
 0x30c   : > { %v2518_v21 = vpop.f32.mrb[11].mxu0  ;;  %v3199_v8 = vmul.f32 %v6062_v29, %v6062_v29  ;;  %v3302_v29 = vld [vmem:[#allocation7 + $0x240] sm:$0xff] }
 0x30d   : > { %v3210_v19 = vmul.f32 %v2518_v21, %v2518_v21  ;;  %5074 = vmatpush1.bf16.msra.mxu0 %v5073_v11  ;;  %v1503_v11 = vld [vmem:[#allocation5 + $0x2750] sm:$0xff] }
 0x30e   : > { %5076 = vmatprep.subr.bf16.mxu0 %v5075_v24  ;;  %v1514_v24 = vld [vmem:[#allocation5 + $0x27a8] sm:$0xff]  ;;  %v5101_v14 = vpack.c.bf16 %v1503_v11, %v1493_v27  ;;  %v1523_v21 = vld [vmem:[#allocation5 + $0x27f0] sm:$0xff] }
 0x30f   : > { %v6066_v41 = vadd.f32 %v3210_v19, %v3195_v38  ;;  %v5103_v32 = vpack.c.bf16 %v1524_v28, %v1514_v24  ;;  %v5105_v38 = vpack.c.bf16 %v1523_v21, %v1513_v34  ;;  %v5444_v19 = vld [vmem:[%s5814_s5 + $0xb0] sm:$0xff]  ;;  %v3287_v27 = vld [vmem:[#allocation7 + $0x1c8] sm:$0xff]  ;;  %v3270_v24 = vld [vmem:[#allocation7 + $0x140] sm:$0xff] }
 0x310   : > { %v3288_v28 = vld [vmem:[#allocation7 + $0x1d0] sm:$0xff] }
 0x311   : > { %5078 = vmatpush1.bf16.msra.mxu0 %v5077_v44  ;;  %v3272_v21 = vld [vmem:[#allocation7 + $0x150] sm:$0xff] }
 0x312   : > { %5080 = vmatprep.subr.bf16.mxu0 %v5079_v15  ;;  %v3262_v15 = vld [vmem:[#allocation7 + $0x100] sm:$0xff] }
 0x315   : > { %5082 = vmatpush1.bf16.msra.mxu0 %v5081_v39 }
 0x316   : > { %5084 = vmatprep.subr.bf16.mxu0 %v5083_v48  ;;  %v5143_v48 = vpack.c.bf16 %v3281_v25, %v3280_v43 }
 0x319   : > { %5086 = vmatpush1.bf16.msra.mxu0 %v5085_v20  ;;  %v3282_v20 = vld [vmem:[#allocation7 + $0x1a0] sm:$0xff] }
 0x31a   : > { %5088 = vmatprep.subr.bf16.mxu0 %v5087_v49  ;;  %v3283_v49 = vld [vmem:[#allocation7 + $0x1a8] sm:$0xff] }
 0x31d   : > { %5090 = vmatpush1.bf16.msra.mxu0 %v5089_v22 }
 0x31e   : > { %5092 = vmatprep.subr.bf16.mxu0 %v5091_v61  ;;  %v5147_v61 = vpack.c.bf16 %v3283_v49, %v3282_v20 }
 0x321   : > { %5094 = vmatpush1.bf16.msra.mxu0 %v5093_v2  ;;  %v3285_v2 = vld [vmem:[#allocation7 + $0x1b8] sm:$0xff] }
 0x322   : > { %5096 = vmatprep.subr.bf16.mxu0 %v5095_v4 }
 0x325   : > { %5098 = vmatpush1.bf16.msra.mxu0 %v5097_v12  ;;  %v3268_v12 = vld [vmem:[#allocation7 + $0x130] sm:$0xff] }
 0x326   : > { %5100 = vmatprep.subr.bf16.mxu0 %v5099_v18  ;;  %v3286_v18 = vld [vmem:[#allocation7 + $0x1c0] sm:$0xff]  ;;  %v5153_v11 = vpack.c.bf16 %v3269_v59, %v3268_v12  ;;  %v3300_v59 = vld [vmem:[#allocation7 + $0x230] sm:$0xff] }
 0x329   : > { %5102 = vmatpush1.bf16.msra.mxu0 %v5101_v14  ;;  %v3289_v14 = vld [vmem:[#allocation7 + $0x1d8] sm:$0xff] }
 0x32a   : > { %5104 = vmatprep.subr.bf16.mxu0 %v5103_v32  ;;  %v5159_v34 = vpack.c.bf16 %v3289_v14, %v3288_v28  ;;  %v3307_v28 = vld [vmem:[#allocation7 + $0x268] sm:$0xff] }
 0x32d   : > { %5106 = vmatpush1.bf16.msra.mxu0 %v5105_v38  ;;  %v3273_v38 = vld [vmem:[#allocation7 + $0x158] sm:$0xff] }
 0x330   : > { %3167 = vmatmul.mubr.f32.vlgmr.msra.gmra.mrb[12].mxu0 %v6022_v13  ;;  %v3187_v13 = vmul.f32 %v6009_v54, %v6009_v54  ;;  %v3192_v54 = vmul.f32 %v6013_v3, %v6013_v3  ;;  %v3284_v3 = vld [vmem:[#allocation7 + $0x1b0] sm:$0xff] }
 0x331   : > { %3172 = vmatprep.mubr.f32.mxu0 %v6027_v60  ;;  %v5151_v10 = vpack.c.bf16 %v3285_v2, %v3284_v3  ;;  %v3298_v2 = vld [vmem:[#allocation7 + $0x220] sm:$0xff] }
 0x334   : > { %3173 = vmatmul.mubr.f32.gmra.mrb[14].mxu0 %v6032_v1  ;;  %v5141_v1 = vpack.c.bf16 %v3263_v40, %v3262_v15  ;;  %v5161_v15 = vpack.c.bf16 %v3273_v38, %v3272_v21  ;;  %v3274_v40 = vld [vmem:[#allocation7 + $0x160] sm:$0xff] }
 0x335   : > { %3178 = vmatprep.mubr.f32.mxu0 %v6036_v30 }
 0x338   : > { %3179 = vmatmul.mubr.f32.gmra.mrb[16].mxu0 %v5444_v19  ;;  %v3290_v19 = vld [vmem:[#allocation7 + $0x1e0] sm:$0xff] }
 0x382   : > { %v2836_v44 = vpop.f32.mrb[12].mxu1 }
 0x383   : > { %v3201_v42 = vmul.f32 %v2836_v44, %v2836_v44  ;;  %v2838_v16 = vpop.f32.mrb[13].mxu1  ;;  %v3291_v44 = vld [vmem:[#allocation7 + $0x1e8] sm:$0xff] }
 0x384   : > { %v3202_v60 = vmul.f32 %v2838_v16, %v2838_v16  ;;  %v3293_v16 = vld [vmem:[#allocation7 + $0x1f8] sm:$0xff] }
 0x385   : > { %v3216_v39 = vadd.f32 %v3201_v42, %v3186_v53  ;;  %v3275_v53 = vld [vmem:[#allocation7 + $0x168] sm:$0xff]  ;;  %v3292_v42 = vld [vmem:[#allocation7 + $0x1f0] sm:$0xff] }
 0x386   : > { %v6077_v46 = vadd.f32 %v3202_v60, %v3187_v13  ;;  %v2842_v30 = vpop.f32.mrb[14].mxu1  ;;  %v5165_v43 = vpack.c.bf16 %v3275_v53, %v3274_v40  ;;  %v5167_v25 = vpack.c.bf16 %v3293_v16, %v3292_v42  ;;  %v3276_v13 = vld [vmem:[#allocation7 + $0x170] sm:$0xff]  ;;  %v3277_v60 = vld [vmem:[#allocation7 + $0x178] sm:$0xff] }
 0x387   : > { %v3206_v31 = vmul.f32 %v2842_v30, %v2842_v30  ;;  %v2844_v23 = vpop.f32.mrb[15].mxu1  ;;  %3374 = vmatprep.mubr.f32.mxu1 %v3216_v39  ;;  %v5169_v39 = vpack.c.bf16 %v3277_v60, %v3276_v13 }
 0x388   : > { %v3207_v50 = vmul.f32 %v2844_v23, %v2844_v23  ;;  %3375 = vmatmul.mubr.f32.vlgmr.msra.gmra.mrb[18].mxu1 %v6054_v7  ;;  %v3197_v7 = vmul.f32 %v6017_v26, %v6017_v26  ;;  %v5155_v26 = vpack.c.bf16 %v3287_v27, %v3286_v18  ;;  %v3189_v23 = vmul.f32 %v6050_v52, %v6050_v52  ;;  %v3301_v18 = vld [vmem:[#allocation7 + $0x238] sm:$0xff] }
 0x389   : > { %v3221_v51 = vadd.f32 %v3206_v31, %v3191_v37  ;;  %5142 = vmatpush3.bf16.msra.mxu1 %v5141_v1  ;;  %v5612_v1 = vmov 0.0|0.0   ;;  %v5614_v27 = vmov 0.0  }
 0x38a   : > { %v6084_v56 = vadd.f32 %v3207_v50, %v3192_v54  ;;  %v2848_v22 = vpop.f32.mrb[16].mxu1  ;;  %5144 = vmatprep.subr.bf16.mxu1 %v5143_v48  ;;  %v3294_v48 = vld [vmem:[#allocation7 + $0x200] sm:$0xff] }
 0x38b   : > { %v3211_v0 = vmul.f32 %v2848_v22, %v2848_v22  ;;  %v2850_v45 = vpop.f32.mrb[17].mxu1  ;;  %3379 = vmatprep.mubr.f32.mxu1 %v3221_v51  ;;  %v5172_v54 = vpack.c.bf16 %v3295_v33, %v3294_v48  ;;  %v3297_v22 = vld [vmem:[#allocation7 + $0x218] sm:$0xff] }
 0x38c   : > { %v3212_v4 = vmul.f32 %v2850_v45, %v2850_v45  ;;  %3380 = vmatmul.mubr.f32.gmra.mrb[20].mxu1 %v6060_v35  ;;  %v3271_v35 = vld [vmem:[#allocation7 + $0x148] sm:$0xff] }
 0x38d   : > { %v3226_v17 = vadd.f32 %v3211_v0, %v3196_v63  ;;  %5146 = vmatpush3.bf16.msra.mxu1 %v5145_v55  ;;  %v5157_v32 = vpack.c.bf16 %v3271_v35, %v3270_v24  ;;  %v3296_v55 = vld [vmem:[#allocation7 + $0x210] sm:$0xff]  ;;  %v3305_v24 = vld [vmem:[#allocation7 + $0x258] sm:$0xff] }
 0x38e   : > { %v6091_v9 = vadd.f32 %v3212_v4, %v3197_v7  ;;  %5148 = vmatprep.subr.bf16.mxu1 %v5147_v61  ;;  %v3193_v61 = vmul.f32 %v6015_v6, %v6015_v6  ;;  %v5175_v0 = vpack.c.bf16 %v3297_v22, %v3296_v55  ;;  %v3299_v7 = vld [vmem:[#allocation7 + $0x228] sm:$0xff]  ;;  %v3198_v6 = vmul.f32 %v6019_v36, %v6019_v36 }
 0x38f   : > { %3384 = vmatprep.mubr.f32.mxu1 %v3226_v17  ;;  %v5181_v36 = vpack.c.bf16 %v3301_v18, %v3300_v59 }
 0x390   : > { %3385 = vmatmul.mubr.f32.gmra.mrb[22].mxu1 %v6066_v41  ;;  %v5163_v41 = vpack.c.bf16 %v3291_v44, %v3290_v19 }
 0x391   : > { %5150 = vmatpush3.bf16.msra.mxu1 %v5149_v5 }
 0x392   : > { %5152 = vmatprep.subr.bf16.mxu1 %v5151_v10  ;;  %v5178_v10 = vpack.c.bf16 %v3299_v7, %v3298_v2 }
 0x395   : > { %5154 = vmatpush3.bf16.msra.mxu1 %v5153_v11 }
 0x396   : > { %5156 = vmatprep.subr.bf16.mxu1 %v5155_v26  ;;  %v3304_v26 = vld [vmem:[#allocation7 + $0x250] sm:$0xff] }
 0x397   : > { %v5187_v35 = vpack.c.bf16 %v3305_v24, %v3304_v26 }
 0x399   : > { %5158 = vmatpush3.bf16.msra.mxu1 %v5157_v32  ;;  %v3308_v32 = vld [vmem:[#allocation7 + $0x270] sm:$0xff] }
 0x39a   : > { %5160 = vmatprep.subr.bf16.mxu1 %v5159_v34  ;;  %v3309_v34 = vld [vmem:[#allocation7 + $0x278] sm:$0xff] }
 0x39b   : > { %v5193_v21 = vpack.c.bf16 %v3309_v34, %v3308_v32 }
 0x39d   : > { %5162 = vmatpush3.bf16.msra.mxu1 %v5161_v15 }
 0x39e   : > { %5164 = vmatprep.subr.bf16.mxu1 %v5163_v41 }
 0x3a1   : > { %5166 = vmatpush3.bf16.msra.mxu1 %v5165_v43 }
 0x3a2   : > { %5168 = vmatprep.subr.bf16.mxu1 %v5167_v25 }
 0x3a5   : > { %5170 = vmatpush3.bf16.msra.mxu1 %v5169_v39 }
 0x3a6   : > { %5171 = vmatprep.subr.bf16.mxu1 %v5612_v1 }
 0x403   : > { %v3168_v30 = vpop.f32.mrb[12].mxu0 }
 0x404   : > { %v3203_v37 = vmul.f32 %v3168_v30, %v3168_v30  ;;  %v3170_v31 = vpop.f32.mrb[13].mxu0 }
 0x405   : > { %v3204_v20 = vmul.f32 %v3170_v31, %v3170_v31 }
 0x406   : > { %v3218_v49 = vadd.f32 %v3203_v37, %v3188_v57 }
 0x407   : > { %v3219_v50 = vadd.f32 %v3204_v20, %v3189_v23  ;;  %v3174_v51 = vpop.f32.mrb[14].mxu0 }
 0x408   : > { %v3208_v47 = vmul.f32 %v3174_v51, %v3174_v51  ;;  %v3176_v62 = vpop.f32.mrb[15].mxu0  ;;  %3454 = vmatprep.mubr.f32.mxu1 %v3218_v49 }
 0x409   : > { %v3209_v63 = vmul.f32 %v3176_v62, %v3176_v62  ;;  %3455 = vmatmul.mubr.f32.vlgmr.msra.gmra.mrb[24].mxu1 %v6077_v46 }
 0x40a   : > { %v3223_v52 = vadd.f32 %v3208_v47, %v3193_v61  ;;  %5173 = vmatpush3.bf16.msra.mxu1 %v5172_v54 }
 0x40b   : > { %v3224_v45 = vadd.f32 %v3209_v63, %v3194_v58  ;;  %v3180_v3 = vpop.f32.mrb[16].mxu0  ;;  %5174 = vmatprep.subr.bf16.mxu1 %v5612_v1 }
 0x40c   : > { %v3213_v4 = vmul.f32 %v3180_v3, %v3180_v3  ;;  %v3182_v17 = vpop.f32.mrb[17].mxu0  ;;  %3459 = vmatprep.mubr.f32.mxu1 %v3223_v52 }
 0x40d   : > { %v3214_v5 = vmul.f32 %v3182_v17, %v3182_v17  ;;  %3460 = vmatmul.mubr.f32.gmra.mrb[26].mxu1 %v6084_v56  ;;  %v3303_v56 = vld [vmem:[#allocation7 + $0x248] sm:$0xff] }
 0x40e   : > { %v3228_v46 = vadd.f32 %v3213_v4, %v3198_v6  ;;  %5176 = vmatpush3.bf16.msra.mxu1 %v5175_v0  ;;  %v5184_v11 = vpack.c.bf16 %v3303_v56, %v3302_v29 }
 0x40f   : > { %v3229_v12 = vadd.f32 %v3214_v5, %v3199_v8  ;;  %5177 = vmatprep.subr.bf16.mxu1 %v5612_v1 }
 0x410   : > { %3464 = vmatprep.mubr.f32.mxu1 %v3228_v46 }
 0x411   : > { %3465 = vmatmul.mubr.f32.gmra.mrb[28].mxu1 %v6091_v9  ;;  %v3306_v9 = vld [vmem:[#allocation7 + $0x260] sm:$0xff] }
 0x412   : > { %5179 = vmatpush3.bf16.msra.mxu1 %v5178_v10  ;;  %3818 = vmatprep.mubr.msk.f32.mxu1 %vm5613_vm0, %v5614_v27  ;;  %v5190_v14 = vpack.c.bf16 %v3307_v28, %v3306_v9 }
 0x413   : > { %5180 = vmatprep.subr.bf16.mxu1 %v5612_v1 }
 0x416   : > { %5182 = vmatpush3.bf16.msra.mxu1 %v5181_v36 }
 0x417   : > { %5183 = vmatprep.subr.bf16.mxu1 %v5612_v1 }
 0x41a   : > { %5185 = vmatpush3.bf16.msra.mxu1 %v5184_v11 }
 0x41b   : > { %5186 = vmatprep.subr.bf16.mxu1 %v5612_v1 }
 0x41e   : > { %5188 = vmatpush3.bf16.msra.mxu1 %v5187_v35 }
 0x41f   : > { %5189 = vmatprep.subr.bf16.mxu1 %v5612_v1 }
 0x422   : > { %5191 = vmatpush3.bf16.msra.mxu1 %v5190_v14 }
 0x423   : > { %5192 = vmatprep.subr.bf16.mxu1 %v5612_v1 }
 0x426   : > { %5194 = vmatpush3.bf16.msra.mxu1 %v5193_v21 }
 0x429   : > { %3819 = vmatmul.mubr.f32.vlgmr.msra.gmra.mrb[30].mxu1 %v3219_v50 }
 0x42a   : > { %3821 = vmatprep.mubr.msk.f32.mxu1 %vm5613_vm0, %v5614_v27 }
 0x42d   : > { %3822 = vmatmul.mubr.f32.gmra.mrb[32].mxu1 %v3224_v45 }
 0x42e   : > { %3824 = vmatprep.mubr.msk.f32.mxu1 %vm5613_vm0, %v5614_v27 }
 0x431   : > { %3825 = vmatmul.mubr.f32.gmra.mrb[34].mxu1 %v3229_v12 }
 0x45b   : > { %v3717_v38 = vpop.f32.mrb[18].mxu1 }
 0x45c   : > { %v3718_v19 = vpop.f32.mrb[19].mxu1 }
 0x45d   : > { %v3719_v44 = vadd.f32 %v3718_v19, %v3717_v38 }
 0x45f   : > { %v3720_v15 = vpop.f32.mrb[20].mxu1 }
 0x460   : > { %v3721_v41 = vpop.f32.mrb[21].mxu1 }
 0x461   : > { %v3722_v40 = vadd.f32 %v3721_v41, %v3720_v15 }
 0x463   : > { %v3723_v53 = vpop.f32.mrb[22].mxu1 }
 0x464   : > { %v3724_v42 = vpop.f32.mrb[23].mxu1 }
 0x465   : > { %v3725_v16 = vadd.f32 %v3724_v42, %v3723_v53 }
 0x4dc   : > { %v3758_v43 = vpop.f32.mrb[24].mxu1 }
 0x4dd   : > { %v3759_v25 = vpop.f32.mrb[25].mxu1 }
 0x4de   : > { %v3760_v13 = vadd.f32 %v3759_v25, %v3758_v43 }
 0x4e0   : > { %v3761_v60 = vpop.f32.mrb[26].mxu1  ;;  %v3457_v39 = vadd.f32 %v3760_v13, %v3719_v44 }
 0x4e1   : > { %v3762_v1 = vpop.f32.mrb[27].mxu1 }
 0x4e2   : > { %v3763_v30 = vadd.f32 %v3762_v1, %v3761_v60 }
 0x4e4   : > { %v3764_v48 = vpop.f32.mrb[28].mxu1  ;;  %v3462_v33 = vadd.f32 %v3763_v30, %v3722_v40 }
 0x4e5   : > { %v3765_v57 = vpop.f32.mrb[29].mxu1 }
 0x4e6   : > { %v3766_v37 = vadd.f32 %v3765_v57, %v3764_v48 }
 0x4e8   : > { %v3467_v31 = vadd.f32 %v3766_v37, %v3725_v16 }
 0x4fc   : > { %v3536_v23 = vpop.f32.mrb[30].mxu1 }
 0x4fd   : > { %v3537_v20 = vadd.f32 %v3536_v23, %v3457_v39  ;;  %v3820_v49 = vpop.f32.mrb[31].mxu1 }
 0x4ff   : > { %v3550_v54 = vmax.f32 %v3537_v20, 1e-05 }
 0x500   : > { %v3541_v50 = vpop.f32.mrb[32].mxu1 }
 0x501   : > { %5366 = vlog2.f32 %v3550_v54  ;;  %v3542_v51 = vadd.f32 %v3541_v50, %v3462_v33  ;;  %v3823_v55 = vpop.f32.mrb[33].mxu1 }
 0x503   : > { %v3551_v22 = vmax.f32 %v3542_v51, 1e-05 }
 0x504   : > { %v3546_v61 = vpop.f32.mrb[34].mxu1 }
 0x505   : > { %5368 = vlog2.f32 %v3551_v22  ;;  %v3547_v47 = vadd.f32 %v3546_v61, %v3467_v31  ;;  %v3826_v62 = vpop.f32.mrb[35].mxu1 }
 0x507   : > { %v3552_v58 = vmax.f32 %v3547_v47, 1e-05 }
 0x509   : > { %5370 = vlog2.f32 %v3552_v58 }
 0x50b   : > { %v5367_v63 = vpop.eup %5366 }
 0x50c   : > { %v3554_v52 = vmul.f32 0.6931472, %v5367_v63 }
 0x50e   : > { %3559 = vst [vmem:[%s218_s20] sm:$0xff] %v3554_v52 }
 0x50f   : > { %v5369_v0 = vpop.eup %5368 }
 0x510   : > { %v3556_v45 = vmul.f32 0.6931472, %v5369_v0 }
 0x512   : > { %3560 = vst [vmem:[%s218_s20 + $0x8] sm:$0xff] %v3556_v45 }
 0x513   : > { %v5371_v3 = vpop.eup %5370 }
 0x514   : > { %v3558_v2 = vmul.f32 0.6931472, %v5371_v3 }
 0x516   : > { %3561 = vst [vmem:[%s218_s20 + $0x10] sm:$0xff] %v3558_v2 }
 0x517   : > { %5544 = shalt.err (!%p5541_p2)
}
 0x518   : > { %s5545_s21 = scalar_lea.hbm %s6127_s7, 384  ;;  %s5549_s30 = scalar_lea.hbm %s6174_s3, 768 }
 0x519   : > { %p5546_p13 = scmp.ne.s32.totalorder %s6127_s7, %s5545_s21  ;;  %p5550_p4 = scmp.lt.u32.totalorder %s6127_s7, %s6174_s3 }
 0x51a   : > { %p5551_p7 = scmp.lt.u32.totalorder %s5549_s30, %s5545_s21  ;;  %p5553_p11 = scmp.lt.u32.totalorder %s5545_s21, %s6127_s7 }
 0x51b   : > { %p5547_p6 = pnand %p5546_p13, %p6188_p0 }
 0x51c   : > { %p5552_p8 = por %p5551_p7, %p5550_p4 }
 0x51d   : > { %p5548_p10 = pneg %p5547_p6 }
 0x51e   : > { %p5554_p1 = por %p5553_p11, %p5552_p8 }
 0x520   : > { %p5555_p3 = pnand %p5554_p1, %p5548_p10 }
 0x522   : > { %5558 = shalt.err (!%p5555_p3)
}
 0x523   : > { %s5616_s18 = smov 128   ;;  %s5617_s20 = smov 8  }
 0x524   : > { %5298 = dma.vmem_to_hbm [thread:$0]  (%p6188_p0), %s6122_s17, 384, %s6127_s7, %s3563_s8, %s5616_s18, %s5616_s18, %s5617_s20  }
 0x525 PF: > { %s3591_s26 = sand.u32 1, %s5589_s12   ;;  %p6189_p5 = scmp.ne.s32.totalorder %s6179_s19, 0 }
 0x526   : > { %p6190_p9 = scmp.ge.s32.totalorder %s5601_s15, 2  ;;  %s3592_s28 = scalar_lea.sflag [#allocation4], %s3591_s26 }
 0x528   : > { %p5312_p12 = pnand %p6190_p9, %p6189_p5 }
 0x52a   : > { %5584 = dma.done.wait (!%p5312_p12), %s3592_s28, 384  }
 0x52b   : > { %5586 = vsyncadd (!%p5312_p12), %s3592_s28, 4294966912  ;;  %p17_p2 = scmp.ge.s32.totalorder %s5748_s6, 4   ;;  %s6191_s12 = smov %s5593_s13 }
 0x52c   : > { %s6192_s13 = smov %s5597_s14  ;;  %s6193_s14 = smov %s5757_s9 }
 0x52d   : > { %s6194_s15 = smov %s5748_s6  ;;  %19 = sbr.rel (!%p17_p2) target bundleno = 6 (0x6), region = 85 }
 0x534   :  { %3597 = vsyncpa [#allocation3], 1 }
 0x535   :  { %3599 = vsyncpa [#allocation3 + $0x1], 1 }
 0x536   :  { %3600 = vsyncpa [#allocation6], 1 }
 0x537   :  { %3601 = vsyncpa [#allocation4], 1 }
 0x538   :  { %3603 = vsyncpa [#allocation4 + $0x1], 1 }

</bundles_post_ra>
